<compile_context>
chip_gen: v5e
topology: v5e:2x2
jax: 0.10.0
libtpu: 0.0.40
codegen_flags: <defaults>
</compile_context>

<pallas_src>
import jax
import jax.numpy as jnp
from jax import lax
from jax.experimental import pallas as pl
from jax.experimental.pallas import tpu as pltpu


def _round_up(x, m):
    return (x + m - 1) // m * m


def _asm2vec_v_kernel(idx_ref, emb_ref, embf_ref, out_ref):
    # idx_ref : VMEM (TB, 7)  int32   -- col 0 = function id, cols 1..6 = tokens
    # emb_ref : VMEM (V, E)   f32     -- token table, resident across the grid
    # embf_ref: VMEM (F, 2E)  f32     -- function table, resident across the grid
    # out_ref : VMEM (TB, 2E) f32
    idx = idx_ref[...]
    emb = emb_ref[...]
    embf = embf_ref[...]

    tb = idx.shape[0]
    V, E = emb.shape
    F = embf.shape[0]

    iota_v = lax.broadcasted_iota(jnp.int32, (tb, V), 1)
    iota_f = lax.broadcasted_iota(jnp.int32, (tb, F), 1)

    def oh_v(col):
        return (iota_v == idx[:, col:col + 1]).astype(jnp.float32)

    # Function embedding gather: (TB, F) @ (F, 2E)
    w_f = (iota_f == idx[:, 0:1]).astype(jnp.float32)
    vf = jnp.dot(w_f, embf,
                 preferred_element_type=jnp.float32,
                 precision=lax.Precision.HIGHEST)

    # First output half needs e0 + e3; second half needs (e1+e2)/2 + (e4+e5)/2.
    # Fold the weights into the one-hot matrices -> 2 matmuls total on the MXU.
    w_first = oh_v(1) + oh_v(4)
    w_second = (oh_v(2) + oh_v(3) + oh_v(5) + oh_v(6)) * 0.5

    first = jnp.dot(w_first, emb,
                    preferred_element_type=jnp.float32,
                    precision=lax.Precision.HIGHEST)     # (TB, E) = e0 + e3
    second = jnp.dot(w_second, emb,
                     preferred_element_type=jnp.float32,
                     precision=lax.Precision.HIGHEST)    # (TB, E) = (e1+e2)/2 + (e4+e5)/2

    third = jnp.float32(1.0 / 3.0)
    # Assemble the full (TB, 2E) tile and write it with one unmasked, lane-dense store.
    halves = jnp.concatenate([first, second], axis=1)    # (TB, 2E)
    out_ref[...] = (vf + halves) * third


def asm2vec_v(inp, emb, emb_f, *, tb=128):
    """Pallas implementation of ASM2VEC.v (the DisasmEmbedding forward pass)."""
    B = inp.shape[0]
    V, E = emb.shape
    F, E2 = emb_f.shape
    assert E2 == 2 * E and inp.shape[1] == 7

    # Batch tile: multiple of 8 sublanes, <= 128 per step; pad B up to a multiple.
    tb = min(tb, _round_up(B, 8))
    b_pad = _round_up(B, tb)
    if b_pad != B:
        pad = jnp.zeros((b_pad - B, 7), dtype=inp.dtype)   # index 0 is always valid
        inp = jnp.concatenate([inp, pad], axis=0)

    grid = (b_pad // tb,)

    grid_spec = pltpu.PrefetchScalarGridSpec(
        num_scalar_prefetch=0,
        grid=grid,
        in_specs=[
            pl.BlockSpec((tb, 7), lambda b: (b, 0)),        # index tile
            pl.BlockSpec((V, E), lambda b: (0, 0)),         # token table (resident)
            pl.BlockSpec((F, 2 * E), lambda b: (0, 0)),     # function table (resident)
        ],
        out_specs=pl.BlockSpec((tb, 2 * E), lambda b: (b, 0)),
    )

    # VMEM budget: tables (conservatively 2x for pipeline buffers) + double-buffered
    # idx/out tiles + margin.
    table_bytes = (V * E + F * 2 * E) * 4
    io_bytes = 2 * (tb * 7 * 4) + 2 * (tb * 2 * E * 4)
    vmem_limit = min(max(2 * table_bytes + io_bytes + (4 << 20), 16 << 20), 48 << 20)

    out = pl.pallas_call(
        _asm2vec_v_kernel,
        out_shape=jax.ShapeDtypeStruct((b_pad, 2 * E), jnp.float32),
        grid_spec=grid_spec,
        compiler_params=pltpu.CompilerParams(
            dimension_semantics=("parallel",),
            vmem_limit_bytes=vmem_limit,
        ),
    )(inp, emb, emb_f)

    return out[:B, :, None]                    # [B, 2E, 1], matches unsqueeze(2)


def asm2vec_v_ref(inp, emb, emb_f):
    """Pure-JAX reference mirroring the PyTorch semantics."""
    e = emb[inp[:, 1:]]                                       # [B, 6, E]
    v_f = emb_f[inp[:, 0]]                                    # [B, 2E]
    v_prev = jnp.concatenate([e[:, 0], (e[:, 1] + e[:, 2]) / 2], axis=1)
    v_next = jnp.concatenate([e[:, 3], (e[:, 4] + e[:, 5]) / 2], axis=1)
    return ((v_f + v_prev + v_next) / 3.0)[:, :, None]


if __name__ == "__main__":
    # Small deterministic setup consistent with the module's __init__ defaults
    # (embedding_size=64 so 2E=128 -> lane-dense output blocks).
    B = 200             # batch of (function, prev-inst, next-inst) samples (exercises padding)
    E = 64              # embedding_size (module default)
    VOCAB = 200         # token vocabulary size
    NFUNC = 16          # number of functions

    key = jax.random.PRNGKey(0)
    k_emb, k_embf, k_fid, k_tok = jax.random.split(key, 4)

    # Deterministic synthetic parameters (ASM2VEC-style small init).
    emb = jax.random.normal(k_emb, (VOCAB, E), dtype=jnp.float32) * 0.1
    emb_f = ((jax.random.uniform(k_embf, (NFUNC, 2 * E), dtype=jnp.float32) - 0.5)
             / E / 2.0)

    # Input: [B, 7] = [function_id, 6 context token ids]
    fid = jax.random.randint(k_fid, (B, 1), 0, NFUNC, dtype=jnp.int32)
    tok = jax.random.randint(k_tok, (B, 6), 0, VOCAB, dtype=jnp.int32)
    inp = jnp.concatenate([fid, tok], axis=1)

    out = jax.block_until_ready(asm2vec_v(inp, emb, emb_f))

    ref = asm2vec_v_ref(inp, emb, emb_f)
    assert out.shape == (B, 2 * E, 1)
    assert jnp.allclose(out, ref, atol=1e-5, rtol=1e-5)

    print("KERNEL_OK")
</pallas_src>

<mosaic_0001>
module attributes {stable_mosaic.version = 11 : i64} {
  func.func @_asm2vec_v_kernel(%arg0: i32, %arg1: memref<128x7xi32, #tpu.memory_space<vmem>>, %arg2: memref<200x64xf32, #tpu.memory_space<vmem>>, %arg3: memref<16x128xf32, #tpu.memory_space<vmem>>, %arg4: memref<128x128xf32, #tpu.memory_space<vmem>>) attributes {dimension_semantics = [#tpu.dimension_semantics<parallel>], iteration_bounds = array<i64: 2>, scalar_prefetch = 0 : i64, scratch_operands = 0 : i64, tpu.core_type = #tpu.core_type<tc>, window_params = [{transform_indices = @transform_0, window_bounds = array<i64: 128, 7>}, {pipeline_mode = #tpu.pipeline_mode<synchronous>, transform_indices = @transform_1, window_bounds = array<i64: 200, 64>}, {pipeline_mode = #tpu.pipeline_mode<synchronous>, transform_indices = @transform_2, window_bounds = array<i64: 16, 128>}, {transform_indices = @transform_3, window_bounds = array<i64: 128, 128>}]} {
    %c0 = arith.constant 0 : index
    %c0_0 = arith.constant 0 : index
    %0 = vector.load %arg1[%c0, %c0_0] : memref<128x7xi32, #tpu.memory_space<vmem>>, vector<128x7xi32>
    %c0_1 = arith.constant 0 : index
    %c0_2 = arith.constant 0 : index
    %1 = vector.load %arg2[%c0_1, %c0_2] : memref<200x64xf32, #tpu.memory_space<vmem>>, vector<200x64xf32>
    %c0_3 = arith.constant 0 : index
    %c0_4 = arith.constant 0 : index
    %2 = vector.load %arg3[%c0_3, %c0_4] : memref<16x128xf32, #tpu.memory_space<vmem>>, vector<16x128xf32>
    %3 = tpu.iota {dimensions = array<i32: 1>} : vector<128x200xi32>
    %4 = tpu.iota {dimensions = array<i32: 1>} : vector<128x16xi32>
    %5 = vector.extract_strided_slice %0 {offsets = [0, 0], sizes = [128, 1], strides = [1, 1]} : vector<128x7xi32> to vector<128x1xi32>
    %6 = vector.broadcast %5 : vector<128x1xi32> to vector<128x16xi32>
    %7 = arith.cmpi eq, %4, %6 : vector<128x16xi32>
    %8 = arith.extui %7 : vector<128x16xi1> to vector<128x16xi32>
    %9 = arith.sitofp %8 : vector<128x16xi32> to vector<128x16xf32>
    %cst = arith.constant dense<0.000000e+00> : vector<128x128xf32>
    %10 = tpu.matmul %9, %2, %cst {dimension_numbers = #tpu.dot_dimension_numbers<[1], [0], [0], [1], [0, 0, 1, 1], [], []>, precision = #tpu.contract_precision<fp32>} : vector<128x16xf32>, vector<16x128xf32>, vector<128x128xf32> -> vector<128x128xf32>
    %11 = vector.extract_strided_slice %0 {offsets = [0, 1], sizes = [128, 1], strides = [1, 1]} : vector<128x7xi32> to vector<128x1xi32>
    %12 = vector.broadcast %11 : vector<128x1xi32> to vector<128x200xi32>
    %13 = arith.cmpi eq, %3, %12 : vector<128x200xi32>
    %14 = arith.extui %13 : vector<128x200xi1> to vector<128x200xi32>
    %15 = arith.sitofp %14 : vector<128x200xi32> to vector<128x200xf32>
    %16 = vector.extract_strided_slice %0 {offsets = [0, 4], sizes = [128, 1], strides = [1, 1]} : vector<128x7xi32> to vector<128x1xi32>
    %17 = vector.broadcast %16 : vector<128x1xi32> to vector<128x200xi32>
    %18 = arith.cmpi eq, %3, %17 : vector<128x200xi32>
    %19 = arith.extui %18 : vector<128x200xi1> to vector<128x200xi32>
    %20 = arith.sitofp %19 : vector<128x200xi32> to vector<128x200xf32>
    %21 = arith.addf %15, %20 : vector<128x200xf32>
    %22 = vector.extract_strided_slice %0 {offsets = [0, 2], sizes = [128, 1], strides = [1, 1]} : vector<128x7xi32> to vector<128x1xi32>
    %23 = vector.broadcast %22 : vector<128x1xi32> to vector<128x200xi32>
    %24 = arith.cmpi eq, %3, %23 : vector<128x200xi32>
    %25 = arith.extui %24 : vector<128x200xi1> to vector<128x200xi32>
    %26 = arith.sitofp %25 : vector<128x200xi32> to vector<128x200xf32>
    %27 = vector.extract_strided_slice %0 {offsets = [0, 3], sizes = [128, 1], strides = [1, 1]} : vector<128x7xi32> to vector<128x1xi32>
    %28 = vector.broadcast %27 : vector<128x1xi32> to vector<128x200xi32>
    %29 = arith.cmpi eq, %3, %28 : vector<128x200xi32>
    %30 = arith.extui %29 : vector<128x200xi1> to vector<128x200xi32>
    %31 = arith.sitofp %30 : vector<128x200xi32> to vector<128x200xf32>
    %32 = arith.addf %26, %31 : vector<128x200xf32>
    %33 = vector.extract_strided_slice %0 {offsets = [0, 5], sizes = [128, 1], strides = [1, 1]} : vector<128x7xi32> to vector<128x1xi32>
    %34 = vector.broadcast %33 : vector<128x1xi32> to vector<128x200xi32>
    %35 = arith.cmpi eq, %3, %34 : vector<128x200xi32>
    %36 = arith.extui %35 : vector<128x200xi1> to vector<128x200xi32>
    %37 = arith.sitofp %36 : vector<128x200xi32> to vector<128x200xf32>
    %38 = arith.addf %32, %37 : vector<128x200xf32>
    %39 = vector.extract_strided_slice %0 {offsets = [0, 6], sizes = [128, 1], strides = [1, 1]} : vector<128x7xi32> to vector<128x1xi32>
    %40 = vector.broadcast %39 : vector<128x1xi32> to vector<128x200xi32>
    %41 = arith.cmpi eq, %3, %40 : vector<128x200xi32>
    %42 = arith.extui %41 : vector<128x200xi1> to vector<128x200xi32>
    %43 = arith.sitofp %42 : vector<128x200xi32> to vector<128x200xf32>
    %44 = arith.addf %38, %43 : vector<128x200xf32>
    %cst_5 = arith.constant 5.000000e-01 : f32
    %45 = vector.broadcast %cst_5 : f32 to vector<128x200xf32>
    %46 = arith.mulf %44, %45 : vector<128x200xf32>
    %cst_6 = arith.constant dense<0.000000e+00> : vector<128x64xf32>
    %47 = tpu.matmul %21, %1, %cst_6 {dimension_numbers = #tpu.dot_dimension_numbers<[1], [0], [0], [1], [0, 0, 1, 1], [], []>, precision = #tpu.contract_precision<fp32>} : vector<128x200xf32>, vector<200x64xf32>, vector<128x64xf32> -> vector<128x64xf32>
    %cst_7 = arith.constant dense<0.000000e+00> : vector<128x64xf32>
    %48 = tpu.matmul %46, %1, %cst_7 {dimension_numbers = #tpu.dot_dimension_numbers<[1], [0], [0], [1], [0, 0, 1, 1], [], []>, precision = #tpu.contract_precision<fp32>} : vector<128x200xf32>, vector<200x64xf32>, vector<128x64xf32> -> vector<128x64xf32>
    %49 = tpu.concatenate %47, %48 in 1 : vector<128x64xf32>, vector<128x64xf32> -> vector<128x128xf32>
    %50 = arith.addf %10, %49 : vector<128x128xf32>
    %cst_8 = arith.constant 0.333333343 : f32
    %51 = vector.broadcast %cst_8 : f32 to vector<128x128xf32>
    %52 = arith.mulf %50, %51 : vector<128x128xf32>
    %c0_9 = arith.constant 0 : index
    %c0_10 = arith.constant 0 : index
    %53 = vector.load %arg4[%c0_9, %c0_10] : memref<128x128xf32, #tpu.memory_space<vmem>>, vector<128x128xf32>
    tpu.vector_store %arg4[%c0_9, %c0_10], %52 {strides = array<i32>} : memref<128x128xf32, #tpu.memory_space<vmem>>, vector<128x128xf32>,
    return
  }
  func.func @transform_0(%arg0: i32) -> (i32, i32) {
    %c0_i32 = arith.constant 0 : i32
    %c0_i32_0 = arith.constant 0 : i32
    return %arg0, %c0_i32 : i32, i32
  }
  func.func @transform_1(%arg0: i32) -> (i32, i32) {
    %c0_i32 = arith.constant 0 : i32
    %c0_i32_0 = arith.constant 0 : i32
    %c0_i32_1 = arith.constant 0 : i32
    return %c0_i32, %c0_i32_0 : i32, i32
  }
  func.func @transform_2(%arg0: i32) -> (i32, i32) {
    %c0_i32 = arith.constant 0 : i32
    %c0_i32_0 = arith.constant 0 : i32
    %c0_i32_1 = arith.constant 0 : i32
    return %c0_i32, %c0_i32_0 : i32, i32
  }
  func.func @transform_3(%arg0: i32) -> (i32, i32) {
    %c0_i32 = arith.constant 0 : i32
    %c0_i32_0 = arith.constant 0 : i32
    return %arg0, %c0_i32 : i32, i32
  }
}

</mosaic_0001>

<bundles_post_ra>
// kernel: tpu_custom_call.1
= control target key start
LH: loop header
LB: loop body
LE: loop exit
PB: predicated region body
PF: predicated region fallthrough
CT: control target
= control target key end

     0   :  { %8 = vsyncpa [#allocation3], 0  ;;  %s9643_s0 = inlined_call_operand.vmem [shape: s32[256,7], index: 0, kind: input, shape index: {}]   ;;  %s9644_s1 = inlined_call_operand.vmem [shape: f32[200,64], index: 1, kind: input, shape index: {}]   ;;  %s9645_s2 = inlined_call_operand.vmem [shape: f32[16,128], index: 2, kind: input, shape index: {}]   ;;  %s9646_s3 = inlined_call_operand.hbm [shape: f32[256,128], index: 3, kind: output, shape index: {}]  }
   0x1   :  { %10 = vsyncpa [#allocation3 + $0x1], 0  ;;  %s5903_s12 = smov 0   ;;  %s5905_s13 = smov 0  }
   0x2   :  { %s5907_s14 = smov 0   ;;  %s5909_s15 = smov 0  }
   0x3 LB: > { %s5924_s16 = sadd.s32 4294967295, %s5870_s15   ;;  %s5341_s17 = sadd.s32 4294967294, %s5870_s15   ;;  %s5870_s15 = sphi %s5909_s15, %s10394_s15   ;;  %s5866_s14 = sphi %s5907_s14, %s10393_s14   ;;  %s5862_s13 = sphi %s5905_s13, %s10392_s13   ;;  %s5858_s12 = sphi %s5903_s12, %s10391_s12  }
   0x4   : > { %s5928_s18 = sadd.s32 1, %s5870_s15   ;;  %s91_s19 = sadd.s32 1, %s5866_s14 }
   0x5   : > { %s88_s20 = ssub.s32 %s5870_s15, %s5928_s18  ;;  %p101_p0 = scmp.ne.s32.totalorder %s5866_s14, %s5862_s13 }
   0x6   : > { %p89_p1 = scmp.eq.s32.totalorder %s88_s20, 0  ;;  %p102_p2 = scmp.eq.s32.totalorder %s5924_s16, 1 }
   0x7   : > { %p107_p3 = scmp.ne.s32.totalorder %s5862_s13, %s5858_s12  ;;  %p108_p4 = scmp.eq.s32.totalorder %s5341_s17, 1 }
   0x8   : > { %s5939_s21 = scalar_select %p89_p1, %s5866_s14, %s91_s19  }
   0x9   : > { %p5941_p5 = por %p102_p2, %p101_p0  ;;  %p5945_p6 = por %p108_p4, %p107_p3 }
   0xa   : > { %p5344_p7 = scmp.ge.s32.totalorder %s5870_s15, 1  ;;  %p141_p8 = scmp.lt.s32.totalorder %s5870_s15, 3 }
   0xc   : > { %p142_p9 = pnand %p5344_p7, %p141_p8 }
   0xe   : > { %145 = sbr.rel (%p142_p9) target bundleno = 1290 (0x50a), region = 32 }
  0x13   : > { %s5346_s24 = sshll.u32 %s5924_s16, 4  ;;  %v9647_v0 = vmov 1   ;;  %v9648_v4 = vmov 4   ;;  %v203_v13 = vld [vmem:[%s9644_s1 + $0x78] sm:$0xff]  ;;  %v202_v15 = vld [vmem:[%s9644_s1 + $0x70] sm:$0xff]  ;;  %v201_v18 = vld [vmem:[%s9644_s1 + $0x68] sm:$0xff] }
  0x14   : > { %5694 = vset.pattern.permute.xlu1 %v9647_v0  ;;  %5692 = vset.pattern.permute.xlu0 %v9647_v0  ;;  %p166_p10 = scmp.lt.s32.totalorder %s5346_s24, 31  ;;  %v5988_v14 = vand.u32 4294901760, %v203_v13  ;;  %v5997_v17 = vand.u32 4294901760, %v202_v15  ;;  %v6011_v21 = vand.u32 4294901760, %v201_v18  ;;  %v200_v23 = vld [vmem:[%s9644_s1 + $0x60] sm:$0xff]  ;;  %v199_v29 = vld [vmem:[%s9644_s1 + $0x58] sm:$0xff] }
  0x15   : > { %5696 = vset.pattern.permute.xlu2 %v9647_v0  ;;  %v6030_v28 = vand.u32 4294901760, %v200_v23  ;;  %v6048_v34 = vand.u32 4294901760, %v199_v29  ;;  %v198_v35 = vld [vmem:[%s9644_s1 + $0x50] sm:$0xff]  ;;  %v197_v41 = vld [vmem:[%s9644_s1 + $0x48] sm:$0xff]  ;;  %v196_v47 = vld [vmem:[%s9644_s1 + $0x40] sm:$0xff]  ;;  %s5880_s4 = smov 64  }
  0x16   : > { %s10396_s24 = smov (!%p166_p10, %s5346_s24), 31  ;;  %1388 = vmatpush.msra.mxu0 %v5988_v14  ;;  %v5995_v16 = vsub.f32 %v203_v13, %v5988_v14  ;;  %5610 = vmatpush.msra.mxu2 %v5988_v14  ;;  %v6009_v20 = vsub.f32 %v202_v15, %v5997_v17  ;;  %v6028_v27 = vsub.f32 %v201_v18, %v6011_v21  ;;  %v6063_v39 = vand.u32 4294901760, %v198_v35  ;;  %v195_v53 = vld [vmem:[%s9644_s1 + $0x38] sm:$0xff]  ;;  %v194_v59 = vld [vmem:[%s9644_s1 + $0x30] sm:$0xff]  ;;  %s162_s5 = sand.u32 1, %s5862_s13  }
  0x17   : > { %s5347_s25 = sshll.u32 %s10396_s24, 3  ;;  %v6046_v33 = vsub.f32 %v200_v23, %v6030_v28  ;;  %v6067_v40 = vsub.f32 %v199_v29, %v6048_v34  ;;  %v6082_v45 = vand.u32 4294901760, %v197_v41  ;;  %v6101_v51 = vand.u32 4294901760, %v196_v47  ;;  %s5345_s6 = sshll.u32 %s162_s5, 7 }
  0x18   : > { %s5958_s28 = scalar_lea.vmem %s9643_s0, %s5347_s25  ;;  %9905 = vst [vmem:[#allocation5_spill] sm:$0xff] %v5995_v16  ;;  %v6005_v19 = vand.u32 4294901760, %v5995_v16  ;;  %1390 = vmatpush.msra.mxu0 %v5997_v17  ;;  %v6024_v26 = vand.u32 4294901760, %v6009_v20  ;;  %5611 = vmatpush.msra.mxu2 %v5997_v17  ;;  %v6042_v32 = vand.u32 4294901760, %v6028_v27  ;;  %v6080_v44 = vsub.f32 %v198_v35, %v6063_v39  ;;  %s9538_s7 = scalar_lea.vmem [#allocation2], %s5345_s6 }
  0x19   : > { %v181_v1 = vld [vmem:[%s5958_s28 + $0x48] sm:$0xff]  ;;  %v180_v2 = vld [vmem:[%s5958_s28 + $0x40] sm:$0xff]  ;;  %v174_v5 = vld [vmem:[%s5958_s28 + $0x10] sm:$0xff]  ;;  %9907 = vst [vmem:[#allocation7_spill] sm:$0xff] %v6009_v20  ;;  %v6061_v38 = vand.u32 4294901760, %v6046_v33  ;;  %v6085_v46 = vand.u32 4294901760, %v6067_v40  ;;  %v6099_v50 = vsub.f32 %v197_v41, %v6082_v45  ;;  %v6117_v56 = vsub.f32 %v196_v47, %v6101_v51 }
  0x1a   : > { %v172_v3 = vld [vmem:[%s5958_s28] sm:$0xff]  ;;  %342 = vperm.xlu1 %5694, %v181_v1   ;;  %339 = vperm.xlu0 %5692, %v180_v2   ;;  %v182_v6 = vld [vmem:[%s5958_s28 + $0x50] sm:$0xff]  ;;  %v173_v7 = vld [vmem:[%s5958_s28 + $0x8] sm:$0xff]  ;;  %9906 = vst [vmem:[#allocation6_spill] sm:$0xff] %v6005_v19  ;;  %v1551_v25 = vsub.f32 %v5995_v16, %v6005_v19  ;;  %v1557_v31 = vsub.f32 %v6009_v20, %v6024_v26  ;;  %v6096_v49 = vand.u32 4294901760, %v6080_v44  ;;  %v6119_v57 = vand.u32 4294901760, %v195_v53 }
  0x1b   : > { %315 = vperm.xlu2 %5696, %v172_v3   ;;  %v183_v8 = vld [vmem:[%s5958_s28 + $0x58] sm:$0xff]  ;;  %v185_v9 = vld [vmem:[%s5958_s28 + $0x68] sm:$0xff]  ;;  %v5976_v10 = vld [vmem:[%s5958_s28 + $0x70] sm:$0xff]  ;;  %9908 = vst [vmem:[#allocation8_spill] sm:$0xff] %v6024_v26  ;;  %1392 = vmatpush.msra.mxu0 %v6011_v21  ;;  %v1563_v37 = vsub.f32 %v6028_v27, %v6042_v32  ;;  %v1569_v43 = vsub.f32 %v6046_v33, %v6061_v38  ;;  %v6114_v55 = vand.u32 4294901760, %v6099_v50  ;;  %v6134_v62 = vand.u32 4294901760, %v6117_v56 }
  0x1c   : > { %v184_v11 = vld [vmem:[%s5958_s28 + $0x60] sm:$0xff]  ;;  %v175_v12 = vld [vmem:[%s5958_s28 + $0x18] sm:$0xff]  ;;  %v6019_v24 = vld [vmem:[%s5958_s28 + $0x30] sm:$0xff]  ;;  %9909 = vst [vmem:[#allocation9_spill] sm:$0xff] %v6028_v27  ;;  %v6037_v30 = vand.u32 4294901760, %v1551_v25  ;;  %5612 = vmatpush.msra.mxu2 %v6011_v21  ;;  %v6056_v36 = vand.u32 4294901760, %v1557_v31  ;;  %v1575_v52 = vsub.f32 %v6067_v40, %v6085_v46  ;;  %v1581_v54 = vsub.f32 %v6080_v44, %v6096_v49 }
  0x1d   : > { %v176_v22 = vld [vmem:[%s5958_s28 + $0x20] sm:$0xff]  ;;  %9910 = vst [vmem:[#allocation10_spill] sm:$0xff] %v6042_v32  ;;  %1394 = vmatpush.msra.mxu0 %v6030_v28  ;;  %v6075_v42 = vand.u32 4294901760, %v1563_v37  ;;  %v6093_v48 = vand.u32 4294901760, %v1569_v43  ;;  %v1587_v61 = vsub.f32 %v6099_v50, %v6114_v55  ;;  %v6137_v63 = vsub.f32 %v195_v53, %v6119_v57  ;;  %v190_v37 = vld [vmem:[%s9644_s1 + $0x10] sm:$0xff]  ;;  %v187_v53 = vld [vmem:[%s5958_s28 + $0x78] sm:$0xff] }
  0x1e   : > { %9911 = vst [vmem:[#allocation11_spill] sm:$0xff] %v6046_v33  ;;  %1553 = vmatpush.msra.mxu1 %v6037_v30  ;;  %5626 = vmatpush.msra.mxu3 %v6037_v30  ;;  %v6123_v58 = vand.u32 4294901760, %v1575_v52  ;;  %v6129_v60 = vand.u32 4294901760, %v1581_v54  ;;  %v6217_v52 = vand.u32 4294901760, %v190_v37  ;;  %s5609_s8 = sshll.u32 %s5924_s16, 7  ;;  %s5276_s17 = sshll.u32 %s9538_s7, 4  ;;  %s5277_s17 = int_to_ptr.vmem [resolvable:$true] %s5276_s17 }
  0x1f   : > { %9912 = vst [vmem:[#allocation12_spill] sm:$0xff] %v6061_v38  ;;  %1396 = vmatpush.msra.mxu0 %v6048_v34  ;;  %5613 = vmatpush.msra.mxu2 %v6030_v28  ;;  %s5275_s11 = scalar_lea.hbm %s9646_s3, %s5609_s8  ;;  %s5264_s16 = scalar_lea.sflag [#allocation3], %s162_s5 }
  0x20   : > { %9913 = vst [vmem:[#allocation13_spill] sm:$0xff] %v6067_v40  ;;  %1559 = vmatpush.msra.mxu1 %v6056_v36  ;;  %5627 = vmatpush.msra.mxu3 %v6056_v36  ;;  %s5278_s19 = sshll.u32 %s5275_s11, 4  ;;  %s5828_s27 = scalar_lea.hbm %s9646_s3, 256  ;;  %s5279_s19 = int_to_ptr.hbm [resolvable:$true] %s5278_s19 }
  0x21   : > { %9914 = vst [vmem:[#allocation14_spill] sm:$0xff] %v6080_v44  ;;  %1398 = vmatpush.msra.mxu0 %v6063_v39  ;;  %5614 = vmatpush.msra.mxu2 %v6048_v34  ;;  %s5822_s20 = sshra.s32 %s5279_s19, 4  ;;  %s5823_s20 = int_to_ptr.hbm [resolvable:$true] %s5822_s20 }
  0x22   : > { %5695 = vset.pattern.permute.xlu1 %v9648_v4  ;;  %5693 = vset.pattern.permute.xlu0 %v9648_v4  ;;  %9915 = vst [vmem:[#allocation15_spill] sm:$0xff] %v6085_v46  ;;  %s5824_s24 = scalar_lea.hbm %s5823_s20, 128  ;;  %p5829_p0 = scmp.lt.s32.totalorder %s5823_s20, %s9646_s3 }
  0x23   : > { %486 = vperm.xlu1 %5695, %v181_v1   ;;  %483 = vperm.xlu0 %5693, %v180_v2   ;;  %9916 = vst [vmem:[#allocation16_spill] sm:$0xff] %v6093_v48  ;;  %v6141_v1 = vld [vmem:[%s5958_s28 + $0x28] sm:$0xff]  ;;  %v6145_v2 = vand.u32 4294901760, %v194_v59  ;;  %p5825_p11 = scmp.ne.s32.totalorder %s5823_s20, %s5824_s24  ;;  %p5830_p1 = scmp.lt.s32.totalorder %s5828_s27, %s5824_s24 }
  0x24   : > { %5697 = vset.pattern.permute.xlu2 %v9648_v4  ;;  %1565 = vmatpush.msra.mxu1 %v6075_v42  ;;  %9917 = vst [vmem:[#allocation17_spill] sm:$0xff] %v6096_v49 }
  0x25   : > { %459 = vperm.xlu2 %5697, %v172_v3   ;;  %9918 = vst [vmem:[#allocation18_spill] sm:$0xff] %v6099_v50  ;;  %5628 = vmatpush.msra.mxu3 %v6075_v42  ;;  %v193_v3 = vld [vmem:[%s9644_s1 + $0x28] sm:$0xff]  ;;  %p5826_p12 = pnand %p5825_p11, %p5941_p5  ;;  %p5831_p2 = por %p5830_p1, %p5829_p0 }
  0x26   : > { %1400 = vmatpush.msra.mxu0 %v6082_v45  ;;  %1571 = vmatpush.msra.mxu1 %v6093_v48  ;;  %9919 = vst [vmem:[#allocation19_spill] sm:$0xff] %v6114_v55 }
  0x27   : > { %9920 = vst [vmem:[#allocation20_spill] sm:$0xff] %v6117_v56  ;;  %5629 = vmatpush.msra.mxu3 %v6093_v48  ;;  %5615 = vmatpush.msra.mxu2 %v6063_v39  ;;  %p5827_p13 = pneg %p5826_p12 }
  0x28   : > { %9921 = vst [vmem:[#allocation21_spill] sm:$0xff] %v6123_v58  ;;  %1402 = vmatpush.msra.mxu0 %v6101_v51  ;;  %1577 = vmatpush.msra.mxu1 %v6123_v58 }
  0x29   : > { %9922 = vst [vmem:[#allocation22_spill] sm:$0xff] %v6129_v60  ;;  %5630 = vmatpush.msra.mxu3 %v6123_v58  ;;  %5616 = vmatpush.msra.mxu2 %v6082_v45  ;;  %p5832_p3 = pnand %p5831_p2, %p5827_p13 }
  0x2a   : > { %9923 = vst [vmem:[#allocation23_spill] sm:$0xff] %v6134_v62  ;;  %1404 = vmatpush.msra.mxu0 %v6119_v57  ;;  %1583 = vmatpush.msra.mxu1 %v6129_v60 }
  0x2b   : > { %5698 = vset.pattern.permute.xlu1 %v9647_v0  ;;  %465 = vperm.xlu0 %5693, %v174_v5   ;;  %9924 = vst [vmem:[#allocation24_spill] sm:$0xff] %v6137_v63 }
  0x2c   : > { %345 = vperm.xlu1 %5698, %v182_v6   ;;  %9925 = vst [vmem:[#allocation25_spill] sm:$0xff] %v6145_v2  ;;  %5631 = vmatpush.msra.mxu3 %v6129_v60 }
  0x2d   : > { %489 = vperm.xlu2 %5697, %v182_v6   ;;  %v1593_v6 = vsub.f32 %v6117_v56, %v6134_v62  ;;  %1406 = vmatpush.msra.mxu0 %v6145_v2  ;;  %9940 = vst [vmem:[#allocation40_spill] sm:$0xff] %v6217_v52 }
  0x2e   : > { %5617 = vmatpush.msra.mxu2 %v6101_v51 }
  0x30   : > { %5618 = vmatpush.msra.mxu2 %v6119_v57 }
  0x32   : > { %5619 = vmatpush.msra.mxu2 %v6145_v2 }
  0x33   : > { %5701 = vset.pattern.permute.xlu0 %v9647_v0 }
  0x34   : > { %5699 = vset.pattern.permute.xlu1 %v9648_v4  ;;  %318 = vperm.xlu0 %5701, %v173_v7  }
  0x35   : > { %462 = vperm.xlu1 %5699, %v173_v7   ;;  %5700 = vset.pattern.permute.xlu2 %v9647_v0  ;;  %v6156_v7 = vand.u32 4294901760, %v6137_v63 }
  0x36   : > { %348 = vperm.xlu2 %5700, %v183_v8  }
  0x37   : > { %9927 = vst [vmem:[#allocation27_spill] sm:$0xff] %v6156_v7 }
  0x3c   : > { %354 = vperm.xlu0 %5701, %v185_v9  }
  0x3d   : > { %492 = vperm.xlu1 %5699, %v183_v8   ;;  %v6158_v8 = vand.u32 4294901760, %v193_v3 }
  0x3e   : > { %321 = vperm.xlu2 %5700, %v174_v5   ;;  %v6150_v5 = vand.u32 4294901760, %v1587_v61 }
  0x3f   : > { %9928 = vst [vmem:[#allocation28_spill] sm:$0xff] %v6158_v8  ;;  %v6176_v13 = vsub.f32 %v193_v3, %v6158_v8  ;;  %1408 = vmatpush.msra.mxu0 %v6158_v8  ;;  %5620 = vmatpush.msra.mxu2 %v6158_v8 }
  0x40   : > { %9926 = vst [vmem:[#allocation26_spill] sm:$0xff] %v6150_v5  ;;  %1589 = vmatpush.msra.mxu1 %v6150_v5  ;;  %5632 = vmatpush.msra.mxu3 %v6150_v5 }
  0x41   : > { %9931 = vst [vmem:[#allocation31_spill] sm:$0xff] %v6176_v13  ;;  %v6193_v25 = vand.u32 4294901760, %v6176_v13 }
  0x43   : > { %9935 = vst [vmem:[#allocation35_spill] sm:$0xff] %v6193_v25  ;;  %v1611_v41 = vsub.f32 %v6176_v13, %v6193_v25 }
  0x44   : > { %5706 = vset.pattern.permute.xlu0 %v9648_v4 }
  0x45   : > { %5702 = vset.pattern.permute.xlu1 %v9647_v0  ;;  %501 = vperm.xlu0 %5706, %v5976_v10   ;;  %v6228_v61 = vand.u32 4294901760, %v1611_v41 }
  0x46   : > { %351 = vperm.xlu1 %5702, %v184_v11   ;;  %5703 = vset.pattern.permute.xlu2 %v9648_v4 }
  0x47   : > { %495 = vperm.xlu2 %5703, %v184_v11   ;;  %v6171_v11 = vand.u32 4294901760, %v1593_v6  ;;  %9942 = vst [vmem:[#allocation42_spill] sm:$0xff] %v6228_v61 }
  0x49   : > { %9930 = vst [vmem:[#allocation30_spill] sm:$0xff] %v6171_v11  ;;  %1595 = vmatpush.msra.mxu1 %v6171_v11  ;;  %5633 = vmatpush.msra.mxu3 %v6171_v11 }
  0x4d   : > { %5709 = vset.pattern.permute.xlu0 %v9647_v0 }
  0x4e   : > { %324 = vperm.xlu1 %5702, %v175_v12   ;;  %333 = vperm.xlu0 %5709, %v6019_v24  }
  0x4f   : > { %468 = vperm.xlu2 %5703, %v175_v12   ;;  %v1599_v12 = vsub.f32 %v6137_v63, %v6156_v7 }
  0x51   : > { %v6189_v23 = vand.u32 4294901760, %v1599_v12 }
  0x53   : > { %9934 = vst [vmem:[#allocation34_spill] sm:$0xff] %v6189_v23  ;;  %1601 = vmatpush.msra.mxu1 %v6189_v23  ;;  %5634 = vmatpush.msra.mxu3 %v6189_v23  ;;  %v215_v23 = vlaneseq }
  0x55   : > { %v6285_v5 = vand.u32 127, %v215_v23  ;;  %v6302_v23 = vld [vmem:[%s5958_s28 + $0x38] sm:$0xff] }
  0x56   : > { %5704 = vset.pattern.permute.xlu1 %v9648_v4 }
  0x57   : > { %498 = vperm.xlu1 %5704, %v185_v9   ;;  %5705 = vset.pattern.permute.xlu2 %v9647_v0  ;;  %v6164_v9 = vsub.f32 %v194_v59, %v6145_v2  ;;  %v189_v59 = vld [vmem:[%s9644_s1 + $0x8] sm:$0xff]  ;;  %9955 = vst [vmem:[#allocation55_spill] sm:$0xff] %v6285_v5  ;;  %v6305_v48 = vadd.s32 128, %v6285_v5 }
  0x58   : > { %327 = vperm.xlu2 %5705, %v176_v22   ;;  %v6241_v12 = vand.u32 4294901760, %v189_v59 }
  0x59   : > { %9929 = vst [vmem:[#allocation29_spill] sm:$0xff] %v6164_v9  ;;  %v6183_v18 = vand.u32 4294901760, %v6164_v9 }
  0x5a   : > { %9945 = vst [vmem:[#allocation45_spill] sm:$0xff] %v6241_v12 }
  0x5b   : > { %9933 = vst [vmem:[#allocation33_spill] sm:$0xff] %v6183_v18  ;;  %v1605_v35 = vsub.f32 %v6164_v9, %v6183_v18 }
  0x5d   : > { %v6221_v54 = vand.u32 4294901760, %v1605_v35 }
  0x5f   : > { %471 = vperm.xlu1 %5704, %v176_v22   ;;  %v191_v22 = vld [vmem:[%s9644_s1 + $0x18] sm:$0xff]  ;;  %9941 = vst [vmem:[#allocation41_spill] sm:$0xff] %v6221_v54  ;;  %1607 = vmatpush.msra.mxu1 %v6221_v54 }
  0x60   : > { %357 = vperm.xlu2 %5705, %v5976_v10   ;;  %v192_v10 = vld [vmem:[%s9644_s1 + $0x20] sm:$0xff]  ;;  %v6198_v31 = vand.u32 4294901760, %v191_v22  ;;  %5635 = vmatpush.msra.mxu3 %v6221_v54 }
  0x61   : > { %v6178_v15 = vand.u32 4294901760, %v192_v10  ;;  %1613 = vmatpush.msra.mxu1 %v6228_v61 }
  0x62   : > { %9937 = vst [vmem:[#allocation37_spill] sm:$0xff] %v6198_v31  ;;  %v6215_v47 = vsub.f32 %v191_v22, %v6198_v31  ;;  %v188_v22 = vld [vmem:[%s9644_s1] sm:$0xff]  ;;  %5636 = vmatpush.msra.mxu3 %v6228_v61 }
  0x63   : > { %9932 = vst [vmem:[#allocation32_spill] sm:$0xff] %v6178_v15  ;;  %v6196_v29 = vsub.f32 %v192_v10, %v6178_v15  ;;  %1410 = vmatpush.msra.mxu0 %v6178_v15  ;;  %v6238_v10 = vsub.f32 %v190_v37, %v6217_v52  ;;  %5621 = vmatpush.msra.mxu2 %v6178_v15 }
  0x64   : > { %9939 = vst [vmem:[#allocation39_spill] sm:$0xff] %v6215_v47  ;;  %v6234_v6 = vand.u32 4294901760, %v6215_v47 }
  0x65   : > { %9936 = vst [vmem:[#allocation36_spill] sm:$0xff] %v6196_v29  ;;  %v6212_v43 = vand.u32 4294901760, %v6196_v29  ;;  %v6255_v37 = vand.u32 4294901760, %v6238_v10  ;;  %1412 = vmatpush.msra.mxu0 %v6198_v31  ;;  %5622 = vmatpush.msra.mxu2 %v6198_v31 }
  0x66   : > { %9943 = vst [vmem:[#allocation43_spill] sm:$0xff] %v6234_v6  ;;  %v1623_v41 = vsub.f32 %v6215_v47, %v6234_v6 }
  0x67   : > { %5707 = vset.pattern.permute.xlu1 %v9647_v0  ;;  %9938 = vst [vmem:[#allocation38_spill] sm:$0xff] %v6212_v43  ;;  %v1617_v3 = vsub.f32 %v6196_v29, %v6212_v43  ;;  %v6251_v0 = vand.u32 4294901760, %v188_v22  ;;  %1414 = vmatpush.msra.mxu0 %v6217_v52 }
  0x68   : > { %330 = vperm.xlu1 %5707, %v6141_v1   ;;  %5708 = vset.pattern.permute.xlu2 %v9648_v4  ;;  %9944 = vst [vmem:[#allocation44_spill] sm:$0xff] %v6238_v10  ;;  %v6258_v4 = vsub.f32 %v189_v59, %v6241_v12 }
  0x69   : > { %474 = vperm.xlu2 %5708, %v6141_v1   ;;  %v6247_v35 = vand.u32 4294901760, %v1617_v3  ;;  %9947 = vst [vmem:[#allocation47_spill] sm:$0xff] %v6251_v0  ;;  %v6262_v3 = vand.u32 4294901760, %v1623_v41  ;;  %v6265_v11 = vsub.f32 %v188_v22, %v6251_v0  ;;  %1416 = vmatpush.msra.mxu0 %v6241_v12 }
  0x6a   : > { %9948 = vst [vmem:[#allocation48_spill] sm:$0xff] %v6255_v37  ;;  %v6271_v54 = vand.u32 4294901760, %v6258_v4  ;;  %5623 = vmatpush.msra.mxu2 %v6217_v52 }
  0x6b   : > { %9946 = vst [vmem:[#allocation46_spill] sm:$0xff] %v6247_v35  ;;  %1619 = vmatpush.msra.mxu1 %v6247_v35  ;;  %v6277_v59 = vand.u32 4294901760, %v6265_v11  ;;  %5637 = vmatpush.msra.mxu3 %v6247_v35 }
  0x6c   : > { %9949 = vst [vmem:[#allocation49_spill] sm:$0xff] %v6258_v4  ;;  %v1635_v61 = vsub.f32 %v6258_v4, %v6271_v54  ;;  %1418 = vmatpush.msra.mxu0 %v6251_v0  ;;  %5624 = vmatpush.msra.mxu2 %v6241_v12 }
  0x6d   : > { %9950 = vst [vmem:[#allocation50_spill] sm:$0xff] %v6262_v3  ;;  %1625 = vmatpush.msra.mxu1 %v6262_v3  ;;  %v1641_v60 = vsub.f32 %v6265_v11, %v6277_v59  ;;  %5638 = vmatpush.msra.mxu3 %v6262_v3 }
  0x6e   : > { %9951 = vst [vmem:[#allocation51_spill] sm:$0xff] %v6265_v11  ;;  %v6292_v35 = vand.u32 4294901760, %v1635_v61  ;;  %v9959_v61 = vmov 1   ;;  %1970 = vmatpush.msrb.mxu0 %v6005_v19  ;;  %5625 = vmatpush.msra.mxu2 %v6251_v0 }
  0x6f   : > { %9952 = vst [vmem:[#allocation52_spill] sm:$0xff] %v6271_v54  ;;  %v6297_v58 = vand.u32 4294901760, %v1641_v60 }
  0x70   : > { %360 = vperm.xlu1 %5707, %v187_v53   ;;  %9953 = vst [vmem:[#allocation53_spill] sm:$0xff] %v6277_v59  ;;  %1974 = vmatpush.msrb.mxu0 %v6024_v26 }
  0x71   : > { %504 = vperm.xlu2 %5708, %v187_v53   ;;  %v1629_v53 = vsub.f32 %v6238_v10, %v6255_v37  ;;  %9956 = vst [vmem:[#allocation56_spill] sm:$0xff] %v6292_v35  ;;  %1711 = vmatpush.msrb.mxu2 %v5995_v16 }
  0x72   : > { %9958 = vst [vmem:[#allocation57_spill] sm:$0xff] %v6297_v58  ;;  %1978 = vmatpush.msrb.mxu0 %v6042_v32 }
  0x73   : > { %v6280_v22 = vand.u32 4294901760, %v1629_v53  ;;  %v9957_v53 = vmov 4   ;;  %1714 = vmatpush.msrb.mxu2 %v6009_v20 }
  0x74   : > { %1982 = vmatpush.msrb.mxu0 %v6061_v38 }
  0x75   : > { %v316_v41 = vpop.permute.xlu2 %315  ;;  %9954 = vst [vmem:[#allocation54_spill] sm:$0xff] %v6280_v22  ;;  %1631 = vmatpush.msra.mxu1 %v6280_v22  ;;  %5639 = vmatpush.msra.mxu3 %v6280_v22 }
  0x76   : > { %vm362_vm0 = vcmp.eq.s32.totalorder %v6285_v5, %v316_v41  ;;  %vm363_vm1 = vcmp.eq.s32.totalorder %v6305_v48, %v316_v41  ;;  %1717 = vmatpush.msrb.mxu2 %v6028_v27  ;;  %1986 = vmatpush.msrb.mxu0 %v6085_v46 }
  0x77   : > { %1637 = vmatpush.msra.mxu1 %v6292_v35  ;;  %5640 = vmatpush.msra.mxu3 %v6292_v35 }
  0x78   : > { %5710 = vset.pattern.permute.xlu1 %v9957_v53  ;;  %1720 = vmatpush.msrb.mxu2 %v6046_v33 }
  0x79   : > { %477 = vperm.xlu1 %5710, %v6019_v24   ;;  %5711 = vset.pattern.permute.xlu2 %v9959_v61  ;;  %v9661_v24 = vmov 0.0  }
  0x7a   : > { %336 = vperm.xlu2 %5711, %v6302_v23   ;;  %1643 = vmatpush.msra.mxu1 %v6297_v58  ;;  %v5364_v60 = vsel %vm362_vm0, 1.0, %v9661_v24  ;;  %v5365_v53 = vsel %vm363_vm1, 1.0, %v9661_v24 }
  0x7b   : > { %5641 = vmatpush.msra.mxu3 %v6297_v58  ;;  %1723 = vmatpush.msrb.mxu2 %v6067_v40 }
  0x7c   : > { %2097 = vmatpush.msrb.mxu1 %v5988_v14  ;;  %1990 = vmatpush.msrb.mxu0 %v6096_v49 }
  0x7d   : > { %1839 = vmatpush.msrb.mxu3 %v5988_v14  ;;  %1726 = vmatpush.msrb.mxu2 %v6080_v44 }
  0x7e   : > { %2099 = vmatpush.msrb.mxu1 %v5997_v17  ;;  %1994 = vmatpush.msrb.mxu0 %v6114_v55 }
  0x7f   : > { %v460_v61 = vpop.permute.xlu2 %459  ;;  %1841 = vmatpush.msrb.mxu3 %v5997_v17  ;;  %1729 = vmatpush.msrb.mxu2 %v6099_v50 }
  0x80   : > { %vm506_vm2 = vcmp.eq.s32.totalorder %v6285_v5, %v460_v61  ;;  %vm507_vm3 = vcmp.eq.s32.totalorder %v6305_v48, %v460_v61  ;;  %2101 = vmatpush.msrb.mxu1 %v6011_v21  ;;  %1998 = vmatpush.msrb.mxu0 %v6134_v62 }
  0x81   : > { %480 = vperm.xlu1 %5710, %v6302_v23   ;;  %v5396_v41 = vsel %vm506_vm2, 1.0, %v9661_v24  ;;  %v5397_v19 = vsel %vm507_vm3, 1.0, %v9661_v24  ;;  %1843 = vmatpush.msrb.mxu3 %v6011_v21 }
  0x82   : > { %v602_v58 = vadd.f32 %v5396_v41, %v5364_v60  ;;  %v6331_v35 = vadd.f32 %v5397_v19, %v5365_v53  ;;  %2103 = vmatpush.msrb.mxu1 %v6030_v28  ;;  %1732 = vmatpush.msrb.mxu2 %v6117_v56 }
  0x83   : > { %1845 = vmatpush.msrb.mxu3 %v6030_v28  ;;  %2002 = vmatpush.msrb.mxu0 %v6156_v7 }
  0x84   : > { %v6337_v61 = vand.u32 4294901760, %v602_v58  ;;  %2105 = vmatpush.msrb.mxu1 %v6048_v34  ;;  %1735 = vmatpush.msrb.mxu2 %v6137_v63 }
  0x85   : > { %1847 = vmatpush.msrb.mxu3 %v6048_v34  ;;  %2006 = vmatpush.msrb.mxu0 %v6183_v18 }
  0x86   : > { %v6344_v19 = vsub.f32 %v602_v58, %v6337_v61  ;;  %1645 = vmatmul.f32.vlgmr.msra.gmra.mxu1 %v6337_v61  ;;  %1738 = vmatpush.msrb.mxu2 %v6164_v9 }
  0x87   : > { %v6348_v60 = vpop.permute.xlu2 %489  ;;  %1849 = vmatpush.msrb.mxu3 %v6063_v39  ;;  %2107 = vmatpush.msrb.mxu1 %v6063_v39 }
  0x88   : > { %v9664_v53 = vand.u32 4294901760, %v6344_v19  ;;  %2010 = vmatpush.msrb.mxu0 %v6193_v25  ;;  %1741 = vmatpush.msrb.mxu2 %v6176_v13  ;;  %vm526_vm12 = vcmp.eq.s32.totalorder %v6285_v5, %v6348_v60  ;;  %vm527_vm13 = vcmp.eq.s32.totalorder %v6305_v48, %v6348_v60 }
  0x89   : > { %1851 = vmatpush.msrb.mxu3 %v6082_v45  ;;  %2109 = vmatpush.msrb.mxu1 %v6082_v45 }
  0x8a   : > { %v1422_v58 = vsub.f32 %v6344_v19, %v9664_v53  ;;  %1744 = vmatpush.msrb.mxu2 %v6196_v29  ;;  %2014 = vmatpush.msrb.mxu0 %v6212_v43 }
  0x8b   : > { %1853 = vmatpush.msrb.mxu3 %v6101_v51  ;;  %2111 = vmatpush.msrb.mxu1 %v6101_v51 }
  0x8c   : > { %v343_v41 = vpop.permute.xlu1 %342  ;;  %v340_v24 = vpop.permute.xlu0 %339  ;;  %v1423_v38 = vand.u32 4294901760, %v1422_v58  ;;  %1747 = vmatpush.msrb.mxu2 %v6215_v47  ;;  %2018 = vmatpush.msrb.mxu0 %v6234_v6 }
  0x8d   : > { %1855 = vmatpush.msrb.mxu3 %v6119_v57  ;;  %vm380_vm4 = vcmp.eq.s32.totalorder %v6285_v5, %v343_v41  ;;  %vm381_vm5 = vcmp.eq.s32.totalorder %v6305_v48, %v343_v41  ;;  %vm378_vm6 = vcmp.eq.s32.totalorder %v6285_v5, %v340_v24  ;;  %vm379_vm7 = vcmp.eq.s32.totalorder %v6305_v48, %v340_v24 }
  0x8e   : > { %1424 = vmatmul.f32.vlgmr.msra.gmra.mxu0 %v1423_v38  ;;  %2113 = vmatpush.msrb.mxu1 %v6119_v57  ;;  %v9960_v38 = vmov 0.0  }
  0x8f   : > { %1857 = vmatpush.msrb.mxu3 %v6145_v2  ;;  %v5382_v58 = vsel %vm380_vm4, 1.0, %v9960_v38  ;;  %v5383_v41 = vsel %vm381_vm5, 1.0, %v9960_v38  ;;  %v5380_v7 = vsel %vm378_vm6, 1.0, %v9960_v38  ;;  %v5381_v24 = vsel %vm379_vm7, 1.0, %v9960_v38  ;;  %1750 = vmatpush.msrb.mxu2 %v6238_v10 }
  0x90   : > { %v6371_v53 = vpop.permute.xlu2 %348  ;;  %2115 = vmatpush.msrb.mxu1 %v6145_v2  ;;  %2022 = vmatpush.msrb.mxu0 %v6255_v37 }
  0x91   : > { %1859 = vmatpush.msrb.mxu3 %v6158_v8  ;;  %1753 = vmatpush.msrb.mxu2 %v6258_v4 }
  0x92   : > { %2117 = vmatpush.msrb.mxu1 %v6158_v8  ;;  %2026 = vmatpush.msrb.mxu0 %v6271_v54 }
  0x93   : > { %1861 = vmatpush.msrb.mxu3 %v6178_v15  ;;  %1756 = vmatpush.msrb.mxu2 %v6265_v11 }
  0x94   : > { %2119 = vmatpush.msrb.mxu1 %v6178_v15  ;;  %2030 = vmatpush.msrb.mxu0 %v6277_v59 }
  0x95   : > { %v487_v62 = vpop.permute.xlu1 %486  ;;  %v484_v63 = vpop.permute.xlu0 %483  ;;  %1863 = vmatpush.msrb.mxu3 %v6198_v31 }
  0x96   : > { %vm524_vm8 = vcmp.eq.s32.totalorder %v6285_v5, %v487_v62  ;;  %vm525_vm9 = vcmp.eq.s32.totalorder %v6305_v48, %v487_v62  ;;  %vm522_vm10 = vcmp.eq.s32.totalorder %v6285_v5, %v484_v63  ;;  %vm523_vm11 = vcmp.eq.s32.totalorder %v6305_v48, %v484_v63  ;;  %2121 = vmatpush.msrb.mxu1 %v6198_v31 }
  0x97   : > { %v5414_v18 = vsel %vm524_vm8, 1.0, %v9960_v38  ;;  %v5415_v9 = vsel %vm525_vm9, 1.0, %v9960_v38  ;;  %v5412_v55 = vsel %vm522_vm10, 1.0, %v9960_v38  ;;  %v5413_v56 = vsel %vm523_vm11, 1.0, %v9960_v38  ;;  %1865 = vmatpush.msrb.mxu3 %v6217_v52 }
  0x98   : > { %v620_v25 = vadd.f32 %v5414_v18, %v5382_v58  ;;  %v6404_v62 = vadd.f32 %v5415_v9, %v5383_v41  ;;  %v618_v49 = vadd.f32 %v5412_v55, %v5380_v7  ;;  %v6406_v50 = vadd.f32 %v5413_v56, %v5381_v24  ;;  %v322_v63 = vpop.permute.xlu2 %321  ;;  %2123 = vmatpush.msrb.mxu1 %v6217_v52 }
  0x99   : > { %vm367_vm14 = vcmp.eq.s32.totalorder %v6305_v48, %v322_v63  ;;  %1867 = vmatpush.msrb.mxu3 %v6241_v12  ;;  %v5416_v56 = vsel %vm526_vm12, 1.0, %v9960_v38  ;;  %v5417_v7 = vsel %vm527_vm13, 1.0, %v9960_v38  ;;  %vm366_vm2 = vcmp.eq.s32.totalorder %v6285_v5, %v322_v63 }
  0x9a   : > { %9961 = vst [vmem:[#allocation58_spill] sm:$0xff] %v6404_v62  ;;  %v6411_v13 = vand.u32 4294901760, %v620_v25  ;;  %v6413_v46 = vand.u32 4294901760, %v618_v49  ;;  %v5369_v58 = vsel %vm367_vm14, 1.0, %v9960_v38  ;;  %2125 = vmatpush.msrb.mxu1 %v6241_v12  ;;  %vm384_vm8 = vcmp.eq.s32.totalorder %v6285_v5, %v6371_v53 }
  0x9b   : > { %9962 = vst [vmem:[#allocation59_spill] sm:$0xff] %v6406_v50  ;;  %1869 = vmatpush.msrb.mxu3 %v6251_v0  ;;  %vm385_vm9 = vcmp.eq.s32.totalorder %v6305_v48, %v6371_v53  ;;  %v5386_v53 = vsel %vm384_vm8, 1.0, %v9960_v38 }
  0x9c   : > { %v6425_v55 = vsub.f32 %v618_v49, %v6413_v46  ;;  %1677 = vmatmul.f32.vlgmr.msra.gmra.mxu3 %v6413_v46  ;;  %v6434_v18 = vsub.f32 %v620_v25, %v6411_v13  ;;  %2127 = vmatpush.msrb.mxu1 %v6251_v0 }
  0x9d   : > { %v466_v9 = vpop.permute.xlu0 %465 }
  0x9e   : > { %v346_v60 = vpop.permute.xlu1 %345  ;;  %vm511_vm15 = vcmp.eq.s32.totalorder %v6305_v48, %v466_v9  ;;  %v9682_v49 = vand.u32 4294901760, %v6425_v55  ;;  %vm510_vm3 = vcmp.eq.s32.totalorder %v6285_v5, %v466_v9 }
  0x9f   : > { %vm382_vm0 = vcmp.eq.s32.totalorder %v6285_v5, %v346_v60  ;;  %vm383_vm1 = vcmp.eq.s32.totalorder %v6305_v48, %v346_v60  ;;  %v5401_v41 = vsel %vm511_vm15, 1.0, %v9960_v38 }
  0xa0   : > { %v5384_v25 = vsel %vm382_vm0, 1.0, %v9960_v38  ;;  %v5385_v24 = vsel %vm383_vm1, 1.0, %v9960_v38  ;;  %v1486_v6 = vsub.f32 %v6425_v55, %v9682_v49  ;;  %v6456_v4 = vadd.f32 %v5401_v41, %v5369_v58 }
  0xa1   : > { %v622_v37 = vadd.f32 %v5416_v56, %v5384_v25  ;;  %v6453_v60 = vadd.f32 %v5417_v7, %v5385_v24  ;;  %v6458_v10 = vpop.permute.xlu2 %495  ;;  %v9685_v49 = vand.u32 4294901760, %v6434_v18  ;;  %v5400_v56 = vsel %vm510_vm3, 1.0, %v9960_v38 }
  0xa2   : > { %9964 = vst [vmem:[#allocation61_spill] sm:$0xff] %v6456_v4  ;;  %v1487_v43 = vand.u32 4294901760, %v1486_v6  ;;  %v5368_v7 = vsel %vm366_vm2, 1.0, %v9960_v38  ;;  %vm530_vm12 = vcmp.eq.s32.totalorder %v6285_v5, %v6458_v10  ;;  %vm531_vm13 = vcmp.eq.s32.totalorder %v6305_v48, %v6458_v10 }
  0xa3   : > { %9963 = vst [vmem:[#allocation60_spill] sm:$0xff] %v6453_v60  ;;  %v6463_v47 = vand.u32 4294901760, %v622_v37  ;;  %v1494_v58 = vsub.f32 %v6434_v18, %v9685_v49 }
  0xa4   : > { %1488 = vmatmul.f32.vlgmr.msra.gmra.mxu2 %v1487_v43  ;;  %1681 = vmatmul.f32.gmra.mxu3 %v6411_v13  ;;  %v606_v43 = vadd.f32 %v5400_v56, %v5368_v7 }
  0xa5   : > { %v6472_v9 = vsub.f32 %v622_v37, %v6463_v47 }
  0xa6   : > { %v319_v6 = vpop.permute.xlu0 %318 }
  0xa7   : > { %vm364_vm4 = vcmp.eq.s32.totalorder %v6285_v5, %v319_v6  ;;  %vm365_vm5 = vcmp.eq.s32.totalorder %v6305_v48, %v319_v6  ;;  %v463_v41 = vpop.permute.xlu1 %462  ;;  %v1495_v6 = vand.u32 4294901760, %v1494_v58  ;;  %v9688_v56 = vand.u32 4294901760, %v6472_v9 }
  0xa8   : > { %v5366_v25 = vsel %vm364_vm4, 1.0, %v9960_v38  ;;  %v5367_v24 = vsel %vm365_vm5, 1.0, %v9960_v38  ;;  %vm508_vm6 = vcmp.eq.s32.totalorder %v6285_v5, %v463_v41  ;;  %vm509_vm7 = vcmp.eq.s32.totalorder %v6305_v48, %v463_v41 }
  0xa9   : > { %v5398_v37 = vsel %vm508_vm6, 1.0, %v9960_v38  ;;  %v5399_v63 = vsel %vm509_vm7, 1.0, %v9960_v38  ;;  %v6485_v59 = vpop.permute.xlu2 %468  ;;  %v6496_v41 = vand.u32 4294901760, %v606_v43  ;;  %v1502_v58 = vsub.f32 %v6472_v9, %v9688_v56 }
  0xaa   : > { %v604_v49 = vadd.f32 %v5398_v37, %v5366_v25  ;;  %v6487_v54 = vadd.f32 %v5399_v63, %v5367_v24  ;;  %v5387_v37 = vsel %vm385_vm9, 1.0, %v9960_v38  ;;  %vm512_vm2 = vcmp.eq.s32.totalorder %v6285_v5, %v6485_v59 }
  0xab   : > { %v1503_v62 = vand.u32 4294901760, %v1502_v58  ;;  %v5421_v58 = vsel %vm531_vm13, 1.0, %v9960_v38  ;;  %vm513_vm3 = vcmp.eq.s32.totalorder %v6305_v48, %v6485_v59 }
  0xac   : > { %v6494_v7 = vand.u32 4294901760, %v604_v49  ;;  %1496 = vmatmul.f32.gmra.mxu2 %v1495_v6  ;;  %1685 = vmatmul.f32.gmra.mxu3 %v6463_v47  ;;  %v6511_v6 = vsub.f32 %v606_v43, %v6496_v41 }
  0xae   : > { %v6500_v25 = vsub.f32 %v604_v49, %v6494_v7  ;;  %1649 = vmatmul.f32.gmra.mxu1 %v6494_v7  ;;  %v6506_v24 = vpop.permute.xlu0 %354  ;;  %v9693_v40 = vand.u32 4294901760, %v6511_v6 }
  0xaf   : > { %v493_v63 = vpop.permute.xlu1 %492  ;;  %vm388_vm8 = vcmp.eq.s32.totalorder %v6285_v5, %v6506_v24  ;;  %vm389_vm9 = vcmp.eq.s32.totalorder %v6305_v48, %v6506_v24 }
  0xb0   : > { %vm528_vm10 = vcmp.eq.s32.totalorder %v6285_v5, %v493_v63  ;;  %vm529_vm11 = vcmp.eq.s32.totalorder %v6305_v48, %v493_v63  ;;  %v9692_v49 = vand.u32 4294901760, %v6500_v25  ;;  %v9988_v8 = vand.u32 4294901760, %v6500_v25 }
  0xb1   : > { %v5418_v11 = vsel %vm528_vm10, 1.0, %v9960_v38  ;;  %v5419_v56 = vsel %vm529_vm11, 1.0, %v9960_v38 }
  0xb2   : > { %v624_v60 = vadd.f32 %v5418_v11, %v5386_v53  ;;  %v6518_v29 = vadd.f32 %v5419_v56, %v5387_v37  ;;  %v1430_v50 = vsub.f32 %v6500_v25, %v9692_v49  ;;  %v6523_v43 = vpop.permute.xlu2 %327  ;;  %v5420_v56 = vsel %vm530_vm12, 1.0, %v9960_v38 }
  0xb3   : > { %vm370_vm12 = vcmp.eq.s32.totalorder %v6285_v5, %v6523_v43  ;;  %vm371_vm13 = vcmp.eq.s32.totalorder %v6305_v48, %v6523_v43 }
  0xb4   : > { %9965 = vst [vmem:[#allocation62_spill] sm:$0xff] %v6518_v29  ;;  %v6525_v44 = vand.u32 4294901760, %v624_v60  ;;  %1504 = vmatmul.f32.gmra.mxu2 %v1503_v62  ;;  %v1431_v63 = vand.u32 4294901760, %v1430_v50  ;;  %v1438_v50 = vsub.f32 %v6511_v6, %v9693_v40 }
  0xb6   : > { %v6533_v11 = vsub.f32 %v624_v60, %v6525_v44  ;;  %1432 = vmatmul.f32.gmra.mxu0 %v1431_v63  ;;  %1653 = vmatmul.f32.gmra.mxu1 %v6496_v41  ;;  %v1439_v33 = vand.u32 4294901760, %v1438_v50  ;;  %v5403_v50 = vsel %vm513_vm3, 1.0, %v9960_v38 }
  0xb7   : > { %1689 = vmatmul.f32.gmra.mxu3 %v6525_v44  ;;  %v502_v62 = vpop.permute.xlu0 %501 }
  0xb8   : > { %v352_v53 = vpop.permute.xlu1 %351  ;;  %v9698_v10 = vand.u32 4294901760, %v6533_v11  ;;  %vm535_vm14 = vcmp.eq.s32.totalorder %v6305_v48, %v502_v62  ;;  %vm534_vm6 = vcmp.eq.s32.totalorder %v6285_v5, %v502_v62 }
  0xb9   : > { %vm386_vm15 = vcmp.eq.s32.totalorder %v6285_v5, %v352_v53  ;;  %vm387_vm0 = vcmp.eq.s32.totalorder %v6305_v48, %v352_v53  ;;  %v5425_v49 = vsel %vm535_vm14, 1.0, %v9960_v38 }
  0xba   : > { %v5388_v60 = vsel %vm386_vm15, 1.0, %v9960_v38  ;;  %v5389_v37 = vsel %vm387_vm0, 1.0, %v9960_v38  ;;  %v1510_v63 = vsub.f32 %v6533_v11, %v9698_v10  ;;  %v358_v29 = vpop.permute.xlu2 %357 }
  0xbb   : > { %v626_v40 = vadd.f32 %v5420_v56, %v5388_v60  ;;  %v6552_v32 = vadd.f32 %v5421_v58, %v5389_v37  ;;  %vm391_vm1 = vcmp.eq.s32.totalorder %v6305_v48, %v358_v29  ;;  %v5402_v58 = vsel %vm512_vm2, 1.0, %v9960_v38 }
  0xbc   : > { %v1511_v26 = vand.u32 4294901760, %v1510_v63  ;;  %v5393_v53 = vsel %vm391_vm1, 1.0, %v9960_v38  ;;  %vm390_vm7 = vcmp.eq.s32.totalorder %v6285_v5, %v358_v29 }
  0xbd   : > { %9966 = vst [vmem:[#allocation63_spill] sm:$0xff] %v6552_v32  ;;  %v6556_v27 = vand.u32 4294901760, %v626_v40  ;;  %v6562_v10 = vadd.f32 %v5425_v49, %v5393_v53 }
  0xbe   : > { %1440 = vmatmul.f32.gmra.mxu0 %v1439_v33  ;;  %1512 = vmatmul.f32.gmra.mxu2 %v1511_v26 }
  0xbf   : > { %9967 = vst [vmem:[#allocation64_spill] sm:$0xff] %v6562_v10  ;;  %v6565_v56 = vsub.f32 %v626_v40, %v6556_v27  ;;  %1693 = vmatmul.f32.gmra.mxu3 %v6556_v27 }
  0xc0   : > { %v325_v60 = vpop.permute.xlu1 %324 }
  0xc1   : > { %vm368_vm4 = vcmp.eq.s32.totalorder %v6285_v5, %v325_v60  ;;  %vm369_vm5 = vcmp.eq.s32.totalorder %v6305_v48, %v325_v60  ;;  %v9699_v59 = vand.u32 4294901760, %v6565_v56 }
  0xc2   : > { %v5370_v49 = vsel %vm368_vm4, 1.0, %v9960_v38  ;;  %v5371_v26 = vsel %vm369_vm5, 1.0, %v9960_v38 }
  0xc3   : > { %v608_v33 = vadd.f32 %v5402_v58, %v5370_v49  ;;  %v6575_v40 = vadd.f32 %v5403_v50, %v5371_v26  ;;  %v1518_v37 = vsub.f32 %v6565_v56, %v9699_v59  ;;  %v5424_v58 = vsel %vm534_vm6, 1.0, %v9960_v38 }
  0xc4   : > { %v5392_v50 = vsel %vm390_vm7, 1.0, %v9960_v38  ;;  %v5390_v49 = vsel %vm388_vm8, 1.0, %v9960_v38 }
  0xc5   : > { %9968 = vst [vmem:[#allocation65_spill] sm:$0xff] %v6575_v40  ;;  %v6582_v63 = vand.u32 4294901760, %v608_v33  ;;  %v1519_v53 = vand.u32 4294901760, %v1518_v37  ;;  %v630_v26 = vadd.f32 %v5424_v58, %v5392_v50 }
  0xc7   : > { %v6585_v60 = vsub.f32 %v608_v33, %v6582_v63  ;;  %1520 = vmatmul.f32.gmra.mxu2 %v1519_v53  ;;  %1657 = vmatmul.f32.gmra.mxu1 %v6582_v63  ;;  %v5391_v33 = vsel %vm389_vm9, 1.0, %v9960_v38  ;;  %v6612_v50 = vand.u32 4294901760, %v630_v26 }
  0xc9   : > { %v499_v29 = vpop.permute.xlu1 %498  ;;  %v9700_v62 = vand.u32 4294901760, %v6585_v60  ;;  %9970 = vst [vmem:[#allocation67_spill] sm:$0xff] %v6612_v50 }
  0xca   : > { %vm532_vm10 = vcmp.eq.s32.totalorder %v6285_v5, %v499_v29  ;;  %vm533_vm11 = vcmp.eq.s32.totalorder %v6305_v48, %v499_v29 }
  0xcb   : > { %v5422_v37 = vsel %vm532_vm10, 1.0, %v9960_v38  ;;  %v5423_v53 = vsel %vm533_vm11, 1.0, %v9960_v38  ;;  %v1446_v24 = vsub.f32 %v6585_v60, %v9700_v62 }
  0xcc   : > { %v628_v59 = vadd.f32 %v5422_v37, %v5390_v49  ;;  %v6604_v10 = vadd.f32 %v5423_v53, %v5391_v33  ;;  %v5372_v49 = vsel %vm370_vm12, 1.0, %v9960_v38  ;;  %v5373_v33 = vsel %vm371_vm13, 1.0, %v9960_v38 }
  0xcd   : > { %v1447_v32 = vand.u32 4294901760, %v1446_v24  ;;  %v6621_v53 = vsub.f32 %v630_v26, %v6612_v50  ;;  %vm1338_vm12 = vcmask 588800  }
  0xce   : > { %9969 = vst [vmem:[#allocation66_spill] sm:$0xff] %v6604_v10  ;;  %v6610_v58 = vand.u32 4294901760, %v628_v59 }
  0xcf   : > { %1448 = vmatmul.f32.gmra.mxu0 %v1447_v32  ;;  %v475_v32 = vpop.permute.xlu2 %474  ;;  %v9708_v16 = vand.u32 4294901760, %v6621_v53 }
  0xd0   : > { %v6615_v29 = vsub.f32 %v628_v59, %v6610_v58  ;;  %1697 = vmatmul.f32.gmra.mxu3 %v6610_v58  ;;  %vm516_vm0 = vcmp.eq.s32.totalorder %v6285_v5, %v475_v32  ;;  %vm517_vm1 = vcmp.eq.s32.totalorder %v6305_v48, %v475_v32 }
  0xd1   : > { %v472_v37 = vpop.permute.xlu1 %471 }
  0xd2   : > { %vm514_vm14 = vcmp.eq.s32.totalorder %v6285_v5, %v472_v37  ;;  %vm515_vm15 = vcmp.eq.s32.totalorder %v6305_v48, %v472_v37  ;;  %v9705_v43 = vand.u32 4294901760, %v6615_v29 }
  0xd3   : > { %v5404_v59 = vsel %vm514_vm14, 1.0, %v9960_v38  ;;  %v5405_v24 = vsel %vm515_vm15, 1.0, %v9960_v38 }
  0xd4   : > { %v610_v62 = vadd.f32 %v5404_v59, %v5372_v49  ;;  %v6628_v10 = vadd.f32 %v5405_v24, %v5373_v33  ;;  %v1526_v20 = vsub.f32 %v6615_v29, %v9705_v43  ;;  %v5406_v49 = vsel %vm516_vm0, 1.0, %v9960_v38 }
  0xd5   : > { %v5407_v33 = vsel %vm517_vm1, 1.0, %v9960_v38  ;;  %v1534_v24 = vsub.f32 %v6621_v53, %v9708_v16 }
  0xd6   : > { %9971 = vst [vmem:[#allocation68_spill] sm:$0xff] %v6628_v10  ;;  %v6633_v26 = vand.u32 4294901760, %v610_v62  ;;  %v1527_v0 = vand.u32 4294901760, %v1526_v20 }
  0xd7   : > { %v505_v10 = vpop.permute.xlu2 %504 }
  0xd8   : > { %v6639_v37 = vsub.f32 %v610_v62, %v6633_v26  ;;  %1528 = vmatmul.f32.gmra.mxu2 %v1527_v0  ;;  %1661 = vmatmul.f32.gmra.mxu1 %v6633_v26  ;;  %v212_v0 = vld [vmem:[%s9644_s1 + $0xc0] sm:$0xff]  ;;  %vm536_vm4 = vcmp.eq.s32.totalorder %v6285_v5, %v505_v10  ;;  %vm537_vm5 = vcmp.eq.s32.totalorder %v6305_v48, %v505_v10 }
  0xd9   : > { %1701 = vmatmul.f32.gmra.mxu3 %v6612_v50  ;;  %v6659_v12 = vand.u32 4294901760, %v212_v0 }
  0xda   : > { %v331_v59 = vpop.permute.xlu1 %330  ;;  %v9713_v20 = vand.u32 4294901760, %v6639_v37 }
  0xdb   : > { %vm372_vm2 = vcmp.eq.s32.totalorder %v6285_v5, %v331_v59  ;;  %vm373_vm3 = vcmp.eq.s32.totalorder %v6305_v48, %v331_v59  ;;  %9972 = vst [vmem:[#allocation69_spill] sm:$0xff] %v6659_v12  ;;  %v1535_v59 = vand.u32 4294901760, %v1534_v24  ;;  %2201 = vmatpush.msra.mxu2 %v6659_v12  ;;  %2596 = vmatpush.msra.mxu1 %v6659_v12 }
  0xdc   : > { %v5374_v62 = vsel %vm372_vm2, 1.0, %v9960_v38  ;;  %v5375_v32 = vsel %vm373_vm3, 1.0, %v9960_v38  ;;  %v1454_v43 = vsub.f32 %v6639_v37, %v9713_v20  ;;  %v6676_v24 = vsub.f32 %v212_v0, %v6659_v12 }
  0xdd   : > { %v612_v16 = vadd.f32 %v5406_v49, %v5374_v62  ;;  %v6661_v22 = vadd.f32 %v5407_v33, %v5375_v32  ;;  %v5427_v49 = vsel %vm537_vm5, 1.0, %v9960_v38 }
  0xde   : > { %v1455_v52 = vand.u32 4294901760, %v1454_v43  ;;  %v5426_v43 = vsel %vm536_vm4, 1.0, %v9960_v38  ;;  %9974 = vst [vmem:[#allocation71_spill] sm:$0xff] %v6676_v24  ;;  %v6684_v62 = vand.u32 4294901760, %v6676_v24  ;;  %2482 = vmatpush.msra.mxu0 %v6676_v24 }
  0xdf   : > { %9973 = vst [vmem:[#allocation70_spill] sm:$0xff] %v6661_v22  ;;  %v6665_v3 = vand.u32 4294901760, %v612_v16  ;;  %v6692_v22 = vpop.permute.xlu0 %333 }
  0xe0   : > { %1456 = vmatmul.f32.gmra.mxu0 %v1455_v52  ;;  %1536 = vmatmul.f32.gmra.mxu2 %v1535_v59  ;;  %9975 = vst [vmem:[#allocation72_spill] sm:$0xff] %v6684_v62  ;;  %vm374_vm8 = vcmp.eq.s32.totalorder %v6285_v5, %v6692_v22 }
  0xe1   : > { %v6670_v20 = vsub.f32 %v612_v16, %v6665_v3  ;;  %1665 = vmatmul.f32.gmra.mxu1 %v6665_v3  ;;  %9977 = vst [vmem:[#allocation74_spill] sm:$0xff] %v6692_v22 }
  0xe2   : > { %v361_v33 = vpop.permute.xlu1 %360 }
  0xe3   : > { %vm392_vm6 = vcmp.eq.s32.totalorder %v6285_v5, %v361_v33  ;;  %vm393_vm7 = vcmp.eq.s32.totalorder %v6305_v48, %v361_v33  ;;  %v9718_v52 = vand.u32 4294901760, %v6670_v20  ;;  %v2357_v33 = vsub.f32 %v6676_v24, %v6684_v62 }
  0xe4   : > { %v5394_v10 = vsel %vm392_vm6, 1.0, %v9960_v38  ;;  %v5395_v16 = vsel %vm393_vm7, 1.0, %v9960_v38 }
  0xe5   : > { %v632_v32 = vadd.f32 %v5426_v43, %v5394_v10  ;;  %v6687_v59 = vadd.f32 %v5427_v49, %v5395_v16  ;;  %v1462_v0 = vsub.f32 %v6670_v20, %v9718_v52  ;;  %v6700_v15 = vand.u32 4294901760, %v2357_v33  ;;  %v211_v49 = vld [vmem:[%s9644_s1 + $0xb8] sm:$0xff]  ;;  %v6722_v52 = vpop.permute.xlu2 %336 }
  0xe6   : > { %v5376_v10 = vsel %vm374_vm8, 1.0, %v9960_v38  ;;  %v6714_v33 = vand.u32 4294901760, %v211_v49  ;;  %9982 = vst [vmem:[#allocation79_spill] sm:$0xff] %v6722_v52  ;;  %vm376_vm10 = vcmp.eq.s32.totalorder %v6285_v5, %v6722_v52  ;;  %v9732_v52 = vmov 3  }
  0xe7   : > { %9976 = vst [vmem:[#allocation73_spill] sm:$0xff] %v6687_v59  ;;  %v6696_v40 = vand.u32 4294901760, %v632_v32  ;;  %v1463_v31 = vand.u32 4294901760, %v1462_v0  ;;  %2359 = vmatpush.msra.mxu3 %v6700_v15  ;;  %5713 = vset.pattern.permute.xlu0 %v9732_v52 }
  0xe8   : > { %9979 = vst [vmem:[#allocation76_spill] sm:$0xff] %v6700_v15  ;;  %2203 = vmatpush.msra.mxu2 %v6714_v33  ;;  %2598 = vmatpush.msra.mxu1 %v6714_v33 }
  0xe9   : > { %9978 = vst [vmem:[#allocation75_spill] sm:$0xff] %v6696_v40  ;;  %v6703_v43 = vsub.f32 %v632_v32, %v6696_v40  ;;  %1464 = vmatmul.f32.gmra.mxu0 %v1463_v31  ;;  %1705 = vmatmul.f32.gmra.mxu3 %v6696_v40 }
  0xea   : > { %9981 = vst [vmem:[#allocation78_spill] sm:$0xff] %v6714_v33 }
  0xeb   : > { %v6711_v16 = vpop.permute.xlu1 %477  ;;  %v9723_v0 = vand.u32 4294901760, %v6703_v43 }
  0xec   : > { %9980 = vst [vmem:[#allocation77_spill] sm:$0xff] %v6711_v16  ;;  %vm518_vm9 = vcmp.eq.s32.totalorder %v6285_v5, %v6711_v16  ;;  %v9983_v16 = vand.u32 4294901760, %v6344_v19 }
  0xed   : > { %v5408_v31 = vsel %vm518_vm9, 1.0, %v9960_v38  ;;  %v1542_v32 = vsub.f32 %v6703_v43, %v9723_v0  ;;  %v6733_v0 = vsub.f32 %v211_v49, %v6714_v33  ;;  %v5776_v49 = vld [vmem:[%s5958_s28] sm:$0xff] }
  0xee   : > { %v614_v24 = vadd.f32 %v5408_v31, %v5376_v10  ;;  %v5378_v31 = vsel %vm376_vm10, 1.0, %v9960_v38  ;;  %779 = vperm.xlu0 %5713, %v5776_v49  }
  0xef   : > { %v1543_v15 = vand.u32 4294901760, %v1542_v32  ;;  %9984 = vst [vmem:[#allocation80_spill] sm:$0xff] %v6733_v0  ;;  %v6743_v32 = vand.u32 4294901760, %v6733_v0  ;;  %2485 = vmatpush.msra.mxu0 %v6733_v0 }
  0xf0   : > { %v6726_v59 = vand.u32 4294901760, %v614_v24 }
  0xf1   : > { %1544 = vmatmul.f32.gmra.mxu2 %v1543_v15  ;;  %1873 = vmatmul.f32.vlgmr.msrb.gmra.mxu3 %v9983_v16  ;;  %9986 = vst [vmem:[#allocation82_spill] sm:$0xff] %v6743_v32  ;;  %v9734_v15 = vmov 5   ;;  %v2363_v40 = vsub.f32 %v6733_v0, %v6743_v32  ;;  %v10002_v0 = vmov 6  }
  0xf2   : > { %v6736_v22 = vsub.f32 %v614_v24, %v6726_v59  ;;  %1669 = vmatmul.f32.gmra.mxu1 %v6726_v59  ;;  %5714 = vset.pattern.permute.xlu1 %v9734_v15 }
  0xf3   : > { %v6739_v10 = vpop.permute.xlu1 %480  ;;  %955 = vperm.xlu1 %5714, %v5776_v49   ;;  %v6758_v15 = vand.u32 4294901760, %v2363_v40 }
  0xf4   : > { %9985 = vst [vmem:[#allocation81_spill] sm:$0xff] %v6739_v10  ;;  %vm520_vm11 = vcmp.eq.s32.totalorder %v6285_v5, %v6739_v10  ;;  %v9742_v24 = vand.u32 4294901760, %v6736_v22 }
  0xf5   : > { %v5410_v16 = vsel %vm520_vm11, 1.0, %v9960_v38  ;;  %9987 = vst [vmem:[#allocation83_spill] sm:$0xff] %v6758_v15  ;;  %2365 = vmatpush.msra.mxu3 %v6758_v15 }
  0xf6   : > { %v616_v50 = vadd.f32 %v5410_v16, %v5378_v31  ;;  %v1470_v52 = vsub.f32 %v6736_v22, %v9742_v24  ;;  %v210_v31 = vld [vmem:[%s9644_s1 + $0xb0] sm:$0xff]  ;;  %794 = vperm.xlu0 %5713, %v6141_v1   ;;  %v9744_v24 = vmov 2  }
  0xf7   : > { %v6773_v40 = vand.u32 4294901760, %v210_v31  ;;  %5712 = vset.pattern.permute.xlu2 %v9744_v24 }
  0xf8   : > { %v6760_v10 = vand.u32 4294901760, %v616_v50  ;;  %v1471_v4 = vand.u32 4294901760, %v1470_v52  ;;  %635 = vperm.xlu2 %5712, %v5776_v49  }
  0xf9   : > { %1759 = vmatmul.f32.vlgmr.msrb.gmra.mxu2 %v6344_v19  ;;  %1879 = vmatmul.f32.gmra.mxu3 %v9988_v8  ;;  %9989 = vst [vmem:[#allocation84_spill] sm:$0xff] %v6773_v40  ;;  %v6783_v8 = vsub.f32 %v210_v31, %v6773_v40  ;;  %v5777_v31 = vld [vmem:[%s5958_s28 + $0x8] sm:$0xff] }
  0xfa   : > { %v6766_v2 = vsub.f32 %v616_v50, %v6760_v10  ;;  %1472 = vmatmul.f32.gmra.mxu0 %v1471_v4  ;;  %1673 = vmatmul.f32.gmra.mxu1 %v6760_v10  ;;  %v9991_v50 = vand.u32 4294901760, %v6511_v6 }
  0xfb   : > { %2205 = vmatpush.msra.mxu2 %v6773_v40  ;;  %2600 = vmatpush.msra.mxu1 %v6773_v40  ;;  %9990 = vst [vmem:[#allocation85_spill] sm:$0xff] %v6783_v8  ;;  %v6789_v16 = vand.u32 4294901760, %v6783_v8 }
  0xfc   : > { %v9743_v52 = vand.u32 4294901760, %v6766_v2  ;;  %5716 = vset.pattern.permute.xlu1 %v9744_v24  ;;  %2488 = vmatpush.msra.mxu0 %v6783_v8 }
  0xfd   : > { %9992 = vst [vmem:[#allocation86_spill] sm:$0xff] %v6789_v16  ;;  %v2369_v1 = vsub.f32 %v6783_v8, %v6789_v16  ;;  %638 = vperm.xlu1 %5716, %v5777_v31   ;;  %v5779_v8 = vld [vmem:[%s5958_s28 + $0x10] sm:$0xff] }
  0xfe   : > { %v1478_v4 = vsub.f32 %v6766_v2, %v9743_v52  ;;  %v9746_v52 = vmov 6  }
 0x100   : > { %v1479_v19 = vand.u32 4294901760, %v1478_v4  ;;  %v6798_v4 = vand.u32 4294901760, %v2369_v1  ;;  %5715 = vset.pattern.permute.xlu2 %v9746_v52 }
 0x101   : > { %1764 = vmatmul.f32.gmra.mxu2 %v6500_v25  ;;  %1885 = vmatmul.f32.gmra.mxu3 %v9991_v50  ;;  %v9993_v25 = vmov 5   ;;  %v209_v50 = vld [vmem:[%s9644_s1 + $0xa8] sm:$0xff] }
 0x102   : > { %1480 = vmatmul.f32.gmra.mxu0 %v1479_v19  ;;  %2129 = vmatmul.f32.vlgmr.msrb.gmra.mxu1 %v6337_v61  ;;  %9994 = vst [vmem:[#allocation87_spill] sm:$0xff] %v6798_v4  ;;  %v9995_v19 = vand.u32 4294901760, %v6585_v60  ;;  %v6810_v1 = vand.u32 4294901760, %v209_v50 }
 0x103   : > { %5730 = vset.pattern.permute.xlu0 %v9993_v25  ;;  %2371 = vmatpush.msra.mxu3 %v6798_v4 }
 0x104   : > { %958 = vperm.xlu0 %5730, %v5777_v31   ;;  %9996 = vst [vmem:[#allocation88_spill] sm:$0xff] %v6810_v1  ;;  %2207 = vmatpush.msra.mxu2 %v6810_v1 }
 0x105   : > { %5718 = vset.pattern.permute.xlu1 %v9746_v52  ;;  %1131 = vperm.xlu2 %5715, %v5776_v49   ;;  %v10001_v49 = vmov 3  }
 0x106   : > { %1134 = vperm.xlu1 %5718, %v5777_v31   ;;  %2602 = vmatpush.msra.mxu1 %v6810_v1 }
 0x109   : > { %1769 = vmatmul.f32.gmra.mxu2 %v6511_v6  ;;  %1891 = vmatmul.f32.gmra.mxu3 %v9995_v19  ;;  %v6815_v6 = vsub.f32 %v209_v50, %v6810_v1  ;;  %v6818_v19 = vld [vmem:[%s5958_s28 + $0x30] sm:$0xff]  ;;  %v9999_v50 = vand.u32 4294901760, %v6639_v37 }
 0x10a   : > { %2032 = vmatmul.f32.vlgmr.msrb.gmra.mxu0 %v6337_v61  ;;  %2133 = vmatmul.f32.gmra.mxu1 %v6494_v7 }
 0x10b   : > { %9997 = vst [vmem:[#allocation89_spill] sm:$0xff] %v6815_v6  ;;  %v6823_v61 = vand.u32 4294901760, %v6815_v6  ;;  %2491 = vmatpush.msra.mxu0 %v6815_v6  ;;  %v6967_v15 = vpop.f32.mrf.mxu0 }
 0x10c   : > { %973 = vperm.xlu0 %5730, %v6818_v19  }
 0x10d   : > { %9998 = vst [vmem:[#allocation90_spill] sm:$0xff] %v6823_v61  ;;  %v2375_v24 = vsub.f32 %v6815_v6, %v6823_v61  ;;  %5717 = vset.pattern.permute.xlu2 %v10001_v49 }
 0x10e   : > { %5720 = vset.pattern.permute.xlu1 %v10001_v49  ;;  %782 = vperm.xlu2 %5717, %v5777_v31  }
 0x10f   : > { %v6834_v52 = vand.u32 4294901760, %v2375_v24  ;;  %785 = vperm.xlu1 %5720, %v5779_v8  }
 0x111   : > { %1774 = vmatmul.f32.gmra.mxu2 %v6585_v60  ;;  %1897 = vmatmul.f32.gmra.mxu3 %v9999_v50  ;;  %10000 = vst [vmem:[#allocation91_spill] sm:$0xff] %v6834_v52  ;;  %v10003_v60 = vand.u32 4294901760, %v6670_v20 }
 0x112   : > { %2036 = vmatmul.f32.gmra.mxu0 %v6494_v7  ;;  %2137 = vmatmul.f32.gmra.mxu1 %v6496_v41  ;;  %v208_v7 = vld [vmem:[%s9644_s1 + $0xa0] sm:$0xff] }
 0x113   : > { %2377 = vmatpush.msra.mxu3 %v6834_v52  ;;  %v6847_v24 = vand.u32 4294901760, %v208_v7  ;;  %v6942_v52 = vpop.f32.mrf.mxu1 }
 0x114   : > { %5735 = vset.pattern.permute.xlu0 %v10002_v0 }
 0x115   : > { %1137 = vperm.xlu0 %5735, %v5779_v8   ;;  %10004 = vst [vmem:[#allocation92_spill] sm:$0xff] %v6847_v24  ;;  %2209 = vmatpush.msra.mxu2 %v6847_v24  ;;  %v6854_v50 = vsub.f32 %v208_v7, %v6847_v24  ;;  %v10008_v7 = vand.u32 4294901760, %v6736_v22 }
 0x116   : > { %2604 = vmatpush.msra.mxu1 %v6847_v24 }
 0x117   : > { %10005 = vst [vmem:[#allocation93_spill] sm:$0xff] %v6854_v50  ;;  %v6857_v31 = vand.u32 4294901760, %v6854_v50  ;;  %2494 = vmatpush.msra.mxu0 %v6854_v50 }
 0x119   : > { %1779 = vmatmul.f32.gmra.mxu2 %v6639_v37  ;;  %1903 = vmatmul.f32.gmra.mxu3 %v10003_v60  ;;  %10006 = vst [vmem:[#allocation94_spill] sm:$0xff] %v6857_v31  ;;  %v10007_v37 = vmov 2   ;;  %v6862_v60 = vld [vmem:[%s5958_s28 + $0x18] sm:$0xff] }
 0x11a   : > { %2040 = vmatmul.f32.gmra.mxu0 %v6496_v41  ;;  %2141 = vmatmul.f32.gmra.mxu1 %v6582_v63  ;;  %v2381_v41 = vsub.f32 %v6854_v50, %v6857_v31 }
 0x11b   : > { %5722 = vset.pattern.permute.xlu1 %v10007_v37  ;;  %5719 = vset.pattern.permute.xlu2 %v10007_v37 }
 0x11c   : > { %644 = vperm.xlu1 %5722, %v6862_v60   ;;  %v6874_v6 = vand.u32 4294901760, %v2381_v41  ;;  %641 = vperm.xlu2 %5719, %v5779_v8  }
 0x11d   : > { %1152 = vperm.xlu0 %5735, %v6302_v23   ;;  %v207_v23 = vld [vmem:[%s9644_s1 + $0x98] sm:$0xff] }
 0x11e   : > { %10009 = vst [vmem:[#allocation95_spill] sm:$0xff] %v6874_v6  ;;  %2383 = vmatpush.msra.mxu3 %v6874_v6  ;;  %v6880_v50 = vand.u32 4294901760, %v207_v23 }
 0x11f   : > { %v6896_v41 = vpop.f32.mrf.mxu3 }
 0x120   : > { %10010 = vst [vmem:[#allocation96_spill] sm:$0xff] %v6880_v50  ;;  %2211 = vmatpush.msra.mxu2 %v6880_v50  ;;  %2606 = vmatpush.msra.mxu1 %v6880_v50 }
 0x121   : > { %1784 = vmatmul.f32.gmra.mxu2 %v6670_v20  ;;  %1909 = vmatmul.f32.gmra.mxu3 %v10008_v7  ;;  %v6892_v20 = vsub.f32 %v207_v23, %v6880_v50  ;;  %10013 = vst [vmem:[#allocation98_spill] sm:$0xff] %v6896_v41  ;;  %v5781_v7 = vld [vmem:[%s5958_s28 + $0x20] sm:$0xff]  ;;  %v10015_v23 = vand.u32 4294901760, %v6425_v55 }
 0x122   : > { %2044 = vmatmul.f32.gmra.mxu0 %v6582_v63  ;;  %2145 = vmatmul.f32.gmra.mxu1 %v6633_v26  ;;  %v10011_v63 = vand.u32 4294901760, %v6766_v2 }
 0x123   : > { %10012 = vst [vmem:[#allocation97_spill] sm:$0xff] %v6892_v20  ;;  %2497 = vmatpush.msra.mxu0 %v6892_v20 }
 0x124   : > { %5724 = vset.pattern.permute.xlu1 %v9993_v25  ;;  %5721 = vset.pattern.permute.xlu2 %v9993_v25 }
 0x125   : > { %964 = vperm.xlu1 %5724, %v6862_v60   ;;  %5740 = vset.pattern.permute.xlu0 %v10007_v37 }
 0x126   : > { %961 = vperm.xlu2 %5721, %v5779_v8   ;;  %647 = vperm.xlu0 %5740, %v5781_v7  }
 0x127   : > { %v6914_v8 = vpop.f32.mrf.mxu2 }
 0x128   : > { %10017 = vst [vmem:[#allocation101_spill] sm:$0xff] %v6914_v8  ;;  %v10033_v8 = vand.u32 4294901760, %v6533_v11 }
 0x129   : > { %1789 = vmatmul.f32.gmra.mxu2 %v6736_v22  ;;  %1915 = vmatmul.f32.gmra.mxu3 %v10011_v63  ;;  %v6900_v22 = vand.u32 4294901760, %v6892_v20 }
 0x12a   : > { %2048 = vmatmul.f32.gmra.mxu0 %v6633_v26  ;;  %2149 = vmatmul.f32.gmra.mxu1 %v6665_v3 }
 0x12b   : > { %10014 = vst [vmem:[#allocation99_spill] sm:$0xff] %v6900_v22  ;;  %v2387_v26 = vsub.f32 %v6892_v20, %v6900_v22  ;;  %v6918_v20 = vld [vmem:[%s5958_s28 + $0x48] sm:$0xff] }
 0x12d   : > { %5726 = vset.pattern.permute.xlu1 %v10001_v49  ;;  %v6909_v63 = vand.u32 4294901760, %v2387_v26 }
 0x12e   : > { %791 = vperm.xlu1 %5726, %v5781_v7   ;;  %5723 = vset.pattern.permute.xlu2 %v10001_v49 }
 0x12f   : > { %10016 = vst [vmem:[#allocation100_spill] sm:$0xff] %v6909_v63  ;;  %2389 = vmatpush.msra.mxu3 %v6909_v63  ;;  %662 = vperm.xlu0 %5740, %v6918_v20   ;;  %v10021_v63 = vand.u32 4294901760, %v6434_v18 }
 0x130   : > { %788 = vperm.xlu2 %5723, %v6862_v60  }
 0x131   : > { %1794 = vmatmul.f32.gmra.mxu2 %v6766_v2  ;;  %1921 = vmatmul.f32.gmra.mxu3 %v10015_v23  ;;  %v206_v2 = vld [vmem:[%s9644_s1 + $0x90] sm:$0xff] }
 0x132   : > { %2052 = vmatmul.f32.gmra.mxu0 %v6665_v3  ;;  %2153 = vmatmul.f32.gmra.mxu1 %v6726_v59  ;;  %v6925_v3 = vpop.f32.mrf.mxu3  ;;  %v6927_v26 = vand.u32 4294901760, %v206_v2 }
 0x133   : > { %10018 = vst [vmem:[#allocation102_spill] sm:$0xff] %v6925_v3 }
 0x134   : > { %10019 = vst [vmem:[#allocation103_spill] sm:$0xff] %v6927_v26  ;;  %2213 = vmatpush.msra.mxu2 %v6927_v26  ;;  %v6931_v23 = vsub.f32 %v206_v2, %v6927_v26  ;;  %2608 = vmatpush.msra.mxu1 %v6927_v26 }
 0x136   : > { %10020 = vst [vmem:[#allocation104_spill] sm:$0xff] %v6931_v23  ;;  %v6940_v6 = vand.u32 4294901760, %v6931_v23  ;;  %5728 = vset.pattern.permute.xlu1 %v10002_v0  ;;  %2500 = vmatpush.msra.mxu0 %v6931_v23 }
 0x137   : > { %1143 = vperm.xlu1 %5728, %v5781_v7   ;;  %5749 = vset.pattern.permute.xlu0 %v10001_v49 }
 0x138   : > { %10022 = vst [vmem:[#allocation105_spill] sm:$0xff] %v6940_v6  ;;  %v2393_v2 = vsub.f32 %v6931_v23, %v6940_v6  ;;  %5725 = vset.pattern.permute.xlu2 %v10002_v0  ;;  %v10026_v23 = vand.u32 4294901760, %v6472_v9 }
 0x139   : > { %1799 = vmatmul.f32.gmra.mxu2 %v6425_v55  ;;  %1927 = vmatmul.f32.gmra.mxu3 %v10021_v63  ;;  %v6951_v55 = vld [vmem:[%s5958_s28 + $0x50] sm:$0xff] }
 0x13a   : > { %2056 = vmatmul.f32.gmra.mxu0 %v6726_v59  ;;  %2157 = vmatmul.f32.gmra.mxu1 %v6760_v10  ;;  %v6954_v59 = vpop.f32.mrf.mxu2  ;;  %v6956_v63 = vand.u32 4294901760, %v2393_v2  ;;  %v6959_v4 = vpop.f32.mrf.mxu3 }
 0x13b   : > { %809 = vperm.xlu0 %5749, %v6951_v55   ;;  %10023 = vst [vmem:[#allocation106_spill] sm:$0xff] %v6954_v59  ;;  %1140 = vperm.xlu2 %5725, %v6862_v60   ;;  %v6969_v2 = vpop.f32.mrf.mxu1  ;;  %v205_v60 = vld [vmem:[%s9644_s1 + $0x88] sm:$0xff] }
 0x13c   : > { %10024 = vst [vmem:[#allocation107_spill] sm:$0xff] %v6956_v63  ;;  %2395 = vmatpush.msra.mxu3 %v6956_v63  ;;  %v6976_v63 = vld [vmem:[%s5958_s28 + $0x28] sm:$0xff] }
 0x13d   : > { %10025 = vst [vmem:[#allocation108_spill] sm:$0xff] %v6959_v4 }
 0x13f   : > { %5731 = vset.pattern.permute.xlu1 %v9993_v25 }
 0x140   : > { %970 = vperm.xlu1 %5731, %v6976_v63  }
 0x141   : > { %1804 = vmatmul.f32.gmra.mxu2 %v6434_v18  ;;  %1933 = vmatmul.f32.gmra.mxu3 %v10026_v23  ;;  %v6979_v18 = vand.u32 4294901760, %v205_v60  ;;  %v6987_v23 = vld [vmem:[%s5958_s28 + $0x58] sm:$0xff] }
 0x142   : > { %2060 = vmatmul.f32.gmra.mxu0 %v6760_v10  ;;  %2161 = vmatmul.f32.gmra.mxu1 %v6413_v46  ;;  %v204_v10 = vld [vmem:[%s9644_s1 + $0x80] sm:$0xff]  ;;  %10028 = vst [vmem:[#allocation110_spill] sm:$0xff] %v6987_v23  ;;  %v6996_v59 = vpop.f32.mrf.mxu2  ;;  %v6998_v41 = vpop.f32.mrf.mxu3 }
 0x143   : > { %10027 = vst [vmem:[#allocation109_spill] sm:$0xff] %v6979_v18  ;;  %5754 = vset.pattern.permute.xlu0 %v9993_v25  ;;  %5727 = vset.pattern.permute.xlu2 %v9993_v25  ;;  %v6992_v4 = vsub.f32 %v205_v60, %v6979_v18  ;;  %v6994_v3 = vand.u32 4294901760, %v204_v10 }
 0x144   : > { %988 = vperm.xlu0 %5754, %v6987_v23   ;;  %2215 = vmatpush.msra.mxu2 %v6979_v18  ;;  %10031 = vst [vmem:[#allocation113_spill] sm:$0xff] %v6996_v59  ;;  %v10081_v59 = vld [vmem:[#allocation56_spill] sm:$0xff] }
 0x145   : > { %10029 = vst [vmem:[#allocation111_spill] sm:$0xff] %v6992_v4  ;;  %967 = vperm.xlu2 %5727, %v5781_v7   ;;  %2610 = vmatpush.msra.mxu1 %v6979_v18  ;;  %v7005_v23 = vand.u32 4294901760, %v6992_v4  ;;  %v7008_v60 = vsub.f32 %v204_v10, %v6994_v3  ;;  %v7012_v7 = vpop.f32.mrf.mxu0 }
 0x146   : > { %10030 = vst [vmem:[#allocation112_spill] sm:$0xff] %v6994_v3  ;;  %2503 = vmatpush.msra.mxu0 %v6992_v4  ;;  %2217 = vmatpush.msra.mxu2 %v6994_v3 }
 0x147   : > { %10032 = vst [vmem:[#allocation114_spill] sm:$0xff] %v6998_v41  ;;  %v2399_v41 = vsub.f32 %v6992_v4, %v7005_v23  ;;  %2612 = vmatpush.msra.mxu1 %v6994_v3 }
 0x148   : > { %10034 = vst [vmem:[#allocation115_spill] sm:$0xff] %v7005_v23  ;;  %2720 = vmatpush.msrb.mxu2 %v6684_v62  ;;  %5733 = vset.pattern.permute.xlu1 %v10007_v37 }
 0x149   : > { %1809 = vmatmul.f32.gmra.mxu2 %v6472_v9  ;;  %1939 = vmatmul.f32.gmra.mxu3 %v10033_v8  ;;  %10035 = vst [vmem:[#allocation116_spill] sm:$0xff] %v7008_v60  ;;  %v7018_v9 = vand.u32 4294901760, %v7008_v60  ;;  %v7023_v8 = vpop.f32.mrf.mxu1 }
 0x14a   : > { %2064 = vmatmul.f32.gmra.mxu0 %v6413_v46  ;;  %2165 = vmatmul.f32.gmra.mxu1 %v6411_v13  ;;  %v7025_v46 = vand.u32 4294901760, %v2399_v41  ;;  %v7037_v62 = vpop.f32.mrf.mxu2  ;;  %v10040_v41 = vand.u32 4294901760, %v6565_v56 }
 0x14b   : > { %10036 = vst [vmem:[#allocation117_spill] sm:$0xff] %v7018_v9  ;;  %v2405_v10 = vsub.f32 %v7008_v60, %v7018_v9  ;;  %2506 = vmatpush.msra.mxu0 %v7008_v60  ;;  %653 = vperm.xlu1 %5733, %v6818_v19   ;;  %v7044_v60 = vpop.f32.mrf.mxu3 }
 0x14c   : > { %10037 = vst [vmem:[#allocation118_spill] sm:$0xff] %v7025_v46  ;;  %2401 = vmatpush.msra.mxu3 %v7025_v46  ;;  %3122 = vmatpush.msrb.mxu1 %v6037_v30 }
 0x14d   : > { %2957 = vmatpush.msrb.mxu0 %v5988_v14  ;;  %v7034_v4 = vand.u32 4294901760, %v2405_v10  ;;  %5729 = vset.pattern.permute.xlu2 %v10007_v37  ;;  %10039 = vst [vmem:[#allocation120_spill] sm:$0xff] %v7037_v62  ;;  %v7052_v30 = vpop.f32.mrf.mxu0 }
 0x14e   : > { %650 = vperm.xlu2 %5729, %v6976_v63   ;;  %10041 = vst [vmem:[#allocation121_spill] sm:$0xff] %v7044_v60  ;;  %2724 = vmatpush.msrb.mxu2 %v6743_v32 }
 0x14f   : > { %10038 = vst [vmem:[#allocation119_spill] sm:$0xff] %v7034_v4  ;;  %2407 = vmatpush.msra.mxu3 %v7034_v4  ;;  %2959 = vmatpush.msrb.mxu0 %v5997_v17 }
 0x150   : > { %3128 = vmatpush.msrb.mxu1 %v6056_v36  ;;  %2728 = vmatpush.msrb.mxu2 %v6789_v16  ;;  %v7121_v16 = vld [vmem:[%s5958_s28 + $0x60] sm:$0xff] }
 0x151   : > { %1814 = vmatmul.f32.gmra.mxu2 %v6533_v11  ;;  %1945 = vmatmul.f32.gmra.mxu3 %v10040_v41  ;;  %v7054_v11 = vpop.f32.mrf.mxu1 }
 0x152   : > { %2068 = vmatmul.f32.gmra.mxu0 %v6411_v13  ;;  %2169 = vmatmul.f32.gmra.mxu1 %v6463_v47  ;;  %v10042_v13 = vand.u32 4294901760, %v6615_v29  ;;  %v7067_v36 = vpop.f32.mrf.mxu2 }
 0x153   : > { %2826 = vmatpush.msrb.mxu3 %v6659_v12  ;;  %5736 = vset.pattern.permute.xlu1 %v10002_v0  ;;  %10043 = vst [vmem:[#allocation122_spill] sm:$0xff] %v7067_v36  ;;  %v7069_v10 = vpop.f32.mrf.mxu3 }
 0x154   : > { %1149 = vperm.xlu1 %5736, %v6818_v19   ;;  %2961 = vmatpush.msrb.mxu0 %v6011_v21  ;;  %10044 = vst [vmem:[#allocation123_spill] sm:$0xff] %v7069_v10 }
 0x155   : > { %2828 = vmatpush.msrb.mxu3 %v6714_v33  ;;  %3134 = vmatpush.msrb.mxu1 %v6075_v42  ;;  %v10045_v42 = vld [vmem:[#allocation16_spill] sm:$0xff] }
 0x156   : > { %5732 = vset.pattern.permute.xlu2 %v10002_v0  ;;  %2963 = vmatpush.msrb.mxu0 %v6030_v28 }
 0x157   : > { %1146 = vperm.xlu2 %5732, %v6976_v63   ;;  %2830 = vmatpush.msrb.mxu3 %v6773_v40  ;;  %v7088_v63 = vld [vmem:[%s5958_s28 + $0x38] sm:$0xff]  ;;  %v10056_v40 = vld [vmem:[#allocation34_spill] sm:$0xff] }
 0x158   : > { %3140 = vmatpush.msrb.mxu1 %v10045_v42  ;;  %2732 = vmatpush.msrb.mxu2 %v6823_v61 }
 0x159   : > { %1819 = vmatmul.f32.gmra.mxu2 %v6565_v56  ;;  %1951 = vmatmul.f32.gmra.mxu3 %v10042_v13  ;;  %v7077_v56 = vpop.f32.mrf.mxu0  ;;  %v7079_v41 = vpop.f32.mrf.mxu1  ;;  %v10047_v13 = vand.u32 4294901760, %v6621_v53 }
 0x15a   : > { %2072 = vmatmul.f32.gmra.mxu0 %v6463_v47  ;;  %2173 = vmatmul.f32.gmra.mxu1 %v6525_v44  ;;  %v10046_v47 = vld [vmem:[#allocation21_spill] sm:$0xff] }
 0x15b   : > { %2832 = vmatpush.msrb.mxu3 %v6810_v1  ;;  %2965 = vmatpush.msrb.mxu0 %v6048_v34  ;;  %v7095_v42 = vpop.f32.mrf.mxu2 }
 0x15c   : > { %3146 = vmatpush.msrb.mxu1 %v10046_v47  ;;  %5738 = vset.pattern.permute.xlu1 %v10001_v49  ;;  %10048 = vst [vmem:[#allocation16_spill] sm:$0xff] %v7095_v42  ;;  %v10049_v47 = vld [vmem:[#allocation22_spill] sm:$0xff]  ;;  %v7103_v61 = vpop.f32.mrf.mxu3 }
 0x15d   : > { %2736 = vmatpush.msrb.mxu2 %v6857_v31  ;;  %800 = vperm.xlu1 %5738, %v7088_v63   ;;  %v1340_v31 = vsel %vm1338_vm12, %v6331_v35, 0  ;;  %10050 = vst [vmem:[#allocation21_spill] sm:$0xff] %v7103_v61  ;;  %v10053_v35 = vld [vmem:[#allocation30_spill] sm:$0xff] }
 0x15e   : > { %2967 = vmatpush.msrb.mxu0 %v6063_v39  ;;  %3152 = vmatpush.msrb.mxu1 %v10049_v47 }
 0x15f   : > { %5734 = vset.pattern.permute.xlu2 %v10001_v49  ;;  %2834 = vmatpush.msrb.mxu3 %v6847_v24 }
 0x160   : > { %797 = vperm.xlu2 %5734, %v6818_v19   ;;  %2969 = vmatpush.msrb.mxu0 %v6082_v45  ;;  %v636_v19 = vpop.permute.xlu2 %635  ;;  %v780_v32 = vpop.permute.xlu0 %779 }
 0x161   : > { %1824 = vmatmul.f32.gmra.mxu2 %v6615_v29  ;;  %1957 = vmatmul.f32.gmra.mxu3 %v10047_v13  ;;  %v7107_v29 = vpop.f32.mrf.mxu0  ;;  %v7113_v13 = vand.u32 4294901760, %v1340_v31  ;;  %v7115_v47 = vpop.f32.mrf.mxu1  ;;  %vm682_vm13 = vcmp.eq.s32.totalorder %v6285_v5, %v636_v19  ;;  %vm683_vm14 = vcmp.eq.s32.totalorder %v6305_v48, %v636_v19  ;;  %vm826_vm15 = vcmp.eq.s32.totalorder %v6285_v5, %v780_v32 }
 0x162   : > { %2076 = vmatmul.f32.gmra.mxu0 %v6525_v44  ;;  %2177 = vmatmul.f32.gmra.mxu1 %v6556_v27  ;;  %v10051_v44 = vld [vmem:[#allocation26_spill] sm:$0xff]  ;;  %vm827_vm0 = vcmp.eq.s32.totalorder %v6305_v48, %v780_v32  ;;  %v5460_v46 = vsel %vm826_vm15, 1.0, %v9960_v38 }
 0x163   : > { %3158 = vmatpush.msrb.mxu1 %v10051_v44  ;;  %2971 = vmatpush.msrb.mxu0 %v6101_v51  ;;  %10052 = vst [vmem:[#allocation22_spill] sm:$0xff] %v7113_v13  ;;  %v10054_v44 = vand.u32 4294901760, %v6703_v43  ;;  %v7134_v4 = vsub.f32 %v1340_v31, %v7113_v13  ;;  %v5461_v31 = vsel %vm827_vm0, 1.0, %v9960_v38 }
 0x164   : > { %5759 = vset.pattern.permute.xlu0 %v10002_v0  ;;  %2740 = vmatpush.msrb.mxu2 %v6900_v22  ;;  %v5429_v22 = vsel %vm683_vm14, 1.0, %v9960_v38 }
 0x165   : > { %3164 = vmatpush.msrb.mxu1 %v10053_v35  ;;  %5741 = vset.pattern.permute.xlu1 %v10007_v37  ;;  %v5428_v35 = vsel %vm682_vm13, 1.0, %v9960_v38  ;;  %v923_v24 = vadd.f32 %v5461_v31, %v5429_v22  ;;  %v956_v1 = vpop.permute.xlu1 %955 }
 0x166   : > { %1167 = vperm.xlu0 %5759, %v7121_v16   ;;  %2836 = vmatpush.msrb.mxu3 %v6880_v50  ;;  %vm1002_vm1 = vcmp.eq.s32.totalorder %v6285_v5, %v956_v1  ;;  %vm1003_vm2 = vcmp.eq.s32.totalorder %v6305_v48, %v956_v1  ;;  %v10058_v50 = vld [vmem:[#allocation25_spill] sm:$0xff] }
 0x167   : > { %2973 = vmatpush.msrb.mxu0 %v6119_v57  ;;  %3170 = vmatpush.msrb.mxu1 %v10056_v40  ;;  %v5493_v40 = vsel %vm1003_vm2, 1.0, %v9960_v38 }
 0x168   : > { %5737 = vset.pattern.permute.xlu2 %v10007_v37  ;;  %2744 = vmatpush.msrb.mxu2 %v6940_v6  ;;  %v1099_v1 = vadd.f32 %v5493_v40, %v923_v24  ;;  %v1132_v61 = vpop.permute.xlu2 %1131  ;;  %v10062_v24 = vld [vmem:[#allocation67_spill] sm:$0xff]  ;;  %v7183_v40 = vpop.permute.xlu0 %794 }
 0x169   : > { %1829 = vmatmul.f32.gmra.mxu2 %v6621_v53  ;;  %1963 = vmatmul.f32.gmra.mxu3 %v10054_v44  ;;  %v1343_v53 = vsel %vm1338_vm12, %v6487_v54, 0  ;;  %v7139_v44 = vld [vmem:[%s5958_s28 + $0x40] sm:$0xff]  ;;  %v922_v54 = vadd.f32 %v5460_v46, %v5428_v35  ;;  %v7160_v12 = vpop.f32.mrf.mxu0  ;;  %v5492_v46 = vsel %vm1002_vm1, 1.0, %v9960_v38  ;;  %vm1178_vm3 = vcmp.eq.s32.totalorder %v6285_v5, %v1132_v61 }
 0x16a   : > { %2080 = vmatmul.f32.gmra.mxu0 %v6556_v27  ;;  %2181 = vmatmul.f32.gmra.mxu1 %v6610_v58  ;;  %v7145_v27 = vpop.f32.mrf.mxu2  ;;  %v7153_v32 = vand.u32 4294901760, %v1343_v53  ;;  %v10059_v35 = vld [vmem:[#allocation41_spill] sm:$0xff]  ;;  %vm1179_vm4 = vcmp.eq.s32.totalorder %v6305_v48, %v1132_v61 }
 0x16b   : > { %659 = vperm.xlu1 %5741, %v7139_v44   ;;  %10055 = vst [vmem:[#allocation26_spill] sm:$0xff] %v7145_v27  ;;  %656 = vperm.xlu2 %5737, %v7088_v63   ;;  %v1098_v31 = vadd.f32 %v5492_v46, %v922_v54  ;;  %v10060_v27 = vld [vmem:[#allocation28_spill] sm:$0xff]  ;;  %v5524_v46 = vsel %vm1178_vm3, 1.0, %v9960_v38 }
 0x16c   : > { %v1706_v19 = vpop.f32.mrf.mxu3  ;;  %10057 = vst [vmem:[#allocation30_spill] sm:$0xff] %v7153_v32  ;;  %2975 = vmatpush.msrb.mxu0 %v10058_v50  ;;  %3176 = vmatpush.msrb.mxu1 %v10059_v35  ;;  %v7175_v33 = vsub.f32 %v1343_v53, %v7153_v32  ;;  %v10061_v35 = vld [vmem:[#allocation61_spill] sm:$0xff] }
 0x16d   : > { %2838 = vmatpush.msrb.mxu3 %v6927_v26  ;;  %2748 = vmatpush.msrb.mxu2 %v7005_v23  ;;  %v1346_v54 = vsel %vm1338_vm12, %v10061_v35, 0  ;;  %v10063_v23 = vand.u32 4294901760, %v7134_v4  ;;  %v7189_v53 = vadd.f32 %v5524_v46, %v1098_v31  ;;  %v10066_v26 = vld [vmem:[#allocation42_spill] sm:$0xff]  ;;  %v10073_v31 = vld [vmem:[#allocation65_spill] sm:$0xff] }
 0x16e   : > { %2977 = vmatpush.msrb.mxu0 %v10060_v27  ;;  %3182 = vmatpush.msrb.mxu1 %v10066_v26 }
 0x16f   : > { %v7162_v22 = vpop.f32.mrf.mxu1  ;;  %v2221_v61 = vsub.f32 %v7134_v4, %v10063_v23  ;;  %10064 = vst [vmem:[#allocation34_spill] sm:$0xff] %v7189_v53  ;;  %v10069_v23 = vld [vmem:[#allocation32_spill] sm:$0xff]  ;;  %v639_v46 = vpop.permute.xlu1 %638  ;;  %5764 = vset.pattern.permute.xlu0 %v10007_v37  ;;  %2840 = vmatpush.msrb.mxu3 %v6979_v18  ;;  %v1349_v18 = vsel %vm1338_vm12, %v10073_v31, 0  ;;  %v10075_v53 = vand.u32 4294901760, %v7175_v33 }
 0x170   : > { %2979 = vmatpush.msrb.mxu0 %v10069_v23  ;;  %vm684_vm5 = vcmp.eq.s32.totalorder %v6285_v5, %v639_v46  ;;  %vm685_vm6 = vcmp.eq.s32.totalorder %v6305_v48, %v639_v46  ;;  %2752 = vmatpush.msrb.mxu2 %v7018_v9 }
 0x171   : > { %1834 = vmatmul.f32.gmra.mxu2 %v6703_v43  ;;  %2409 = vmatmul.f32.vlgmr.msra.gmra.mxu3 %v7113_v13  ;;  %v5525_v43 = vsel %vm1179_vm4, 1.0, %v9960_v38  ;;  %v7195_v13 = vand.u32 4294901760, %v1346_v54  ;;  %v5431_v46 = vsel %vm685_vm6, 1.0, %v9960_v38 }
 0x172   : > { %2084 = vmatmul.f32.gmra.mxu0 %v6610_v58  ;;  %2185 = vmatmul.f32.gmra.mxu1 %v10062_v24  ;;  %v7191_v6 = vadd.f32 %v5525_v43, %v1099_v1  ;;  %v10070_v1 = vld [vmem:[#allocation46_spill] sm:$0xff]  ;;  %v2222_v43 = vand.u32 4294901760, %v2221_v61 }
 0x173   : > { %5743 = vset.pattern.permute.xlu1 %v9993_v25  ;;  %10067 = vst [vmem:[#allocation41_spill] sm:$0xff] %v7195_v13  ;;  %5739 = vset.pattern.permute.xlu2 %v9993_v25  ;;  %v7218_v61 = vsub.f32 %v1346_v54, %v7195_v13  ;;  %v2229_v54 = vsub.f32 %v7175_v33, %v10075_v53 }
 0x174   : > { %10065 = vst [vmem:[#allocation25_spill] sm:$0xff] %v7191_v6  ;;  %v1545_v35 = vpop.f32.mrf.mxu2  ;;  %v1874_v58 = vpop.f32.mrf.mxu3  ;;  %979 = vperm.xlu1 %5743, %v7139_v44   ;;  %976 = vperm.xlu2 %5739, %v7088_v63   ;;  %v10072_v63 = vld [vmem:[#allocation37_spill] sm:$0xff] }
 0x175   : > { %v7197_v10 = vadd.f32 %v1706_v19, %v1545_v35  ;;  %3188 = vmatpush.msrb.mxu1 %v10070_v1  ;;  %v7213_v19 = vld [vmem:[%s5958_s28 + $0x70] sm:$0xff]  ;;  %2981 = vmatpush.msrb.mxu0 %v10072_v63  ;;  %v5430_v35 = vsel %vm684_vm5, 1.0, %v9960_v38  ;;  %v783_v1 = vpop.permute.xlu2 %782 }
 0x176   : > { %10071 = vst [vmem:[#allocation61_spill] sm:$0xff] %v7213_v19  ;;  %677 = vperm.xlu0 %5764, %v7213_v19   ;;  %vm828_vm7 = vcmp.eq.s32.totalorder %v6285_v5, %v783_v1  ;;  %vm829_vm8 = vcmp.eq.s32.totalorder %v6305_v48, %v783_v1  ;;  %2842 = vmatpush.msrb.mxu3 %v6994_v3  ;;  %v7246_v3 = vand.u32 4294901760, %v1349_v18 }
 0x177   : > { %10068 = vst [vmem:[#allocation28_spill] sm:$0xff] %v7197_v10  ;;  %v7204_v6 = vpop.f32.mrf.mxu0  ;;  %v7206_v26 = vpop.f32.mrf.mxu1  ;;  %v10074_v10 = vld [vmem:[#allocation75_spill] sm:$0xff]  ;;  %v5462_v42 = vsel %vm828_vm7, 1.0, %v9960_v38  ;;  %v5463_v31 = vsel %vm829_vm8, 1.0, %v9960_v38 }
 0x178   : > { %v924_v36 = vadd.f32 %v5462_v42, %v5430_v35  ;;  %v925_v1 = vadd.f32 %v5463_v31, %v5431_v46  ;;  %10078 = vst [vmem:[#allocation67_spill] sm:$0xff] %v7246_v3  ;;  %v10079_v42 = vld [vmem:[#allocation54_spill] sm:$0xff]  ;;  %v10080_v31 = vld [vmem:[#allocation45_spill] sm:$0xff]  ;;  %v1135_v9 = vpop.permute.xlu1 %1134  ;;  %3408 = vmatpush.msra.mxu3 %v5988_v14 }
 0x179   : > { %2223 = vmatmul.f32.vlgmr.msra.gmra.mxu2 %v2222_v43  ;;  %2413 = vmatmul.f32.gmra.mxu3 %v7153_v32  ;;  %v959_v43 = vpop.permute.xlu0 %958  ;;  %v1647_v32 = vadd.f32 %v6942_v52, %v6967_v15  ;;  %vm1180_vm11 = vcmp.eq.s32.totalorder %v6285_v5, %v1135_v9  ;;  %vm1181_vm13 = vcmp.eq.s32.totalorder %v6305_v48, %v1135_v9  ;;  %v10085_v9 = vld [vmem:[#allocation68_spill] sm:$0xff] }
 0x17a   : > { %2088 = vmatmul.f32.gmra.mxu0 %v10062_v24  ;;  %2189 = vmatmul.f32.gmra.mxu1 %v10074_v10  ;;  %vm1004_vm9 = vcmp.eq.s32.totalorder %v6285_v5, %v959_v43  ;;  %v10076_v24 = vld [vmem:[#allocation50_spill] sm:$0xff]  ;;  %vm1005_vm10 = vcmp.eq.s32.totalorder %v6305_v48, %v959_v43 }
 0x17b   : > { %3194 = vmatpush.msrb.mxu1 %v10076_v24  ;;  %v5494_v52 = vsel %vm1004_vm9, 1.0, %v9960_v38  ;;  %v5495_v62 = vsel %vm1005_vm10, 1.0, %v9960_v38  ;;  %v10077_v24 = vld [vmem:[#allocation40_spill] sm:$0xff]  ;;  %3410 = vmatpush.msra.mxu3 %v5997_v17 }
 0x17c   : > { %v1760_v60 = vpop.f32.mrf.mxu2  ;;  %v1880_v53 = vpop.f32.mrf.mxu3  ;;  %5745 = vset.pattern.permute.xlu1 %v10001_v49  ;;  %2983 = vmatpush.msrb.mxu0 %v10077_v24  ;;  %v1101_v19 = vadd.f32 %v5495_v62, %v925_v1  ;;  %v1100_v43 = vadd.f32 %v5494_v52, %v924_v36  ;;  %v7265_v36 = vsub.f32 %v1349_v18, %v7246_v3  ;;  %v5526_v1 = vsel %vm1180_vm11, 1.0, %v9960_v38 }
 0x17d   : > { %v1761_v15 = vadd.f32 %v1760_v60, %v1647_v32  ;;  %806 = vperm.xlu1 %5745, %v6918_v20   ;;  %5742 = vset.pattern.permute.xlu2 %v10001_v49  ;;  %v2230_v32 = vand.u32 4294901760, %v2229_v54  ;;  %v7262_v62 = vpop.permute.xlu2 %641  ;;  %v1651_v18 = vadd.f32 %v6969_v2, %v7012_v7 }
 0x17e   : > { %3200 = vmatpush.msrb.mxu1 %v10079_v42  ;;  %803 = vperm.xlu2 %5742, %v7139_v44   ;;  %v1352_v42 = vsel %vm1338_vm12, %v10085_v9, 0  ;;  %vm687_vm14 = vcmp.eq.s32.totalorder %v6305_v48, %v7262_v62 }
 0x17f   : > { %v7251_v35 = vpop.f32.mrf.mxu0  ;;  %v7253_v60 = vpop.f32.mrf.mxu1  ;;  %v1875_v46 = vadd.f32 %v1874_v58, %v1761_v15  ;;  %2985 = vmatpush.msrb.mxu0 %v10080_v31  ;;  %5769 = vset.pattern.permute.xlu0 %v10001_v49  ;;  %v10082_v58 = vand.u32 4294901760, %v7134_v4  ;;  %v5527_v15 = vsel %vm1181_vm13, 1.0, %v9960_v38  ;;  %v10089_v31 = vld [vmem:[#allocation57_spill] sm:$0xff]  ;;  %v7296_v2 = vand.u32 4294901760, %v1352_v42 }
 0x180   : > { %3206 = vmatpush.msrb.mxu1 %v10081_v59  ;;  %v10083_v59 = vand.u32 4294901760, %v7218_v61  ;;  %3412 = vmatpush.msra.mxu3 %v6011_v21 }
 0x181   : > { %2231 = vmatmul.f32.gmra.mxu2 %v2230_v32  ;;  %2417 = vmatmul.f32.gmra.mxu3 %v7195_v13  ;;  %v7275_v52 = vpop.permute.xlu0 %973  ;;  %v7283_v32 = vadd.f32 %v5527_v15, %v1101_v19  ;;  %v10091_v19 = vld [vmem:[#allocation7_spill] sm:$0xff]  ;;  %v7308_v7 = vpop.permute.xlu1 %785 }
 0x182   : > { %2092 = vmatmul.f32.gmra.mxu0 %v10074_v10  ;;  %2616 = vmatmul.f32.vlgmr.msra.gmra.mxu1 %v10082_v58  ;;  %v2237_v54 = vsub.f32 %v7218_v61, %v10083_v59  ;;  %10084 = vst [vmem:[#allocation42_spill] sm:$0xff] %v7275_v52  ;;  %v7281_v10 = vadd.f32 %v5526_v1, %v1100_v43  ;;  %v7286_v58 = vld [vmem:[%s5958_s28 + $0x78] sm:$0xff]  ;;  %v10088_v59 = vld [vmem:[#allocation5_spill] sm:$0xff]  ;;  %v10090_v52 = vld [vmem:[#allocation47_spill] sm:$0xff] }
 0x183   : > { %10087 = vst [vmem:[#allocation46_spill] sm:$0xff] %v7283_v32  ;;  %824 = vperm.xlu0 %5769, %v7286_v58   ;;  %3280 = vmatpush.msra.mxu2 %v10088_v59  ;;  %v10092_v43 = vld [vmem:[#allocation74_spill] sm:$0xff]  ;;  %v5433_v59 = vsel %vm687_vm14, 1.0, %v9960_v38  ;;  %vm831_vm1 = vcmp.eq.s32.totalorder %v6305_v48, %v7308_v7  ;;  %vm837_vm14 = vcmp.eq.s32.totalorder %v6305_v48, %v7183_v40 }
 0x184   : > { %10086 = vst [vmem:[#allocation32_spill] sm:$0xff] %v7281_v10  ;;  %v1765_v13 = vpop.f32.mrf.mxu2  ;;  %v1886_v5 = vpop.f32.mrf.mxu3  ;;  %3212 = vmatpush.msrb.mxu1 %v10089_v31  ;;  %2987 = vmatpush.msrb.mxu0 %v10090_v52  ;;  %vm375_vm15 = vcmp.eq.s32.totalorder %v6305_v48, %v10092_v43  ;;  %v2238_v1 = vand.u32 4294901760, %v2237_v54  ;;  %v10097_v54 = vand.u32 4294901760, %v7265_v36  ;;  %v1655_v43 = vadd.f32 %v7023_v8, %v7052_v30 }
 0x185   : > { %v1766_v9 = vadd.f32 %v1765_v13, %v1651_v18  ;;  %5747 = vset.pattern.permute.xlu1 %v10002_v0  ;;  %3283 = vmatpush.msra.mxu2 %v10091_v19  ;;  %10093 = vst [vmem:[#allocation37_spill] sm:$0xff] %v7308_v7  ;;  %v10094_v19 = vld [vmem:[#allocation77_spill] sm:$0xff] }
 0x186   : > { %1158 = vperm.xlu1 %5747, %v6918_v20   ;;  %5744 = vset.pattern.permute.xlu2 %v10002_v0  ;;  %vm519_vm0 = vcmp.eq.s32.totalorder %v6305_v48, %v10094_v19  ;;  %v10104_v19 = vld [vmem:[#allocation11_spill] sm:$0xff] }
 0x187   : > { %v2033_v31 = vpop.f32.mrf.mxu0  ;;  %v7303_v13 = vpop.f32.mrf.mxu1  ;;  %v1881_v15 = vadd.f32 %v1880_v53, %v1766_v9  ;;  %1155 = vperm.xlu2 %5744, %v7139_v44   ;;  %3666 = vmatpush.msra.mxu1 %v5988_v14  ;;  %v5377_v44 = vsel %vm375_vm15, 1.0, %v9960_v38  ;;  %v10096_v14 = vand.u32 4294901760, %v7175_v33  ;;  %v2245_v9 = vsub.f32 %v7265_v36, %v10097_v54 }
 0x188   : > { %v2034_v18 = vadd.f32 %v2033_v31, %v1875_v46  ;;  %v7317_v53 = vpop.permute.xlu2 %961  ;;  %v7320_v46 = vsub.f32 %v1352_v42, %v7296_v2  ;;  %v5465_v31 = vsel %vm831_vm1, 1.0, %v9960_v38  ;;  %v10099_v42 = vld [vmem:[#allocation70_spill] sm:$0xff]  ;;  %v5409_v54 = vsel %vm519_vm0, 1.0, %v9960_v38  ;;  %3414 = vmatpush.msra.mxu3 %v6030_v28 }
 0x189   : > { %2239 = vmatmul.f32.gmra.mxu2 %v2238_v1  ;;  %2421 = vmatmul.f32.gmra.mxu3 %v7246_v3  ;;  %10095 = vst [vmem:[#allocation65_spill] sm:$0xff] %v7317_v53  ;;  %v7333_v1 = vpop.permute.xlu0 %1137  ;;  %v1355_v32 = vsel %vm1338_vm12, %v10099_v42, 0  ;;  %v927_v3 = vadd.f32 %v5465_v31, %v5433_v59  ;;  %vm1007_vm2 = vcmp.eq.s32.totalorder %v6305_v48, %v7317_v53  ;;  %v10103_v31 = vld [vmem:[#allocation8_spill] sm:$0xff] }
 0x18a   : > { %2509 = vmatmul.f32.vlgmr.msra.gmra.mxu0 %v7134_v4  ;;  %2622 = vmatmul.f32.gmra.mxu1 %v10096_v14  ;;  %10098 = vst [vmem:[#allocation75_spill] sm:$0xff] %v7333_v1  ;;  %v10100_v4 = vld [vmem:[#allocation6_spill] sm:$0xff]  ;;  %v10101_v14 = vld [vmem:[#allocation9_spill] sm:$0xff]  ;;  %v5497_v42 = vsel %vm1007_vm2, 1.0, %v9960_v38  ;;  %vm1183_vm3 = vcmp.eq.s32.totalorder %v6305_v48, %v7333_v1  ;;  %v7353_v8 = vadd.f32 %v7253_v60, %v2034_v18 }
 0x18b   : > { %3539 = vmatpush.msra.mxu0 %v10100_v4  ;;  %3286 = vmatpush.msra.mxu2 %v10101_v14  ;;  %v1103_v59 = vadd.f32 %v5497_v42, %v927_v3  ;;  %v7359_v4 = vand.u32 4294901760, %v1355_v32  ;;  %v2246_v14 = vand.u32 4294901760, %v2245_v9  ;;  %v5529_v1 = vsel %vm1183_vm3, 1.0, %v9960_v38  ;;  %v10107_v9 = vld [vmem:[#allocation81_spill] sm:$0xff] }
 0x18c   : > { %v1770_v10 = vpop.f32.mrf.mxu2  ;;  %v7347_v7 = vpop.f32.mrf.mxu3  ;;  %10102 = vst [vmem:[#allocation50_spill] sm:$0xff] %v7353_v8  ;;  %3668 = vmatpush.msra.mxu1 %v5997_v17  ;;  %v615_v60 = vadd.f32 %v5409_v54, %v5377_v44  ;;  %v9811_v17 = vand.u32 4294901760, %v7320_v46  ;;  %vm521_vm4 = vcmp.eq.s32.totalorder %v6305_v48, %v10107_v9  ;;  %v10108_v44 = vld [vmem:[#allocation79_spill] sm:$0xff]  ;;  %3416 = vmatpush.msra.mxu3 %v6048_v34 }
 0x18d   : > { %v1771_v30 = vadd.f32 %v1770_v10, %v1655_v43  ;;  %3543 = vmatpush.msra.mxu0 %v10103_v31  ;;  %3289 = vmatpush.msra.mxu2 %v10104_v19  ;;  %v7366_v3 = vadd.f32 %v5529_v1, %v1103_v59  ;;  %v10106_v10 = vld [vmem:[#allocation10_spill] sm:$0xff]  ;;  %vm377_vm5 = vcmp.eq.s32.totalorder %v6305_v48, %v10108_v44  ;;  %v10110_v59 = vld [vmem:[#allocation13_spill] sm:$0xff]  ;;  %v10114_v9 = vld [vmem:[#allocation15_spill] sm:$0xff] }
 0x18e   : > { %5750 = vset.pattern.permute.xlu1 %v9993_v25  ;;  %3670 = vmatpush.msra.mxu1 %v6011_v21  ;;  %v7379_v1 = vsub.f32 %v1355_v32, %v7359_v4  ;;  %v1358_v42 = vsel %vm1338_vm12, %v615_v60, 0  ;;  %v10112_v60 = vld [vmem:[#allocation14_spill] sm:$0xff] }
 0x18f   : > { %v2037_v18 = vpop.f32.mrf.mxu0  ;;  %v2138_v8 = vpop.f32.mrf.mxu1  ;;  %v1887_v53 = vadd.f32 %v1886_v5, %v1771_v30  ;;  %985 = vperm.xlu1 %5750, %v6951_v55   ;;  %10105 = vst [vmem:[#allocation40_spill] sm:$0xff] %v7366_v3  ;;  %3547 = vmatpush.msra.mxu0 %v10106_v10  ;;  %v1659_v30 = vadd.f32 %v7054_v11, %v7077_v56  ;;  %v5379_v11 = vsel %vm377_vm5, 1.0, %v9960_v38 }
 0x190   : > { %v2038_v43 = vadd.f32 %v2037_v18, %v1881_v15  ;;  %5746 = vset.pattern.permute.xlu2 %v9993_v25  ;;  %v7376_v5 = vpop.permute.xlu1 %644  ;;  %v10109_v15 = vand.u32 4294901760, %v7218_v61  ;;  %v7386_v21 = vpop.permute.xlu2 %788  ;;  %3292 = vmatpush.msra.mxu2 %v10110_v59  ;;  %v7415_v18 = vand.u32 4294901760, %v1358_v42  ;;  %v9810_v10 = vand.u32 4294901760, %v7379_v1 }
 0x191   : > { %2247 = vmatmul.f32.gmra.mxu2 %v2246_v14  ;;  %2425 = vmatmul.f32.gmra.mxu3 %v7296_v2  ;;  %vm689_vm6 = vcmp.eq.s32.totalorder %v6305_v48, %v7376_v5  ;;  %vm833_vm7 = vcmp.eq.s32.totalorder %v6305_v48, %v7386_v21 }
 0x192   : > { %2514 = vmatmul.f32.gmra.mxu0 %v7175_v33  ;;  %2628 = vmatmul.f32.gmra.mxu1 %v10109_v15  ;;  %v7389_v54 = vadd.f32 %v7303_v13, %v2038_v43  ;;  %v2253_v33 = vsub.f32 %v7320_v46, %v9811_v17  ;;  %v5435_v32 = vsel %vm689_vm6, 1.0, %v9960_v38  ;;  %v5411_v13 = vsel %vm521_vm4, 1.0, %v9960_v38  ;;  %10113 = vst [vmem:[#allocation54_spill] sm:$0xff] %v7415_v18 }
 0x193   : > { %982 = vperm.xlu2 %5746, %v6918_v20   ;;  %v10111_v20 = vld [vmem:[#allocation12_spill] sm:$0xff]  ;;  %v5467_v14 = vsel %vm833_vm7, 1.0, %v9960_v38  ;;  %3672 = vmatpush.msra.mxu1 %v6030_v28  ;;  %v617_v44 = vadd.f32 %v5411_v13, %v5379_v11 }
 0x194   : > { %v1775_v56 = vpop.f32.mrf.mxu2  ;;  %v1898_v31 = vpop.f32.mrf.mxu3  ;;  %3551 = vmatpush.msra.mxu0 %v10111_v20  ;;  %3295 = vmatpush.msra.mxu2 %v10112_v60  ;;  %v929_v43 = vadd.f32 %v5467_v14, %v5435_v32  ;;  %v2254_v20 = vand.u32 4294901760, %v2253_v33  ;;  %v10116_v60 = vld [vmem:[#allocation18_spill] sm:$0xff]  ;;  %v7427_v32 = vsub.f32 %v1358_v42, %v7415_v18  ;;  %v10117_v33 = vand.u32 4294901760, %v7265_v36 }
 0x195   : > { %v1776_v19 = vadd.f32 %v1775_v56, %v1659_v30  ;;  %3418 = vmatpush.msra.mxu3 %v6063_v39  ;;  %3674 = vmatpush.msra.mxu1 %v6048_v34  ;;  %v10115_v56 = vld [vmem:[#allocation110_spill] sm:$0xff]  ;;  %v2261_v34 = vsub.f32 %v7379_v1, %v9810_v10  ;;  %v1361_v11 = vsel %vm1338_vm12, %v617_v44, 0  ;;  %v1663_v42 = vadd.f32 %v7079_v41, %v7107_v29  ;;  %v10118_v29 = vld [vmem:[#allocation17_spill] sm:$0xff] }
 0x196   : > { %3555 = vmatpush.msra.mxu0 %v10114_v9  ;;  %3298 = vmatpush.msra.mxu2 %v10116_v60  ;;  %v7455_v44 = vand.u32 4294901760, %v1361_v11  ;;  %v2268_v10 = vand.u32 4294901760, %v7427_v32 }
 0x197   : > { %v2041_v15 = vpop.f32.mrf.mxu0  ;;  %v2142_v59 = vpop.f32.mrf.mxu1  ;;  %v1893_v30 = vadd.f32 %v7347_v7, %v1776_v19  ;;  %5752 = vset.pattern.permute.xlu1 %v10007_v37  ;;  %3420 = vmatpush.msra.mxu3 %v6082_v45  ;;  %v2262_v60 = vand.u32 4294901760, %v2261_v34  ;;  %v10124_v34 = vand.u32 4294901760, %v7320_v46 }
 0x198   : > { %v2042_v28 = vadd.f32 %v2041_v15, %v1887_v53  ;;  %668 = vperm.xlu1 %5752, %v10115_v56   ;;  %v7435_v7 = vpop.permute.xlu1 %964  ;;  %v7437_v53 = vpop.permute.xlu2 %1140  ;;  %3559 = vmatpush.msra.mxu0 %v10118_v29  ;;  %10119 = vst [vmem:[#allocation56_spill] sm:$0xff] %v7455_v44  ;;  %v10120_v15 = vld [vmem:[#allocation20_spill] sm:$0xff] }
 0x199   : > { %2255 = vmatmul.f32.gmra.mxu2 %v2254_v20  ;;  %2429 = vmatmul.f32.gmra.mxu3 %v7359_v4  ;;  %vm1009_vm8 = vcmp.eq.s32.totalorder %v6305_v48, %v7435_v7  ;;  %vm1185_vm9 = vcmp.eq.s32.totalorder %v6305_v48, %v7437_v53 }
 0x19a   : > { %2519 = vmatmul.f32.gmra.mxu0 %v7218_v61  ;;  %2634 = vmatmul.f32.gmra.mxu1 %v10117_v33  ;;  %v7439_v13 = vadd.f32 %v2138_v8, %v2042_v28  ;;  %v5499_v14 = vsel %vm1009_vm8, 1.0, %v9960_v38  ;;  %v5531_v8 = vsel %vm1185_vm9, 1.0, %v9960_v38 }
 0x19b   : > { %5748 = vset.pattern.permute.xlu2 %v10007_v37  ;;  %v1105_v41 = vadd.f32 %v5499_v14, %v929_v43  ;;  %3676 = vmatpush.msra.mxu1 %v6063_v39  ;;  %v7465_v39 = vpop.permute.xlu0 %1152 }
 0x19c   : > { %v1780_v61 = vpop.f32.mrf.mxu2  ;;  %v1904_v19 = vpop.f32.mrf.mxu3  ;;  %665 = vperm.xlu2 %5748, %v6951_v55   ;;  %3301 = vmatpush.msra.mxu2 %v10120_v15  ;;  %v10128_v15 = vld [vmem:[#allocation29_spill] sm:$0xff]  ;;  %vm1193_vm9 = vcmp.eq.s32.totalorder %v6305_v48, %v7465_v39 }
 0x19d   : > { %v1781_v9 = vadd.f32 %v1780_v61, %v1663_v42  ;;  %3422 = vmatpush.msra.mxu3 %v6101_v51  ;;  %v7460_v17 = vadd.f32 %v5531_v8, %v1105_v41  ;;  %v10122_v42 = vld [vmem:[#allocation19_spill] sm:$0xff]  ;;  %3678 = vmatpush.msra.mxu1 %v6082_v45  ;;  %v10123_v61 = vld [vmem:[#allocation24_spill] sm:$0xff]  ;;  %v1667_v8 = vadd.f32 %v7115_v47, %v7160_v12 }
 0x19e   : > { %3563 = vmatpush.msra.mxu0 %v10122_v42  ;;  %3304 = vmatpush.msra.mxu2 %v10123_v61  ;;  %v10125_v45 = vld [vmem:[#allocation59_spill] sm:$0xff] }
 0x19f   : > { %v2045_v20 = vpop.f32.mrf.mxu0  ;;  %v2146_v28 = vpop.f32.mrf.mxu1  ;;  %v1899_v33 = vadd.f32 %v1898_v31, %v1781_v9  ;;  %10121 = vst [vmem:[#allocation68_spill] sm:$0xff] %v7460_v17  ;;  %v7470_v31 = vsub.f32 %v1361_v11, %v7455_v44  ;;  %v2269_v9 = vsub.f32 %v7427_v32, %v2268_v10  ;;  %3424 = vmatpush.msra.mxu3 %v6119_v57 }
 0x1a0   : > { %v2046_v43 = vadd.f32 %v2045_v20, %v1893_v30  ;;  %5755 = vset.pattern.permute.xlu1 %v10002_v0  ;;  %v1364_v30 = vsel %vm1338_vm12, %v10125_v45, 0  ;;  %v7489_v29 = vpop.permute.xlu1 %791  ;;  %3680 = vmatpush.msra.mxu1 %v6101_v51  ;;  %v7501_v61 = vpop.permute.xlu2 %967  ;;  %v10130_v45 = vld [vmem:[#allocation31_spill] sm:$0xff] }
 0x1a1   : > { %2263 = vmatmul.f32.gmra.mxu2 %v2262_v60  ;;  %2433 = vmatmul.f32.gmra.mxu3 %v7415_v18  ;;  %v7492_v12 = vand.u32 4294901760, %v1364_v30  ;;  %v2276_v47 = vand.u32 4294901760, %v7470_v31  ;;  %vm835_vm10 = vcmp.eq.s32.totalorder %v6305_v48, %v7489_v29  ;;  %v2270_v42 = vand.u32 4294901760, %v2269_v9 }
 0x1a2   : > { %2524 = vmatmul.f32.gmra.mxu0 %v7265_v36  ;;  %2640 = vmatmul.f32.gmra.mxu1 %v10124_v34  ;;  %v7475_v14 = vadd.f32 %v2142_v59, %v2046_v43  ;;  %v10126_v59 = vld [vmem:[#allocation23_spill] sm:$0xff]  ;;  %vm1011_vm11 = vcmp.eq.s32.totalorder %v6305_v48, %v7501_v61  ;;  %v10132_v9 = vand.u32 4294901760, %v7379_v1 }
 0x1a3   : > { %1164 = vperm.xlu1 %5755, %v10115_v56   ;;  %3567 = vmatpush.msra.mxu0 %v10126_v59  ;;  %10127 = vst [vmem:[#allocation5_spill] sm:$0xff] %v7492_v12  ;;  %v7503_v34 = vpop.permute.xlu0 %647  ;;  %v1671_v59 = vadd.f32 %v7162_v22, %v7204_v6  ;;  %v10135_v6 = vld [vmem:[#allocation36_spill] sm:$0xff] }
 0x1a4   : > { %v1785_v36 = vpop.f32.mrf.mxu2  ;;  %v1910_v11 = vpop.f32.mrf.mxu3  ;;  %5751 = vset.pattern.permute.xlu2 %v10002_v0  ;;  %3307 = vmatpush.msra.mxu2 %v10128_v15  ;;  %vm691_vm13 = vcmp.eq.s32.totalorder %v6305_v48, %v7503_v34  ;;  %v10134_v15 = vld [vmem:[#allocation33_spill] sm:$0xff] }
 0x1a5   : > { %v1786_v41 = vadd.f32 %v1785_v36, %v1667_v8  ;;  %1161 = vperm.xlu2 %5751, %v6951_v55   ;;  %3426 = vmatpush.msra.mxu3 %v10058_v50  ;;  %v10129_v55 = vld [vmem:[#allocation27_spill] sm:$0xff]  ;;  %v7517_v8 = vsub.f32 %v1364_v30, %v7492_v12  ;;  %v2277_v36 = vsub.f32 %v7470_v31, %v2276_v47  ;;  %v5501_v30 = vsel %vm1011_vm11, 1.0, %v9960_v38 }
 0x1a6   : > { %3571 = vmatpush.msra.mxu0 %v10129_v55  ;;  %3682 = vmatpush.msra.mxu1 %v6119_v57  ;;  %v10131_v57 = vld [vmem:[#allocation58_spill] sm:$0xff] }
 0x1a7   : > { %v2049_v20 = vpop.f32.mrf.mxu0  ;;  %v2150_v60 = vpop.f32.mrf.mxu1  ;;  %v1905_v43 = vadd.f32 %v1904_v19, %v1786_v41  ;;  %3310 = vmatpush.msra.mxu2 %v10130_v45  ;;  %3428 = vmatpush.msra.mxu3 %v10060_v27  ;;  %v5469_v19 = vsel %vm835_vm10, 1.0, %v9960_v38  ;;  %v5437_v41 = vsel %vm691_vm13, 1.0, %v9960_v38 }
 0x1a8   : > { %v2050_v51 = vadd.f32 %v2049_v20, %v1899_v33  ;;  %v1367_v33 = vsel %vm1338_vm12, %v10131_v57, 0  ;;  %3575 = vmatpush.msra.mxu0 %v10134_v15  ;;  %v931_v55 = vadd.f32 %v5469_v19, %v5437_v41  ;;  %3684 = vmatpush.msra.mxu1 %v10058_v50  ;;  %v2278_v50 = vand.u32 4294901760, %v2277_v36  ;;  %v10137_v41 = vld [vmem:[#allocation35_spill] sm:$0xff] }
 0x1a9   : > { %2271 = vmatmul.f32.gmra.mxu2 %v2270_v42  ;;  %2437 = vmatmul.f32.gmra.mxu3 %v7455_v44  ;;  %v7539_v22 = vand.u32 4294901760, %v1367_v33 }
 0x1aa   : > { %2529 = vmatmul.f32.gmra.mxu0 %v7320_v46  ;;  %2646 = vmatmul.f32.gmra.mxu1 %v10132_v9  ;;  %v7532_v46 = vadd.f32 %v2146_v28, %v2050_v51  ;;  %v7543_v28 = vpop.permute.xlu1 %1143  ;;  %v1107_v51 = vadd.f32 %v5501_v30, %v931_v55 }
 0x1ab   : > { %5757 = vset.pattern.permute.xlu1 %v10001_v49  ;;  %3313 = vmatpush.msra.mxu2 %v10135_v6  ;;  %10136 = vst [vmem:[#allocation47_spill] sm:$0xff] %v7539_v22  ;;  %vm1187_vm15 = vcmp.eq.s32.totalorder %v6305_v48, %v7543_v28  ;;  %v1675_v6 = vadd.f32 %v7206_v26, %v7251_v35  ;;  %v7591_v35 = vld [vmem:[%s5958_s28 + $0x68] sm:$0xff] }
 0x1ac   : > { %10133 = vst [vmem:[#allocation57_spill] sm:$0xff] %v7532_v46  ;;  %v1790_v20 = vpop.f32.mrf.mxu2  ;;  %v1916_v42 = vpop.f32.mrf.mxu3  ;;  %815 = vperm.xlu1 %5757, %v7121_v16   ;;  %3430 = vmatpush.msra.mxu3 %v10069_v23  ;;  %v5533_v30 = vsel %vm1187_vm15, 1.0, %v9960_v38 }
 0x1ad   : > { %v1791_v45 = vadd.f32 %v1790_v20, %v1671_v59  ;;  %5753 = vset.pattern.permute.xlu2 %v10001_v49  ;;  %v9812_v59 = vand.u32 4294901760, %v7517_v8  ;;  %3579 = vmatpush.msra.mxu0 %v10137_v41  ;;  %v10138_v20 = vld [vmem:[#allocation39_spill] sm:$0xff]  ;;  %v7564_v36 = vadd.f32 %v5533_v30, %v1107_v51 }
 0x1ae   : > { %812 = vperm.xlu2 %5753, %v10115_v56   ;;  %3686 = vmatpush.msra.mxu1 %v10060_v27  ;;  %v7555_v56 = vpop.permute.xlu2 %650  ;;  %v7567_v27 = vsub.f32 %v1367_v33, %v7539_v22 }
 0x1af   : > { %v2053_v19 = vpop.f32.mrf.mxu0  ;;  %v7547_v57 = vpop.f32.mrf.mxu1  ;;  %v1911_v9 = vadd.f32 %v1910_v11, %v1791_v45  ;;  %3316 = vmatpush.msra.mxu2 %v10138_v20  ;;  %3432 = vmatpush.msra.mxu3 %v10072_v63  ;;  %v5471_v11 = vsel %vm837_vm14, 1.0, %v9960_v38  ;;  %10139 = vst [vmem:[#allocation7_spill] sm:$0xff] %v7564_v36  ;;  %vm693_vm0 = vcmp.eq.s32.totalorder %v6305_v48, %v7555_v56 }
 0x1b0   : > { %v2054_v15 = vadd.f32 %v2053_v19, %v1905_v43  ;;  %v10140_v43 = vld [vmem:[#allocation60_spill] sm:$0xff]  ;;  %v2285_v33 = vsub.f32 %v7517_v8, %v9812_v59  ;;  %v5439_v51 = vsel %vm693_vm0, 1.0, %v9960_v38  ;;  %v10142_v19 = vld [vmem:[#allocation38_spill] sm:$0xff]  ;;  %3688 = vmatpush.msra.mxu1 %v10069_v23  ;;  %v10145_v23 = vld [vmem:[#allocation43_spill] sm:$0xff] }
 0x1b1   : > { %2279 = vmatmul.f32.gmra.mxu2 %v2278_v50  ;;  %2441 = vmatmul.f32.gmra.mxu3 %v7492_v12  ;;  %v1370_v55 = vsel %vm1338_vm12, %v10140_v43, 0  ;;  %v933_v50 = vadd.f32 %v5471_v11, %v5439_v51 }
 0x1b2   : > { %2534 = vmatmul.f32.gmra.mxu0 %v7379_v1  ;;  %2652 = vmatmul.f32.gmra.mxu1 %v2268_v10  ;;  %v7576_v45 = vadd.f32 %v2150_v60, %v2054_v15  ;;  %v10143_v60 = vld [vmem:[#allocation44_spill] sm:$0xff]  ;;  %v7588_v41 = vand.u32 4294901760, %v1370_v55  ;;  %v9813_v15 = vand.u32 4294901760, %v7567_v27  ;;  %v2286_v11 = vand.u32 4294901760, %v2285_v33  ;;  %v7600_v51 = vpop.permute.xlu1 %970  ;;  %v10149_v33 = vld [vmem:[#allocation101_spill] sm:$0xff] }
 0x1b3   : > { %3583 = vmatpush.msra.mxu0 %v10142_v19  ;;  %3319 = vmatpush.msra.mxu2 %v10143_v60  ;;  %v10147_v60 = vld [vmem:[#allocation49_spill] sm:$0xff]  ;;  %vm1013_vm1 = vcmp.eq.s32.totalorder %v6305_v48, %v7600_v51 }
 0x1b4   : > { %10141 = vst [vmem:[#allocation74_spill] sm:$0xff] %v7576_v45  ;;  %v1795_v1 = vpop.f32.mrf.mxu2  ;;  %v1922_v10 = vpop.f32.mrf.mxu3  ;;  %5760 = vset.pattern.permute.xlu1 %v10007_v37  ;;  %3434 = vmatpush.msra.mxu3 %v10077_v24  ;;  %v7607_v59 = vsub.f32 %v1370_v55, %v7588_v41  ;;  %v5503_v55 = vsel %vm1013_vm1, 1.0, %v9960_v38 }
 0x1b5   : > { %10144 = vst [vmem:[#allocation77_spill] sm:$0xff] %v7588_v41  ;;  %v1796_v26 = vadd.f32 %v1795_v1, %v1675_v6  ;;  %674 = vperm.xlu1 %5760, %v7591_v35   ;;  %3587 = vmatpush.msra.mxu0 %v10145_v23  ;;  %v10146_v1 = vld [vmem:[#allocation45_spill] sm:$0xff] }
 0x1b6   : > { %5756 = vset.pattern.permute.xlu2 %v10007_v37  ;;  %3690 = vmatpush.msra.mxu1 %v10072_v63  ;;  %v7602_v19 = vpop.permute.xlu2 %1146 }
 0x1b7   : > { %v2057_v30 = vpop.f32.mrf.mxu0  ;;  %v2158_v20 = vpop.f32.mrf.mxu1  ;;  %v1917_v43 = vadd.f32 %v1916_v42, %v1796_v26  ;;  %671 = vperm.xlu2 %5756, %v7121_v16   ;;  %3436 = vmatpush.msra.mxu3 %v10146_v1  ;;  %v10148_v42 = vld [vmem:[#allocation62_spill] sm:$0xff]  ;;  %vm1189_vm2 = vcmp.eq.s32.totalorder %v6305_v48, %v7602_v19 }
 0x1b8   : > { %v2058_v6 = vadd.f32 %v2057_v30, %v1911_v9  ;;  %3322 = vmatpush.msra.mxu2 %v10147_v60  ;;  %v1373_v63 = vsel %vm1338_vm12, %v10148_v42, 0  ;;  %v2293_v9 = vsub.f32 %v7567_v27, %v9813_v15  ;;  %v10150_v26 = vld [vmem:[#allocation98_spill] sm:$0xff]  ;;  %v1109_v30 = vadd.f32 %v5503_v55, %v933_v50  ;;  %3692 = vmatpush.msra.mxu1 %v10077_v24  ;;  %v10153_v15 = vld [vmem:[#allocation51_spill] sm:$0xff]  ;;  %v10155_v50 = vld [vmem:[#allocation52_spill] sm:$0xff] }
 0x1b9   : > { %2287 = vmatmul.f32.gmra.mxu2 %v2286_v11  ;;  %2445 = vmatmul.f32.gmra.mxu3 %v7539_v22  ;;  %v1679_v23 = vadd.f32 %v10150_v26, %v10149_v33  ;;  %v5535_v11 = vsel %vm1189_vm2, 1.0, %v9960_v38  ;;  %v7637_v55 = vand.u32 4294901760, %v1373_v63 }
 0x1ba   : > { %2539 = vmatmul.f32.gmra.mxu0 %v7427_v32  ;;  %2658 = vmatmul.f32.gmra.mxu1 %v2276_v47  ;;  %v7627_v32 = vadd.f32 %v7547_v57, %v2058_v6  ;;  %v10152_v47 = vld [vmem:[#allocation48_spill] sm:$0xff]  ;;  %v7634_v33 = vadd.f32 %v5535_v11, %v1109_v30  ;;  %v9814_v57 = vand.u32 4294901760, %v7607_v59  ;;  %v2294_v24 = vand.u32 4294901760, %v2293_v9  ;;  %v10158_v11 = vld [vmem:[#allocation42_spill] sm:$0xff] }
 0x1bb   : > { %3438 = vmatpush.msra.mxu3 %v10090_v52  ;;  %3591 = vmatpush.msra.mxu0 %v10152_v47  ;;  %10156 = vst [vmem:[#allocation9_spill] sm:$0xff] %v7637_v55  ;;  %vm1015_vm3 = vcmp.eq.s32.totalorder %v6305_v48, %v10158_v11 }
 0x1bc   : > { %10151 = vst [vmem:[#allocation70_spill] sm:$0xff] %v7627_v32  ;;  %v1800_v60 = vpop.f32.mrf.mxu2  ;;  %v1928_v42 = vpop.f32.mrf.mxu3  ;;  %3325 = vmatpush.msra.mxu2 %v10153_v15  ;;  %3694 = vmatpush.msra.mxu1 %v10146_v1  ;;  %v10157_v15 = vld [vmem:[#allocation53_spill] sm:$0xff]  ;;  %v10160_v1 = vld [vmem:[#allocation63_spill] sm:$0xff] }
 0x1bd   : > { %v1801_v36 = vadd.f32 %v1800_v60, %v1679_v23  ;;  %5762 = vset.pattern.permute.xlu1 %v9993_v25  ;;  %10154 = vst [vmem:[#allocation6_spill] sm:$0xff] %v7634_v33  ;;  %3595 = vmatpush.msra.mxu0 %v10155_v50  ;;  %v7644_v30 = vpop.permute.xlu1 %653  ;;  %v1376_v9 = vsel %vm1338_vm12, %v10160_v1, 0  ;;  %v10161_v60 = vld [vmem:[#allocation106_spill] sm:$0xff] }
 0x1be   : > { %994 = vperm.xlu1 %5762, %v7591_v35   ;;  %3696 = vmatpush.msra.mxu1 %v10090_v52  ;;  %vm695_vm4 = vcmp.eq.s32.totalorder %v6305_v48, %v7644_v30  ;;  %v2301_v52 = vsub.f32 %v7607_v59, %v9814_v57  ;;  %v10162_v50 = vld [vmem:[#allocation102_spill] sm:$0xff]  ;;  %v7675_v17 = vand.u32 4294901760, %v1376_v9 }
 0x1bf   : > { %v2061_v6 = vpop.f32.mrf.mxu0  ;;  %v2162_v26 = vpop.f32.mrf.mxu1  ;;  %v1923_v47 = vadd.f32 %v1922_v10, %v1801_v36  ;;  %5758 = vset.pattern.permute.xlu2 %v9993_v25  ;;  %3599 = vmatpush.msra.mxu0 %v10157_v15  ;;  %v7656_v10 = vsub.f32 %v1373_v63, %v7637_v55 }
 0x1c0   : > { %v2062_v23 = vadd.f32 %v2061_v6, %v1917_v43  ;;  %991 = vperm.xlu2 %5758, %v7121_v16   ;;  %v7653_v36 = vpop.permute.xlu2 %797  ;;  %v10159_v16 = vand.u32 4294901760, %v7517_v8  ;;  %v5441_v43 = vsel %vm695_vm4, 1.0, %v9960_v38  ;;  %v1683_v6 = vadd.f32 %v10162_v50, %v10161_v60  ;;  %10164 = vst [vmem:[#allocation11_spill] sm:$0xff] %v7675_v17 }
 0x1c1   : > { %2295 = vmatmul.f32.gmra.mxu2 %v2294_v24  ;;  %2449 = vmatmul.f32.gmra.mxu3 %v7588_v41  ;;  %vm839_vm5 = vcmp.eq.s32.totalorder %v6305_v48, %v7653_v36  ;;  %v2302_v60 = vand.u32 4294901760, %v2301_v52  ;;  %v9821_v41 = vand.u32 4294901760, %v7656_v10 }
 0x1c2   : > { %2544 = vmatmul.f32.gmra.mxu0 %v7470_v31  ;;  %2664 = vmatmul.f32.gmra.mxu1 %v10159_v16  ;;  %v7671_v63 = vadd.f32 %v2158_v20, %v2062_v23  ;;  %v5505_v31 = vsel %vm1015_vm3, 1.0, %v9960_v38  ;;  %v5473_v16 = vsel %vm839_vm5, 1.0, %v9960_v38  ;;  %v10165_v20 = vld [vmem:[#allocation61_spill] sm:$0xff] }
 0x1c3   : > { %v935_v33 = vadd.f32 %v5473_v16, %v5441_v43 }
 0x1c4   : > { %10163 = vst [vmem:[#allocation8_spill] sm:$0xff] %v7671_v63  ;;  %v1805_v24 = vpop.f32.mrf.mxu2  ;;  %v1934_v15 = vpop.f32.mrf.mxu3 }
 0x1c5   : > { %v1806_v57 = vadd.f32 %v1805_v24, %v1683_v6  ;;  %v1111_v23 = vadd.f32 %v5505_v31, %v935_v33  ;;  %v7687_v24 = vsub.f32 %v1376_v9, %v7675_v17  ;;  %v10167_v33 = vld [vmem:[#allocation113_spill] sm:$0xff]  ;;  %v10169_v9 = vld [vmem:[#allocation66_spill] sm:$0xff] }
 0x1c6   : > { %5765 = vset.pattern.permute.xlu1 %v10001_v49  ;;  %v7682_v43 = vpop.permute.xlu1 %1149 }
 0x1c7   : > { %v2065_v1 = vpop.f32.mrf.mxu0  ;;  %v2166_v3 = vpop.f32.mrf.mxu1  ;;  %v1929_v50 = vadd.f32 %v1928_v42, %v1806_v57  ;;  %821 = vperm.xlu1 %5765, %v10165_v20   ;;  %v10166_v42 = vand.u32 4294901760, %v7567_v27  ;;  %vm1191_vm6 = vcmp.eq.s32.totalorder %v6305_v48, %v7682_v43 }
 0x1c8   : > { %v2066_v22 = vadd.f32 %v2065_v1, %v1923_v47  ;;  %5761 = vset.pattern.permute.xlu2 %v10001_v49  ;;  %v7684_v6 = vpop.permute.xlu2 %656  ;;  %v10168_v49 = vld [vmem:[#allocation108_spill] sm:$0xff]  ;;  %v2309_v47 = vsub.f32 %v7656_v10, %v9821_v41  ;;  %v5537_v52 = vsel %vm1191_vm6, 1.0, %v9960_v38 }
 0x1c9   : > { %2303 = vmatmul.f32.gmra.mxu2 %v2302_v60  ;;  %2453 = vmatmul.f32.gmra.mxu3 %v7637_v55  ;;  %v1687_v57 = vadd.f32 %v10168_v49, %v10167_v33  ;;  %v7703_v1 = vadd.f32 %v5537_v52, %v1111_v23  ;;  %v9824_v33 = vand.u32 4294901760, %v7687_v24  ;;  %vm697_vm7 = vcmp.eq.s32.totalorder %v6305_v48, %v7684_v6 }
 0x1ca   : > { %2549 = vmatmul.f32.gmra.mxu0 %v7517_v8  ;;  %2670 = vmatmul.f32.gmra.mxu1 %v10166_v42  ;;  %v1379_v8 = vsel %vm1338_vm12, %v10169_v9, 0  ;;  %v7705_v60 = vadd.f32 %v2162_v26, %v2066_v22  ;;  %v2310_v63 = vand.u32 4294901760, %v2309_v47  ;;  %v10173_v26 = vld [vmem:[#allocation64_spill] sm:$0xff]  ;;  %v5443_v52 = vsel %vm697_vm7, 1.0, %v9960_v38  ;;  %v10176_v9 = vld [vmem:[#allocation114_spill] sm:$0xff] }
 0x1cb   : > { %818 = vperm.xlu2 %5761, %v7591_v35   ;;  %10170 = vst [vmem:[#allocation10_spill] sm:$0xff] %v7703_v1  ;;  %v7708_v49 = vand.u32 4294901760, %v1379_v8  ;;  %v2317_v47 = vsub.f32 %v7687_v24, %v9824_v33 }
 0x1cc   : > { %v1810_v31 = vpop.f32.mrf.mxu2  ;;  %v1940_v16 = vpop.f32.mrf.mxu3  ;;  %10171 = vst [vmem:[#allocation81_spill] sm:$0xff] %v7705_v60 }
 0x1cd   : > { %v1811_v42 = vadd.f32 %v1810_v31, %v1687_v57  ;;  %10172 = vst [vmem:[#allocation79_spill] sm:$0xff] %v7708_v49  ;;  %v1382_v57 = vsel %vm1338_vm12, %v10173_v26, 0  ;;  %v2318_v32 = vand.u32 4294901760, %v2317_v47 }
 0x1cf   : > { %v2069_v55 = vpop.f32.mrf.mxu0  ;;  %v2170_v41 = vpop.f32.mrf.mxu1  ;;  %v1935_v12 = vadd.f32 %v1934_v15, %v1811_v42  ;;  %5767 = vset.pattern.permute.xlu1 %v10002_v0  ;;  %v10174_v15 = vand.u32 4294901760, %v7607_v59 }
 0x1d0   : > { %1173 = vperm.xlu1 %5767, %v10165_v20   ;;  %v2070_v23 = vadd.f32 %v2069_v55, %v1929_v50  ;;  %v7715_v22 = vpop.permute.xlu2 %976  ;;  %v7726_v55 = vpop.permute.xlu1 %800  ;;  %v10175_v50 = vld [vmem:[#allocation120_spill] sm:$0xff] }
 0x1d1   : > { %2311 = vmatmul.f32.gmra.mxu2 %v2310_v63  ;;  %2457 = vmatmul.f32.gmra.mxu3 %v7675_v17  ;;  %vm1017_vm8 = vcmp.eq.s32.totalorder %v6305_v48, %v7715_v22  ;;  %v7731_v63 = vsub.f32 %v1379_v8, %v7708_v49  ;;  %vm841_vm10 = vcmp.eq.s32.totalorder %v6305_v48, %v7726_v55 }
 0x1d2   : > { %2554 = vmatmul.f32.gmra.mxu0 %v7567_v27  ;;  %2676 = vmatmul.f32.gmra.mxu1 %v10174_v15  ;;  %v1691_v27 = vadd.f32 %v10176_v9, %v10175_v50  ;;  %v5475_v26 = vsel %vm841_vm10, 1.0, %v9960_v38  ;;  %v5507_v8 = vsel %vm1017_vm8, 1.0, %v9960_v38  ;;  %v7743_v1 = vadd.f32 %v2166_v3, %v2070_v23 }
 0x1d3   : > { %5763 = vset.pattern.permute.xlu2 %v10002_v0  ;;  %v937_v33 = vadd.f32 %v5475_v26, %v5443_v52  ;;  %v7745_v50 = vand.u32 4294901760, %v1382_v57  ;;  %v5539_v9 = vsel %vm1193_vm9, 1.0, %v9960_v38  ;;  %v2324_v45 = vand.u32 4294901760, %v7731_v63 }
 0x1d4   : > { %v1815_v31 = vpop.f32.mrf.mxu2  ;;  %v1946_v42 = vpop.f32.mrf.mxu3  ;;  %1170 = vperm.xlu2 %5763, %v7591_v35   ;;  %10177 = vst [vmem:[#allocation13_spill] sm:$0xff] %v7743_v1  ;;  %v10180_v23 = vand.u32 4294901760, %v7656_v10 }
 0x1d5   : > { %v1816_v15 = vadd.f32 %v1815_v31, %v1691_v27  ;;  %10178 = vst [vmem:[#allocation12_spill] sm:$0xff] %v7745_v50  ;;  %v1113_v18 = vadd.f32 %v5507_v8, %v937_v33  ;;  %v7754_v3 = vsub.f32 %v1382_v57, %v7745_v50 }
 0x1d7   : > { %v2073_v17 = vpop.f32.mrf.mxu0  ;;  %v2174_v60 = vpop.f32.mrf.mxu1  ;;  %v1941_v44 = vadd.f32 %v1940_v16, %v1816_v15  ;;  %v7751_v35 = vadd.f32 %v5539_v9, %v1113_v18  ;;  %v10184_v18 = vld [vmem:[#allocation73_spill] sm:$0xff]  ;;  %v9831_v31 = vand.u32 4294901760, %v7754_v3 }
 0x1d8   : > { %v2074_v46 = vadd.f32 %v2073_v17, %v1935_v12  ;;  %5770 = vset.pattern.permute.xlu1 %v9993_v25  ;;  %v7759_v16 = vpop.permute.xlu2 %803  ;;  %v10182_v17 = vld [vmem:[#allocation122_spill] sm:$0xff]  ;;  %v10183_v12 = vld [vmem:[#allocation121_spill] sm:$0xff] }
 0x1d9   : > { %2319 = vmatmul.f32.gmra.mxu2 %v2318_v32  ;;  %2461 = vmatmul.f32.gmra.mxu3 %v7708_v49  ;;  %10179 = vst [vmem:[#allocation14_spill] sm:$0xff] %v7751_v35  ;;  %v1695_v33 = vadd.f32 %v10183_v12, %v10182_v17  ;;  %v2325_v32 = vsub.f32 %v7731_v63, %v2324_v45 }
 0x1da   : > { %2559 = vmatmul.f32.gmra.mxu0 %v7607_v59  ;;  %2682 = vmatmul.f32.gmra.mxu1 %v10180_v23  ;;  %v7761_v47 = vadd.f32 %v2170_v41, %v2074_v46  ;;  %vm843_vm11 = vcmp.eq.s32.totalorder %v6305_v48, %v7759_v16  ;;  %v1385_v59 = vsel %vm1338_vm12, %v10184_v18, 0 }
 0x1db   : > { %1000 = vperm.xlu1 %5770, %v7286_v58   ;;  %v5477_v41 = vsel %vm843_vm11, 1.0, %v9960_v38  ;;  %v7779_v26 = vand.u32 4294901760, %v1385_v59  ;;  %v2326_v9 = vand.u32 4294901760, %v2325_v32  ;;  %v10189_v32 = vld [vmem:[#allocation123_spill] sm:$0xff] }
 0x1dc   : > { %10181 = vst [vmem:[#allocation15_spill] sm:$0xff] %v7761_v47  ;;  %v1820_v57 = vpop.f32.mrf.mxu2  ;;  %v1952_v52 = vpop.f32.mrf.mxu3  ;;  %5766 = vset.pattern.permute.xlu2 %v9993_v25  ;;  %v10221_v47 = vld [vmem:[#allocation41_spill] sm:$0xff] }
 0x1dd   : > { %v1821_v27 = vadd.f32 %v1820_v57, %v1695_v33  ;;  %v7772_v46 = vpop.permute.xlu1 %659  ;;  %997 = vperm.xlu2 %5766, %v10165_v20   ;;  %10185 = vst [vmem:[#allocation110_spill] sm:$0xff] %v7779_v26  ;;  %v10186_v20 = vand.u32 4294901760, %v7687_v24  ;;  %v7791_v57 = vsub.f32 %v1385_v59, %v7779_v26 }
 0x1de   : > { %vm699_vm13 = vcmp.eq.s32.totalorder %v6305_v48, %v7772_v46 }
 0x1df   : > { %v2077_v8 = vpop.f32.mrf.mxu0  ;;  %v2178_v15 = vpop.f32.mrf.mxu1  ;;  %v1947_v23 = vadd.f32 %v1946_v42, %v1821_v27  ;;  %v5445_v25 = vsel %vm699_vm13, 1.0, %v9960_v38  ;;  %v10188_v42 = vld [vmem:[#allocation16_spill] sm:$0xff] }
 0x1e0   : > { %v2078_v17 = vadd.f32 %v2077_v8, %v1941_v44  ;;  %v939_v12 = vadd.f32 %v5477_v41, %v5445_v25  ;;  %v1699_v27 = vadd.f32 %v10189_v32, %v10188_v42  ;;  %v2333_v44 = vsub.f32 %v7754_v3, %v9831_v31 }
 0x1e1   : > { %2327 = vmatmul.f32.gmra.mxu2 %v2326_v9  ;;  %2465 = vmatmul.f32.gmra.mxu3 %v7745_v50  ;;  %v7786_v33 = vpop.permute.xlu2 %1155  ;;  %v10203_v50 = vld [vmem:[#allocation83_spill] sm:$0xff] }
 0x1e2   : > { %2564 = vmatmul.f32.gmra.mxu0 %v7656_v10  ;;  %2688 = vmatmul.f32.gmra.mxu1 %v10186_v20  ;;  %v7788_v18 = vadd.f32 %v2174_v60, %v2078_v17  ;;  %vm1195_vm14 = vcmp.eq.s32.totalorder %v6305_v48, %v7786_v33  ;;  %v2334_v25 = vand.u32 4294901760, %v2333_v44  ;;  %v9832_v20 = vand.u32 4294901760, %v7791_v57  ;;  %v10192_v44 = vld [vmem:[#allocation21_spill] sm:$0xff] }
 0x1e4   : > { %10187 = vst [vmem:[#allocation18_spill] sm:$0xff] %v7788_v18  ;;  %v1825_v41 = vpop.f32.mrf.mxu2  ;;  %v1958_v8 = vpop.f32.mrf.mxu3  ;;  %v10215_v18 = vld [vmem:[#allocation78_spill] sm:$0xff] }
 0x1e5   : > { %v1826_v10 = vadd.f32 %v1825_v41, %v1699_v27  ;;  %5768 = vset.pattern.permute.xlu2 %v10007_v37  ;;  %v5541_v27 = vsel %vm1195_vm14, 1.0, %v9960_v38 }
 0x1e6   : > { %v7801_v60 = vpop.permute.xlu1 %979  ;;  %680 = vperm.xlu2 %5768, %v7286_v58  }
 0x1e7   : > { %v2081_v59 = vpop.f32.mrf.mxu0  ;;  %v2182_v9 = vpop.f32.mrf.mxu1  ;;  %v1953_v17 = vadd.f32 %v1952_v52, %v1826_v10  ;;  %vm1019_vm15 = vcmp.eq.s32.totalorder %v6305_v48, %v7801_v60  ;;  %v10191_v52 = vld [vmem:[#allocation26_spill] sm:$0xff] }
 0x1e8   : > { %v2082_v42 = vadd.f32 %v2081_v59, %v1947_v23  ;;  %v5509_v32 = vsel %vm1019_vm15, 1.0, %v9960_v38  ;;  %v1703_v10 = vadd.f32 %v10192_v44, %v10191_v52  ;;  %v2341_v23 = vsub.f32 %v7791_v57, %v9832_v20 }
 0x1e9   : > { %2335 = vmatmul.f32.gmra.mxu2 %v2334_v25  ;;  %2469 = vmatmul.f32.gmra.mxu3 %v7779_v26  ;;  %v1115_v37 = vadd.f32 %v5509_v32, %v939_v12  ;;  %v10194_v12 = vld [vmem:[#allocation55_spill] sm:$0xff] }
 0x1ea   : > { %2569 = vmatmul.f32.gmra.mxu0 %v7687_v24  ;;  %2694 = vmatmul.f32.gmra.mxu1 %v2324_v45  ;;  %v7811_v41 = vadd.f32 %v2178_v15, %v2082_v42  ;;  %vm686_vm0 = vcmp.eq.s32.totalorder %v10194_v12, %v7262_v62  ;;  %v10195_v45 = vld [vmem:[#allocation37_spill] sm:$0xff]  ;;  %v2342_v42 = vand.u32 4294901760, %v2341_v23  ;;  %v7835_v62 = vpop.permute.xlu0 %662  ;;  %v10199_v23 = vld [vmem:[#allocation76_spill] sm:$0xff]  ;;  %vm688_vm6 = vcmp.eq.s32.totalorder %v10194_v12, %v7376_v5 }
 0x1eb   : > { %v7818_v59 = vadd.f32 %v5541_v27, %v1115_v37  ;;  %vm830_vm1 = vcmp.eq.s32.totalorder %v10194_v12, %v10195_v45  ;;  %v5432_v44 = vsel %vm686_vm0, 1.0, %v9960_v38  ;;  %vm701_vm5 = vcmp.eq.s32.totalorder %v6305_v48, %v7835_v62 }
 0x1ec   : > { %10190 = vst [vmem:[#allocation17_spill] sm:$0xff] %v7811_v41  ;;  %v1830_v31 = vpop.f32.mrf.mxu2  ;;  %v1964_v35 = vpop.f32.mrf.mxu3  ;;  %vm832_vm7 = vcmp.eq.s32.totalorder %v10194_v12, %v7386_v21  ;;  %vm1008_vm10 = vcmp.eq.s32.totalorder %v10194_v12, %v7435_v7  ;;  %vm1184_vm14 = vcmp.eq.s32.totalorder %v10194_v12, %v7437_v53  ;;  %vm834_vm15 = vcmp.eq.s32.totalorder %v10194_v12, %v7489_v29 }
 0x1ed   : > { %10193 = vst [vmem:[#allocation20_spill] sm:$0xff] %v7818_v59  ;;  %v1831_v25 = vadd.f32 %v1830_v31, %v1703_v10  ;;  %v7830_v52 = vpop.permute.xlu2 %982  ;;  %v10196_v31 = vld [vmem:[#allocation22_spill] sm:$0xff]  ;;  %v5464_v10 = vsel %vm830_vm1, 1.0, %v9960_v38  ;;  %v5466_v49 = vsel %vm832_vm7, 1.0, %v9960_v38  ;;  %vm690_vm0 = vcmp.eq.s32.totalorder %v10194_v12, %v7503_v34  ;;  %v10223_v34 = vld [vmem:[#allocation88_spill] sm:$0xff] }
 0x1ee   : > { %5771 = vset.pattern.permute.xlu2 %v10002_v0  ;;  %vm1021_vm4 = vcmp.eq.s32.totalorder %v6305_v48, %v7830_v52  ;;  %v926_v59 = vadd.f32 %v5464_v10, %v5432_v44  ;;  %v10205_v10 = vld [vmem:[#allocation87_spill] sm:$0xff] }
 0x1ef   : > { %v2085_v24 = vpop.f32.mrf.mxu0  ;;  %v7825_v15 = vpop.f32.mrf.mxu1  ;;  %v1959_v32 = vadd.f32 %v1958_v8, %v1831_v25  ;;  %1176 = vperm.xlu2 %5771, %v7286_v58   ;;  %v10197_v58 = vand.u32 4294901760, %v7754_v3  ;;  %v10200_v25 = vld [vmem:[#allocation34_spill] sm:$0xff] }
 0x1f0   : > { %v2086_v27 = vadd.f32 %v2085_v24, %v1953_v17  ;;  %v7828_v37 = vpop.permute.xlu1 %806  ;;  %v10198_v17 = vld [vmem:[#allocation65_spill] sm:$0xff]  ;;  %v1306_v45 = vmul.f32 0.5, %v10200_v25 }
 0x1f1   : > { %2343 = vmatmul.f32.gmra.mxu2 %v2342_v42  ;;  %2844 = vmatmul.f32.vlgmr.msrb.gmra.mxu3 %v10196_v31  ;;  %vm845_vm2 = vcmp.eq.s32.totalorder %v6305_v48, %v7828_v37  ;;  %vm1006_vm3 = vcmp.eq.s32.totalorder %v10194_v12, %v10198_v17  ;;  %v5511_v42 = vsel %vm1021_vm4, 1.0, %v9960_v38  ;;  %v10202_v17 = vld [vmem:[#allocation28_spill] sm:$0xff]  ;;  %vm836_vm4 = vcmp.eq.s32.totalorder %v10194_v12, %v7183_v40 }
 0x1f2   : > { %2574 = vmatmul.f32.gmra.mxu0 %v7731_v63  ;;  %2700 = vmatmul.f32.gmra.mxu1 %v10197_v58  ;;  %v5479_v8 = vsel %vm845_vm2, 1.0, %v9960_v38  ;;  %v5447_v58 = vsel %vm701_vm5, 1.0, %v9960_v38  ;;  %v7853_v20 = vadd.f32 %v2182_v9, %v2086_v27  ;;  %v5496_v41 = vsel %vm1006_vm3, 1.0, %v9960_v38 }
 0x1f3   : > { %3928 = vmatpush.msrb.mxu3 %v10199_v23  ;;  %v941_v26 = vadd.f32 %v5479_v8, %v5447_v58  ;;  %v10204_v23 = vld [vmem:[#allocation75_spill] sm:$0xff]  ;;  %v7867_v8 = vand.u32 4294901760, %v1306_v45  ;;  %v1102_v21 = vadd.f32 %v5496_v41, %v926_v59  ;;  %v7892_v59 = vpop.permute.xlu0 %809  ;;  %vm1010_vm3 = vcmp.eq.s32.totalorder %v10194_v12, %v7501_v61  ;;  %v10228_v61 = vld [vmem:[#allocation96_spill] sm:$0xff] }
 0x1f4   : > { %v1835_v24 = vpop.f32.mrf.mxu2  ;;  %v2410_v63 = vpop.f32.mrf.mxu3  ;;  %10201 = vst [vmem:[#allocation19_spill] sm:$0xff] %v7853_v20  ;;  %vm1182_vm8 = vcmp.eq.s32.totalorder %v10194_v12, %v10204_v23  ;;  %v5434_v20 = vsel %vm688_vm6, 1.0, %v9960_v38  ;;  %v10212_v23 = vld [vmem:[#allocation91_spill] sm:$0xff]  ;;  %vm847_vm13 = vcmp.eq.s32.totalorder %v6305_v48, %v7892_v59  ;;  %vm1186_vm5 = vcmp.eq.s32.totalorder %v10194_v12, %v7543_v28 }
 0x1f5   : > { %v1836_v0 = vadd.f32 %v1835_v24, %v10202_v17  ;;  %3934 = vmatpush.msrb.mxu3 %v10203_v50  ;;  %v1117_v44 = vadd.f32 %v5511_v42, %v941_v26  ;;  %10206 = vst [vmem:[#allocation24_spill] sm:$0xff] %v7867_v8  ;;  %v10207_v50 = vld [vmem:[#allocation32_spill] sm:$0xff]  ;;  %v10209_v26 = vand.u32 4294901760, %v7791_v57  ;;  %v10211_v42 = vld [vmem:[#allocation69_spill] sm:$0xff]  ;;  %vm692_vm6 = vcmp.eq.s32.totalorder %v10194_v12, %v7555_v56  ;;  %v10231_v56 = vld [vmem:[#allocation71_spill] sm:$0xff] }
 0x1f6   : > { %v1308_v24 = vmul.f32 0.5, %v10207_v50  ;;  %v7872_v5 = vpop.permute.xlu2 %665 }
 0x1f7   : > { %v2089_v25 = vpop.f32.mrf.mxu0  ;;  %v7864_v9 = vpop.f32.mrf.mxu1  ;;  %v1965_v27 = vadd.f32 %v1964_v35, %v1836_v0  ;;  %3940 = vmatpush.msrb.mxu3 %v10205_v10  ;;  %v10208_v0 = vld [vmem:[#allocation30_spill] sm:$0xff]  ;;  %v5528_v35 = vsel %vm1182_vm8, 1.0, %v9960_v38  ;;  %vm703_vm11 = vcmp.eq.s32.totalorder %v6305_v48, %v7872_v5  ;;  %vm1012_vm8 = vcmp.eq.s32.totalorder %v10194_v12, %v7600_v51 }
 0x1f8   : > { %v2090_v58 = vadd.f32 %v2089_v25, %v1959_v32  ;;  %v7870_v17 = vpop.permute.xlu1 %1158  ;;  %v928_v25 = vadd.f32 %v5466_v49, %v5434_v20  ;;  %v10216_v49 = vld [vmem:[#allocation95_spill] sm:$0xff]  ;;  %v7915_v20 = vand.u32 4294901760, %v1308_v24 }
 0x1f9   : > { %2754 = vmatmul.f32.vlgmr.msrb.gmra.mxu2 %v10196_v31  ;;  %2848 = vmatmul.f32.gmra.mxu3 %v10208_v0  ;;  %vm1197_vm9 = vcmp.eq.s32.totalorder %v6305_v48, %v7870_v17  ;;  %v5449_v31 = vsel %vm703_vm11, 1.0, %v9960_v38  ;;  %vm1188_vm11 = vcmp.eq.s32.totalorder %v10194_v12, %v7602_v19 }
 0x1fa   : > { %2579 = vmatmul.f32.gmra.mxu0 %v7754_v3  ;;  %2706 = vmatmul.f32.gmra.mxu1 %v10209_v26  ;;  %v5543_v41 = vsel %vm1197_vm9, 1.0, %v9960_v38  ;;  %v7900_v3 = vsub.f32 %v1306_v45, %v7867_v8  ;;  %v7905_v26 = vadd.f32 %v7825_v15, %v2090_v58  ;;  %v5481_v45 = vsel %vm847_vm13, 1.0, %v9960_v38  ;;  %10217 = vst [vmem:[#allocation29_spill] sm:$0xff] %v7915_v20 }
 0x1fb   : > { %v7894_v32 = vadd.f32 %v5543_v41, %v1117_v44  ;;  %3770 = vmatpush.msrb.mxu2 %v10211_v42  ;;  %3946 = vmatpush.msrb.mxu3 %v10212_v23  ;;  %v1278_v44 = vadd.f32 %v5528_v35, %v1102_v21  ;;  %v5498_v41 = vsel %vm1008_vm10, 1.0, %v9960_v38  ;;  %v943_v15 = vadd.f32 %v5481_v45, %v5449_v31  ;;  %v10218_v35 = vld [vmem:[#allocation84_spill] sm:$0xff] }
 0x1fc   : > { %v2224_v10 = vpop.f32.mrf.mxu2  ;;  %v2414_v50 = vpop.f32.mrf.mxu3  ;;  %10213 = vst [vmem:[#allocation23_spill] sm:$0xff] %v7905_v26  ;;  %v5530_v45 = vsel %vm1184_vm14, 1.0, %v9960_v38  ;;  %vm694_vm13 = vcmp.eq.s32.totalorder %v10194_v12, %v7644_v30  ;;  %vm838_vm14 = vcmp.eq.s32.totalorder %v10194_v12, %v7653_v36 }
 0x1fd   : > { %10210 = vst [vmem:[#allocation59_spill] sm:$0xff] %v7894_v32  ;;  %v10214_v32 = vld [vmem:[#allocation50_spill] sm:$0xff]  ;;  %3772 = vmatpush.msrb.mxu2 %v10215_v18  ;;  %3952 = vmatpush.msrb.mxu3 %v10216_v49  ;;  %v1104_v49 = vadd.f32 %v5498_v41, %v928_v25  ;;  %v1310_v31 = vmul.f32 0.5, %v1278_v44  ;;  %v5472_v19 = vsel %vm838_vm14, 1.0, %v9960_v38 }
 0x1fe   : > { %v2225_v23 = vadd.f32 %v2224_v10, %v10214_v32  ;;  %v10219_v32 = vld [vmem:[#allocation100_spill] sm:$0xff]  ;;  %v9844_v10 = vand.u32 4294901760, %v7900_v3 }
 0x1ff   : > { %v2093_v7 = vpop.f32.mrf.mxu0  ;;  %v7923_v58 = vpop.f32.mrf.mxu1  ;;  %3774 = vmatpush.msrb.mxu2 %v10218_v35  ;;  %3958 = vmatpush.msrb.mxu3 %v10219_v32  ;;  %v1280_v44 = vadd.f32 %v5530_v45, %v1104_v49  ;;  %v10224_v32 = vld [vmem:[#allocation107_spill] sm:$0xff]  ;;  %v5500_v49 = vsel %vm1010_vm3, 1.0, %v9960_v38  ;;  %v10227_v45 = vld [vmem:[#allocation118_spill] sm:$0xff]  ;;  %vm1190_vm3 = vcmp.eq.s32.totalorder %v10194_v12, %v7682_v43 }
 0x200   : > { %v2411_v21 = vadd.f32 %v2410_v63, %v2225_v23  ;;  %v2094_v26 = vadd.f32 %v2093_v7, %v1965_v27  ;;  %v7928_v53 = vpop.permute.xlu2 %1161  ;;  %v7938_v63 = vsub.f32 %v1308_v24, %v7915_v20  ;;  %v5468_v27 = vsel %vm834_vm15, 1.0, %v9960_v38 }
 0x201   : > { %10220 = vst [vmem:[#allocation27_spill] sm:$0xff] %v7928_v53  ;;  %2758 = vmatmul.f32.gmra.mxu2 %v10208_v0  ;;  %2852 = vmatmul.f32.gmra.mxu3 %v10221_v47  ;;  %v7933_v1 = vpop.permute.xlu1 %985  ;;  %vm1199_vm1 = vcmp.eq.s32.totalorder %v6305_v48, %v7928_v53  ;;  %v5436_v0 = vsel %vm690_vm0, 1.0, %v9960_v38  ;;  %vm1014_vm15 = vcmp.eq.s32.totalorder %v10194_v12, %v10158_v11 }
 0x202   : > { %10222 = vst [vmem:[#allocation31_spill] sm:$0xff] %v7938_v63  ;;  %2584 = vmatmul.f32.gmra.mxu0 %v7791_v57  ;;  %3214 = vmatmul.f32.vlgmr.msrb.gmra.mxu1 %v7867_v8  ;;  %vm1023_vm2 = vcmp.eq.s32.totalorder %v6305_v48, %v7933_v1  ;;  %v5545_v29 = vsel %vm1199_vm1, 1.0, %v9960_v38  ;;  %v7957_v25 = vadd.f32 %v7864_v9, %v2094_v26  ;;  %v7967_v8 = vand.u32 4294901760, %v1310_v31  ;;  %v10225_v26 = vld [vmem:[#allocation92_spill] sm:$0xff] }
 0x203   : > { %v5513_v24 = vsel %vm1023_vm2, 1.0, %v9960_v38  ;;  %4165 = vmatpush.msrb.mxu1 %v10211_v42  ;;  %3776 = vmatpush.msrb.mxu2 %v10223_v34  ;;  %v2991_v57 = vsub.f32 %v7900_v3, %v9844_v10  ;;  %v930_v53 = vadd.f32 %v5468_v27, %v5436_v0  ;;  %v9845_v40 = vand.u32 4294901760, %v7938_v63  ;;  %v10230_v10 = vld [vmem:[#allocation67_spill] sm:$0xff] }
 0x204   : > { %v2232_v41 = vpop.f32.mrf.mxu2  ;;  %v7964_v23 = vpop.f32.mrf.mxu3  ;;  %v1119_v7 = vadd.f32 %v5513_v24, %v943_v15  ;;  %3964 = vmatpush.msrb.mxu3 %v10224_v32  ;;  %v7993_v32 = vsub.f32 %v1310_v31, %v7967_v8  ;;  %vm696_vm0 = vcmp.eq.s32.totalorder %v10194_v12, %v7684_v6  ;;  %vm840_vm1 = vcmp.eq.s32.totalorder %v10194_v12, %v7726_v55 }
 0x205   : > { %v2233_v9 = vadd.f32 %v2232_v41, %v7389_v54  ;;  %4167 = vmatpush.msrb.mxu1 %v10215_v18  ;;  %3778 = vmatpush.msrb.mxu2 %v10225_v26  ;;  %v2992_v24 = vand.u32 4294901760, %v2991_v57  ;;  %v10229_v41 = vld [vmem:[#allocation119_spill] sm:$0xff]  ;;  %v5532_v57 = vsel %vm1186_vm5, 1.0, %v9960_v38  ;;  %v2999_v28 = vsub.f32 %v7938_v63, %v9845_v40  ;;  %v8029_v63 = vpop.permute.xlu0 %988 }
 0x206   : > { %v7978_v15 = vadd.f32 %v5545_v29, %v1119_v7  ;;  %3970 = vmatpush.msrb.mxu3 %v10227_v45  ;;  %v1312_v29 = vmul.f32 0.5, %v1280_v44  ;;  %v5470_v7 = vsel %vm836_vm4, 1.0, %v9960_v38  ;;  %v1106_v45 = vadd.f32 %v5500_v49, %v930_v53 }
 0x207   : > { %v2510_v54 = vpop.f32.mrf.mxu0  ;;  %v7985_v27 = vpop.f32.mrf.mxu1  ;;  %v2415_v0 = vadd.f32 %v2414_v50, %v2233_v9  ;;  %4169 = vmatpush.msrb.mxu1 %v10218_v35  ;;  %3780 = vmatpush.msrb.mxu2 %v10228_v61  ;;  %v5438_v44 = vsel %vm692_vm6, 1.0, %v9960_v38  ;;  %v9853_v35 = vand.u32 4294901760, %v7993_v32  ;;  %vm1025_vm10 = vcmp.eq.s32.totalorder %v6305_v48, %v8029_v63 }
 0x208   : > { %10226 = vst [vmem:[#allocation58_spill] sm:$0xff] %v7978_v15  ;;  %3976 = vmatpush.msrb.mxu3 %v10229_v41  ;;  %v7997_v50 = vpop.permute.xlu2 %812  ;;  %v2511_v9 = vadd.f32 %v2510_v54, %v2411_v21  ;;  %v1282_v41 = vadd.f32 %v5532_v57, %v1106_v45  ;;  %v932_v40 = vadd.f32 %v5470_v7, %v5438_v44  ;;  %v3000_v51 = vand.u32 4294901760, %v2999_v28 }
 0x209   : > { %2762 = vmatmul.f32.gmra.mxu2 %v10221_v47  ;;  %2856 = vmatmul.f32.gmra.mxu3 %v10230_v10  ;;  %vm849_vm7 = vcmp.eq.s32.totalorder %v6305_v48, %v7997_v50  ;;  %v8021_v47 = vand.u32 4294901760, %v1312_v29  ;;  %vm1016_vm4 = vcmp.eq.s32.totalorder %v10194_v12, %v7715_v22  ;;  %vm1192_vm6 = vcmp.eq.s32.totalorder %v10194_v12, %v7465_v39 }
 0x20a   : > { %2993 = vmatmul.f32.vlgmr.msrb.gmra.mxu0 %v2992_v24  ;;  %3218 = vmatmul.f32.gmra.mxu1 %v7915_v20  ;;  %v8008_v53 = vpop.permute.xlu1 %668  ;;  %v5483_v54 = vsel %vm849_vm7, 1.0, %v9960_v38  ;;  %v10233_v24 = vld [vmem:[#allocation103_spill] sm:$0xff]  ;;  %v8040_v45 = vadd.f32 %v7923_v58, %v2511_v9  ;;  %v1314_v28 = vmul.f32 0.5, %v1282_v41 }
 0x20b   : > { %vm705_vm9 = vcmp.eq.s32.totalorder %v6305_v48, %v8008_v53  ;;  %4051 = vmatpush.msrb.mxu0 %v10231_v56  ;;  %4171 = vmatpush.msrb.mxu1 %v10223_v34  ;;  %10232 = vst [vmem:[#allocation33_spill] sm:$0xff] %v8021_v47  ;;  %v10234_v56 = vld [vmem:[#allocation80_spill] sm:$0xff]  ;;  %v5502_v34 = vsel %vm1012_vm8, 1.0, %v9960_v38  ;;  %vm842_vm8 = vcmp.eq.s32.totalorder %v10194_v12, %v7759_v16 }
 0x20c   : > { %v2240_v21 = vpop.f32.mrf.mxu2  ;;  %v8023_v31 = vpop.f32.mrf.mxu3  ;;  %v5451_v49 = vsel %vm705_vm9, 1.0, %v9960_v38  ;;  %3782 = vmatpush.msrb.mxu2 %v10233_v24  ;;  %v8091_v30 = vand.u32 4294901760, %v1314_v28 }
 0x20d   : > { %v2241_v15 = vadd.f32 %v2240_v21, %v7439_v13  ;;  %v945_v20 = vadd.f32 %v5483_v54, %v5451_v49  ;;  %4054 = vmatpush.msrb.mxu0 %v10234_v56  ;;  %4173 = vmatpush.msrb.mxu1 %v10225_v26  ;;  %v10235_v13 = vld [vmem:[#allocation109_spill] sm:$0xff]  ;;  %v5515_v21 = vsel %vm1025_vm10, 1.0, %v9960_v38  ;;  %v8057_v54 = vsub.f32 %v1312_v29, %v8021_v47  ;;  %v10238_v29 = vld [vmem:[#allocation112_spill] sm:$0xff] }
 0x20e   : > { %3784 = vmatpush.msrb.mxu2 %v10235_v13  ;;  %v10236_v49 = vld [vmem:[#allocation85_spill] sm:$0xff]  ;;  %v1108_v56 = vadd.f32 %v5502_v34, %v932_v40  ;;  %10239 = vst [vmem:[#allocation36_spill] sm:$0xff] %v8091_v30  ;;  %v8124_v55 = vsub.f32 %v1314_v28, %v8091_v30  ;;  %v8141_v28 = vpop.permute.xlu0 %1167 }
 0x20f   : > { %v2515_v7 = vpop.f32.mrf.mxu0  ;;  %v8046_v57 = vpop.f32.mrf.mxu1  ;;  %v2419_v44 = vadd.f32 %v7964_v23, %v2241_v15  ;;  %4057 = vmatpush.msrb.mxu0 %v10236_v49  ;;  %v1121_v9 = vadd.f32 %v5515_v21, %v945_v20  ;;  %4175 = vmatpush.msrb.mxu1 %v10228_v61  ;;  %v5534_v15 = vsel %vm1188_vm11, 1.0, %v9960_v38  ;;  %v3007_v20 = vsub.f32 %v7993_v32, %v9853_v35  ;;  %v10240_v21 = vld [vmem:[#allocation93_spill] sm:$0xff] }
 0x210   : > { %v2516_v58 = vadd.f32 %v2515_v7, %v2415_v0  ;;  %v10237_v0 = vld [vmem:[#allocation89_spill] sm:$0xff]  ;;  %3786 = vmatpush.msrb.mxu2 %v10238_v29  ;;  %v1284_v41 = vadd.f32 %v5534_v15, %v1108_v56  ;;  %v9852_v7 = vand.u32 4294901760, %v8057_v54  ;;  %v5504_v49 = vsel %vm1014_vm15, 1.0, %v9960_v38 }
 0x211   : > { %2766 = vmatmul.f32.gmra.mxu2 %v10230_v10  ;;  %2860 = vmatmul.f32.gmra.mxu3 %v7296_v2  ;;  %v8061_v23 = vpop.permute.xlu2 %671  ;;  %v5440_v10 = vsel %vm694_vm13, 1.0, %v9960_v38  ;;  %v5474_v56 = vsel %vm840_vm1, 1.0, %v9960_v38  ;;  %vm1203_vm10 = vcmp.eq.s32.totalorder %v6305_v48, %v8141_v28  ;;  %vm698_vm11 = vcmp.eq.s32.totalorder %v10194_v12, %v7772_v46 }
 0x212   : > { %3001 = vmatmul.f32.gmra.mxu0 %v3000_v51  ;;  %3222 = vmatmul.f32.gmra.mxu1 %v7967_v8  ;;  %v8072_v34 = vadd.f32 %v7985_v27, %v2516_v58  ;;  %v934_v58 = vadd.f32 %v5472_v19, %v5440_v10  ;;  %vm707_vm5 = vcmp.eq.s32.totalorder %v6305_v48, %v8061_v23 }
 0x213   : > { %4060 = vmatpush.msrb.mxu0 %v10237_v0  ;;  %4177 = vmatpush.msrb.mxu1 %v10233_v24  ;;  %v3008_v0 = vand.u32 4294901760, %v3007_v20  ;;  %v10241_v20 = vld [vmem:[#allocation97_spill] sm:$0xff]  ;;  %vm1018_vm13 = vcmp.eq.s32.totalorder %v10194_v12, %v7801_v60  ;;  %vm1194_vm15 = vcmp.eq.s32.totalorder %v10194_v12, %v7786_v33  ;;  %vm700_vm1 = vcmp.eq.s32.totalorder %v10194_v12, %v7835_v62 }
 0x214   : > { %v2248_v27 = vpop.f32.mrf.mxu2  ;;  %v2426_v40 = vpop.f32.mrf.mxu3  ;;  %v5540_v62 = vsel %vm1194_vm15, 1.0, %v9960_v38 }
 0x215   : > { %v2249_v36 = vadd.f32 %v2248_v27, %v7475_v14  ;;  %v8095_v51 = vpop.permute.xlu1 %1164  ;;  %4063 = vmatpush.msrb.mxu0 %v10240_v21  ;;  %4179 = vmatpush.msrb.mxu1 %v10235_v13  ;;  %v5442_v14 = vsel %vm696_vm0, 1.0, %v9960_v38  ;;  %v1316_v21 = vmul.f32 0.5, %v1284_v41  ;;  %v10243_v41 = vld [vmem:[#allocation104_spill] sm:$0xff]  ;;  %vm844_vm0 = vcmp.eq.s32.totalorder %v10194_v12, %v7828_v37 }
 0x216   : > { %vm1201_vm2 = vcmp.eq.s32.totalorder %v6305_v48, %v8095_v51  ;;  %v936_v43 = vadd.f32 %v5474_v56, %v5442_v14 }
 0x217   : > { %v2520_v15 = vpop.f32.mrf.mxu0  ;;  %v2635_v27 = vpop.f32.mrf.mxu1  ;;  %v2423_v11 = vadd.f32 %v8023_v31, %v2249_v36  ;;  %v5547_v10 = vsel %vm1201_vm2, 1.0, %v9960_v38  ;;  %4066 = vmatpush.msrb.mxu0 %v10241_v20  ;;  %4181 = vmatpush.msrb.mxu1 %v10238_v29  ;;  %v3015_v31 = vsub.f32 %v8057_v54, %v9852_v7  ;;  %v1110_v36 = vadd.f32 %v5504_v49, %v934_v58 }
 0x218   : > { %v2521_v6 = vadd.f32 %v2520_v15, %v2419_v44  ;;  %v8121_v19 = vadd.f32 %v5547_v10, %v1121_v9  ;;  %v5536_v9 = vsel %vm1190_vm3, 1.0, %v9960_v38  ;;  %v10246_v15 = vld [vmem:[#allocation111_spill] sm:$0xff]  ;;  %vm1020_vm3 = vcmp.eq.s32.totalorder %v10194_v12, %v7830_v52 }
 0x219   : > { %2770 = vmatmul.f32.gmra.mxu2 %v7296_v2  ;;  %2864 = vmatmul.f32.gmra.mxu3 %v7359_v4  ;;  %v5506_v2 = vsel %vm1016_vm4, 1.0, %v9960_v38  ;;  %v3016_v56 = vand.u32 4294901760, %v3015_v31  ;;  %v1286_v10 = vadd.f32 %v5536_v9, %v1110_v36  ;;  %v10247_v31 = vld [vmem:[#allocation116_spill] sm:$0xff] }
 0x21a   : > { %10242 = vst [vmem:[#allocation35_spill] sm:$0xff] %v8121_v19  ;;  %3009 = vmatmul.f32.gmra.mxu0 %v3008_v0  ;;  %3226 = vmatmul.f32.gmra.mxu1 %v8021_v47  ;;  %v8132_v22 = vpop.permute.xlu2 %991  ;;  %v8135_v44 = vadd.f32 %v8046_v57, %v2521_v6  ;;  %v8146_v0 = vand.u32 4294901760, %v1316_v21  ;;  %v10245_v57 = vld [vmem:[#allocation57_spill] sm:$0xff]  ;;  %v1112_v20 = vadd.f32 %v5506_v2, %v936_v43  ;;  %v9854_v6 = vand.u32 4294901760, %v8124_v55  ;;  %v10248_v2 = vld [vmem:[#allocation54_spill] sm:$0xff] }
 0x21b   : > { %4069 = vmatpush.msrb.mxu0 %v10243_v41  ;;  %vm1027_vm7 = vcmp.eq.s32.totalorder %v6305_v48, %v8132_v22  ;;  %v5453_v41 = vsel %vm707_vm5, 1.0, %v9960_v38  ;;  %v1318_v39 = vmul.f32 0.5, %v1286_v10  ;;  %vm1196_vm5 = vcmp.eq.s32.totalorder %v10194_v12, %v7870_v17 }
 0x21c   : > { %v2256_v49 = vpop.f32.mrf.mxu2  ;;  %v2430_v58 = vpop.f32.mrf.mxu3  ;;  %10244 = vst [vmem:[#allocation39_spill] sm:$0xff] %v8146_v0  ;;  %v5517_v9 = vsel %vm1027_vm7, 1.0, %v9960_v38  ;;  %v8177_v46 = vsub.f32 %v1316_v21, %v8146_v0  ;;  %v5476_v21 = vsel %vm842_vm8, 1.0, %v9960_v38  ;;  %vm846_vm7 = vcmp.eq.s32.totalorder %v10194_v12, %v7892_v59 }
 0x21d   : > { %v2257_v14 = vadd.f32 %v2256_v49, %v10245_v57  ;;  %4072 = vmatpush.msrb.mxu0 %v10246_v15  ;;  %v8201_v16 = vand.u32 4294901760, %v1318_v39  ;;  %v5542_v59 = vsel %vm1196_vm5, 1.0, %v9960_v38 }
 0x21e   : > { %v8154_v7 = vpop.permute.xlu1 %815 }
 0x21f   : > { %v2525_v35 = vpop.f32.mrf.mxu0  ;;  %v2641_v19 = vpop.f32.mrf.mxu1  ;;  %v2427_v49 = vadd.f32 %v2426_v40, %v2257_v14  ;;  %vm851_vm9 = vcmp.eq.s32.totalorder %v6305_v48, %v8154_v7  ;;  %4075 = vmatpush.msrb.mxu0 %v10247_v31  ;;  %v5538_v40 = vsel %vm1192_vm6, 1.0, %v9960_v38  ;;  %10251 = vst [vmem:[#allocation38_spill] sm:$0xff] %v8201_v16  ;;  %vm702_vm6 = vcmp.eq.s32.totalorder %v10194_v12, %v7872_v5 }
 0x220   : > { %v2526_v36 = vadd.f32 %v2525_v35, %v2423_v11  ;;  %v5485_v43 = vsel %vm851_vm9, 1.0, %v9960_v38  ;;  %v3023_v35 = vsub.f32 %v8124_v55, %v9854_v6  ;;  %v5549_v11 = vsel %vm1203_vm10, 1.0, %v9960_v38 }
 0x221   : > { %2774 = vmatmul.f32.gmra.mxu2 %v7359_v4  ;;  %2868 = vmatmul.f32.gmra.mxu3 %v10248_v2  ;;  %v947_v57 = vadd.f32 %v5485_v43, %v5453_v41  ;;  %v5444_v4 = vsel %vm698_vm11, 1.0, %v9960_v38  ;;  %v10249_v43 = vld [vmem:[#allocation74_spill] sm:$0xff]  ;;  %vm1022_vm9 = vcmp.eq.s32.totalorder %v10194_v12, %v7933_v1  ;;  %vm704_vm11 = vcmp.eq.s32.totalorder %v10194_v12, %v8008_v53 }
 0x222   : > { %3017 = vmatmul.f32.gmra.mxu0 %v3016_v56  ;;  %3230 = vmatmul.f32.gmra.mxu1 %v8091_v30  ;;  %v8184_v14 = vadd.f32 %v2635_v27, %v2526_v36  ;;  %v1288_v56 = vadd.f32 %v5538_v40, %v1112_v20  ;;  %v938_v10 = vadd.f32 %v5476_v21, %v5444_v4  ;;  %v9859_v36 = vand.u32 4294901760, %v8177_v46  ;;  %v10252_v21 = vld [vmem:[#allocation56_spill] sm:$0xff] }
 0x223   : > { %v1123_v15 = vadd.f32 %v5517_v9, %v947_v57  ;;  %v5508_v20 = vsel %vm1018_vm13, 1.0, %v9960_v38  ;;  %v3024_v40 = vand.u32 4294901760, %v3023_v35  ;;  %v5478_v35 = vsel %vm844_vm0, 1.0, %v9960_v38 }
 0x224   : > { %v2264_v41 = vpop.f32.mrf.mxu2  ;;  %v2434_v31 = vpop.f32.mrf.mxu3  ;;  %v1320_v47 = vmul.f32 0.5, %v1288_v56  ;;  %v3031_v33 = vsub.f32 %v8177_v46, %v9859_v36  ;;  %v5446_v56 = vsel %vm700_vm1, 1.0, %v9960_v38  ;;  %vm848_vm13 = vcmp.eq.s32.totalorder %v10194_v12, %v7997_v50 }
 0x225   : > { %v2265_v6 = vadd.f32 %v2264_v41, %v10249_v43  ;;  %v8194_v30 = vadd.f32 %v5549_v11, %v1123_v15  ;;  %v8196_v27 = vpop.permute.xlu2 %818  ;;  %vm1024_vm1 = vcmp.eq.s32.totalorder %v10194_v12, %v8029_v63 }
 0x226   : > { %vm853_vm14 = vcmp.eq.s32.totalorder %v6305_v48, %v8196_v27 }
 0x227   : > { %10250 = vst [vmem:[#allocation60_spill] sm:$0xff] %v8194_v30  ;;  %v2530_v9 = vpop.f32.mrf.mxu0  ;;  %v2647_v60 = vpop.f32.mrf.mxu1  ;;  %v2431_v57 = vadd.f32 %v2430_v58, %v2265_v6  ;;  %v5487_v4 = vsel %vm853_vm14, 1.0, %v9960_v38  ;;  %v1114_v58 = vadd.f32 %v5508_v20, %v938_v10  ;;  %v8223_v6 = vsub.f32 %v1318_v39, %v8201_v16  ;;  %v10256_v20 = vld [vmem:[#allocation70_spill] sm:$0xff] }
 0x228   : > { %v2531_v11 = vadd.f32 %v2530_v9, %v2427_v49  ;;  %v8206_v15 = vpop.permute.xlu1 %674  ;;  %v8230_v10 = vand.u32 4294901760, %v1320_v47 }
 0x229   : > { %2778 = vmatmul.f32.gmra.mxu2 %v10248_v2  ;;  %2872 = vmatmul.f32.gmra.mxu3 %v10252_v21  ;;  %vm709_vm2 = vcmp.eq.s32.totalorder %v6305_v48, %v8206_v15  ;;  %10253 = vst [vmem:[#allocation44_spill] sm:$0xff] %v8223_v6  ;;  %v1290_v39 = vadd.f32 %v5540_v62, %v1114_v58  ;;  %v9864_v30 = vand.u32 4294901760, %v8223_v6 }
 0x22a   : > { %3025 = vmatmul.f32.gmra.mxu0 %v3024_v40  ;;  %3234 = vmatmul.f32.gmra.mxu1 %v8146_v0  ;;  %v5455_v37 = vsel %vm709_vm2, 1.0, %v9960_v38  ;;  %v8226_v2 = vadd.f32 %v2641_v19, %v2531_v11  ;;  %10255 = vst [vmem:[#allocation45_spill] sm:$0xff] %v8230_v10  ;;  %v3032_v40 = vand.u32 4294901760, %v3031_v33  ;;  %v5510_v0 = vsel %vm1020_vm3, 1.0, %v9960_v38 }
 0x22b   : > { %v949_v49 = vadd.f32 %v5487_v4, %v5455_v37  ;;  %v940_v4 = vadd.f32 %v5478_v35, %v5446_v56  ;;  %v8246_v58 = vsub.f32 %v1320_v47, %v8230_v10  ;;  %v1322_v62 = vmul.f32 0.5, %v1290_v39 }
 0x22c   : > { %10254 = vst [vmem:[#allocation43_spill] sm:$0xff] %v8226_v2  ;;  %v2272_v41 = vpop.f32.mrf.mxu2  ;;  %v2438_v43 = vpop.f32.mrf.mxu3  ;;  %v3039_v39 = vsub.f32 %v8223_v6, %v9864_v30  ;;  %v10262_v2 = vld [vmem:[#allocation27_spill] sm:$0xff]  ;;  %vm1200_vm2 = vcmp.eq.s32.totalorder %v10194_v12, %v8095_v51  ;;  %vm706_vm3 = vcmp.eq.s32.totalorder %v10194_v12, %v8061_v23 }
 0x22d   : > { %v2273_v9 = vadd.f32 %v2272_v41, %v10256_v20  ;;  %10257 = vst [vmem:[#allocation49_spill] sm:$0xff] %v8246_v58  ;;  %v1116_v5 = vadd.f32 %v5510_v0, %v940_v4  ;;  %v5480_v41 = vsel %vm846_vm7, 1.0, %v9960_v38  ;;  %v10260_v0 = vld [vmem:[#allocation8_spill] sm:$0xff]  ;;  %v8278_v17 = vand.u32 4294901760, %v1322_v62 }
 0x22e   : > { %v8235_v36 = vpop.permute.xlu2 %1170  ;;  %vm1198_vm10 = vcmp.eq.s32.totalorder %v10194_v12, %v10262_v2  ;;  %v3040_v1 = vand.u32 4294901760, %v3039_v39  ;;  %vm1202_vm7 = vcmp.eq.s32.totalorder %v10194_v12, %v8141_v28 }
 0x22f   : > { %v2535_v19 = vpop.f32.mrf.mxu0  ;;  %v8237_v11 = vpop.f32.mrf.mxu1  ;;  %v2435_v37 = vadd.f32 %v2434_v31, %v2273_v9  ;;  %vm1205_vm4 = vcmp.eq.s32.totalorder %v6305_v48, %v8235_v36  ;;  %v10258_v31 = vld [vmem:[#allocation5_spill] sm:$0xff]  ;;  %v1292_v4 = vadd.f32 %v5542_v59, %v1116_v5  ;;  %v5548_v28 = vsel %vm1202_vm7, 1.0, %v9960_v38 }
 0x230   : > { %v2536_v52 = vadd.f32 %v2535_v19, %v2431_v57  ;;  %v8248_v33 = vpop.permute.xlu1 %994  ;;  %v5551_v57 = vsel %vm1205_vm4, 1.0, %v9960_v38  ;;  %vm850_vm4 = vcmp.eq.s32.totalorder %v10194_v12, %v8154_v7 }
 0x231   : > { %2782 = vmatmul.f32.gmra.mxu2 %v10252_v21  ;;  %2876 = vmatmul.f32.gmra.mxu3 %v10258_v31  ;;  %vm1029_vm8 = vcmp.eq.s32.totalorder %v6305_v48, %v8248_v33  ;;  %v5448_v21 = vsel %vm702_vm6, 1.0, %v9960_v38  ;;  %vm1026_vm6 = vcmp.eq.s32.totalorder %v10194_v12, %v8132_v22  ;;  %v10269_v22 = vld [vmem:[#allocation9_spill] sm:$0xff] }
 0x232   : > { %3033 = vmatmul.f32.gmra.mxu0 %v3032_v40  ;;  %3238 = vmatmul.f32.gmra.mxu1 %v8201_v16  ;;  %v5519_v47 = vsel %vm1029_vm8, 1.0, %v9960_v38  ;;  %v8261_v35 = vadd.f32 %v2647_v60, %v2536_v52  ;;  %v942_v19 = vadd.f32 %v5480_v41, %v5448_v21  ;;  %v5544_v21 = vsel %vm1198_vm10, 1.0, %v9960_v38 }
 0x233   : > { %v1125_v56 = vadd.f32 %v5519_v47, %v949_v49  ;;  %v9867_v49 = vand.u32 4294901760, %v8246_v58  ;;  %vm708_vm8 = vcmp.eq.s32.totalorder %v10194_v12, %v8206_v15  ;;  %vm1028_vm10 = vcmp.eq.s32.totalorder %v10194_v12, %v8248_v33 }
 0x234   : > { %10259 = vst [vmem:[#allocation62_spill] sm:$0xff] %v8261_v35  ;;  %v2280_v20 = vpop.f32.mrf.mxu2  ;;  %v2442_v9 = vpop.f32.mrf.mxu3  ;;  %v5512_v35 = vsel %vm1022_vm9, 1.0, %v9960_v38  ;;  %vm852_vm9 = vcmp.eq.s32.totalorder %v10194_v12, %v8196_v27  ;;  %v5454_v27 = vsel %vm708_vm8, 1.0, %v9960_v38 }
 0x235   : > { %v2281_v60 = vadd.f32 %v2280_v20, %v10260_v0  ;;  %v8276_v40 = vadd.f32 %v5551_v57, %v1125_v56  ;;  %v10263_v57 = vld [vmem:[#allocation47_spill] sm:$0xff]  ;;  %v8299_v56 = vsub.f32 %v1322_v62, %v8278_v17  ;;  %v1118_v59 = vadd.f32 %v5512_v35, %v942_v19  ;;  %v10265_v35 = vld [vmem:[#allocation81_spill] sm:$0xff] }
 0x236   : > { %v5450_v62 = vsel %vm704_vm11, 1.0, %v9960_v38  ;;  %v5482_v20 = vsel %vm848_vm13, 1.0, %v9960_v38  ;;  %vm1204_vm11 = vcmp.eq.s32.totalorder %v10194_v12, %v8235_v36 }
 0x237   : > { %10261 = vst [vmem:[#allocation101_spill] sm:$0xff] %v8276_v40  ;;  %v2540_v52 = vpop.f32.mrf.mxu0  ;;  %v2659_v47 = vpop.f32.mrf.mxu1  ;;  %v2439_v16 = vadd.f32 %v2438_v43, %v2281_v60  ;;  %v3047_v43 = vsub.f32 %v8246_v58, %v9867_v49  ;;  %v9875_v50 = vand.u32 4294901760, %v8299_v56  ;;  %v944_v49 = vadd.f32 %v5482_v20, %v5450_v62 }
 0x238   : > { %v2541_v30 = vadd.f32 %v2540_v52, %v2435_v37  ;;  %v8283_v6 = vpop.permute.xlu2 %997  ;;  %v8296_v37 = vpop.permute.xlu0 %677 }
 0x239   : > { %2786 = vmatmul.f32.gmra.mxu2 %v10258_v31  ;;  %2880 = vmatmul.f32.gmra.mxu3 %v10263_v57  ;;  %v8294_v5 = vpop.permute.xlu1 %821  ;;  %vm1031_vm15 = vcmp.eq.s32.totalorder %v6305_v48, %v8283_v6  ;;  %v1324_v31 = vmul.f32 0.5, %v1292_v4  ;;  %vm711_vm0 = vcmp.eq.s32.totalorder %v6305_v48, %v8296_v37  ;;  %v3048_v63 = vand.u32 4294901760, %v3047_v43 }
 0x23a   : > { %3041 = vmatmul.f32.gmra.mxu0 %v3040_v1  ;;  %3242 = vmatmul.f32.gmra.mxu1 %v8230_v10  ;;  %vm855_vm14 = vcmp.eq.s32.totalorder %v6305_v48, %v8294_v5  ;;  %v8322_v2 = vadd.f32 %v8237_v11, %v2541_v30  ;;  %v5521_v53 = vsel %vm1031_vm15, 1.0, %v9960_v38  ;;  %v5457_v4 = vsel %vm711_vm0, 1.0, %v9960_v38 }
 0x23b   : > { %v5489_v41 = vsel %vm855_vm14, 1.0, %v9960_v38  ;;  %v8330_v52 = vand.u32 4294901760, %v1324_v31  ;;  %v1294_v1 = vadd.f32 %v5544_v21, %v1118_v59  ;;  %v5514_v11 = vsel %vm1024_vm1, 1.0, %v9960_v38  ;;  %v10266_v59 = vld [vmem:[#allocation77_spill] sm:$0xff] }
 0x23c   : > { %v2288_v39 = vpop.f32.mrf.mxu2  ;;  %v2446_v0 = vpop.f32.mrf.mxu3  ;;  %10264 = vst [vmem:[#allocation98_spill] sm:$0xff] %v8322_v2  ;;  %v951_v19 = vadd.f32 %v5489_v41, %v5457_v4  ;;  %v1120_v7 = vadd.f32 %v5514_v11, %v944_v49  ;;  %v5452_v43 = vsel %vm706_vm3, 1.0, %v9960_v38  ;;  %v5484_v21 = vsel %vm850_vm4, 1.0, %v9960_v38 }
 0x23d   : > { %v2289_v60 = vadd.f32 %v2288_v39, %v10265_v35  ;;  %v8350_v23 = vsub.f32 %v1324_v31, %v8330_v52  ;;  %vm854_vm13 = vcmp.eq.s32.totalorder %v10194_v12, %v8294_v5  ;;  %vm710_vm14 = vcmp.eq.s32.totalorder %v10194_v12, %v8296_v37 }
 0x23e   : > { %v1127_v58 = vadd.f32 %v5521_v53, %v951_v19  ;;  %v5550_v5 = vsel %vm1204_vm11, 1.0, %v9960_v38  ;;  %v5488_v37 = vsel %vm854_vm13, 1.0, %v9960_v38  ;;  %vm1030_vm15 = vcmp.eq.s32.totalorder %v10194_v12, %v8283_v6 }
 0x23f   : > { %v2545_v40 = vpop.f32.mrf.mxu0  ;;  %v2665_v10 = vpop.f32.mrf.mxu1  ;;  %v2443_v30 = vadd.f32 %v2442_v9, %v2289_v60 }
 0x240   : > { %v2546_v2 = vadd.f32 %v2545_v40, %v2439_v16  ;;  %v3055_v16 = vsub.f32 %v8299_v56, %v9875_v50  ;;  %v1326_v40 = vmul.f32 0.5, %v1294_v1  ;;  %v5516_v1 = vsel %vm1026_vm6, 1.0, %v9960_v38  ;;  %v8408_v36 = vpop.permute.xlu2 %680 }
 0x241   : > { %2790 = vmatmul.f32.gmra.mxu2 %v10263_v57  ;;  %2884 = vmatmul.f32.gmra.mxu3 %v10266_v59  ;;  %v5546_v57 = vsel %vm1200_vm2, 1.0, %v9960_v38  ;;  %vm712_vm0 = vcmp.eq.s32.totalorder %v10194_v12, %v8408_v36 }
 0x242   : > { %3049 = vmatmul.f32.gmra.mxu0 %v3048_v63  ;;  %3246 = vmatmul.f32.gmra.mxu1 %v8278_v17  ;;  %v8345_v9 = vpop.permute.xlu1 %1173  ;;  %v8347_v51 = vadd.f32 %v2659_v47, %v2546_v2  ;;  %v10267_v47 = vld [vmem:[#allocation13_spill] sm:$0xff]  ;;  %v1296_v49 = vadd.f32 %v5546_v57, %v1120_v7  ;;  %v946_v2 = vadd.f32 %v5484_v21, %v5452_v43  ;;  %v3056_v53 = vand.u32 4294901760, %v3055_v16  ;;  %v10270_v43 = vld [vmem:[#allocation15_spill] sm:$0xff] }
 0x243   : > { %vm1207_vm5 = vcmp.eq.s32.totalorder %v6305_v48, %v8345_v9  ;;  %v8363_v19 = vand.u32 4294901760, %v1326_v40  ;;  %v9874_v63 = vand.u32 4294901760, %v8350_v23  ;;  %v5486_v57 = vsel %vm852_vm9, 1.0, %v9960_v38 }
 0x244   : > { %v2296_v41 = vpop.f32.mrf.mxu2  ;;  %v2450_v62 = vpop.f32.mrf.mxu3  ;;  %v5553_v20 = vsel %vm1207_vm5, 1.0, %v9960_v38  ;;  %vm1206_vm1 = vcmp.eq.s32.totalorder %v10194_v12, %v8345_v9  ;;  %vm713_vm5 = vcmp.eq.s32.totalorder %v6305_v48, %v8408_v36  ;;  %vm4558_vm9 = vcmask 130048  }
 0x245   : > { %v2297_v31 = vadd.f32 %v2296_v41, %v10267_v47  ;;  %v8361_v39 = vadd.f32 %v5553_v20, %v1127_v58  ;;  %v8379_v16 = vsub.f32 %v1326_v40, %v8363_v19  ;;  %v3063_v15 = vsub.f32 %v8350_v23, %v9874_v63 }
 0x247   : > { %10268 = vst [vmem:[#allocation48_spill] sm:$0xff] %v8361_v39  ;;  %v2550_v35 = vpop.f32.mrf.mxu0  ;;  %v2671_v60 = vpop.f32.mrf.mxu1  ;;  %v2447_v4 = vadd.f32 %v2446_v0, %v2297_v31  ;;  %v1328_v0 = vmul.f32 0.5, %v1296_v49  ;;  %v948_v31 = vadd.f32 %v5486_v57, %v5454_v27 }
 0x248   : > { %v2551_v11 = vadd.f32 %v2550_v35, %v2443_v30  ;;  %v1122_v30 = vadd.f32 %v5516_v1, %v946_v2  ;;  %v3064_v2 = vand.u32 4294901760, %v3063_v15  ;;  %v9873_v35 = vand.u32 4294901760, %v8379_v16  ;;  %v10271_v1 = vld [vmem:[#allocation11_spill] sm:$0xff] }
 0x249   : > { %2794 = vmatmul.f32.gmra.mxu2 %v10266_v59  ;;  %2888 = vmatmul.f32.gmra.mxu3 %v10269_v22  ;;  %v8390_v21 = vand.u32 4294901760, %v1328_v0 }
 0x24a   : > { %3057 = vmatmul.f32.gmra.mxu0 %v3056_v53  ;;  %3250 = vmatmul.f32.gmra.mxu1 %v8330_v52  ;;  %v8376_v58 = vadd.f32 %v2665_v10, %v2551_v11  ;;  %v1298_v40 = vadd.f32 %v5548_v28, %v1122_v30  ;;  %v5518_v53 = vsel %vm1028_vm10, 1.0, %v9960_v38  ;;  %v3071_v28 = vsub.f32 %v8379_v16, %v9873_v35  ;;  %v10276_v35 = vld [vmem:[#allocation12_spill] sm:$0xff] }
 0x24b   : > { %v1124_v11 = vadd.f32 %v5518_v53, %v948_v31  ;;  %v5520_v53 = vsel %vm1030_vm15, 1.0, %v9960_v38 }
 0x24c   : > { %v2304_v59 = vpop.f32.mrf.mxu2  ;;  %v2454_v7 = vpop.f32.mrf.mxu3 }
 0x24d   : > { %v2305_v10 = vadd.f32 %v2304_v59, %v10270_v43  ;;  %v10272_v59 = vld [vmem:[#allocation18_spill] sm:$0xff] }
 0x24f   : > { %v2555_v41 = vpop.f32.mrf.mxu0  ;;  %v2677_v20 = vpop.f32.mrf.mxu1  ;;  %v2451_v47 = vadd.f32 %v2450_v62, %v2305_v10  ;;  %v8406_v62 = vsub.f32 %v1328_v0, %v8390_v21 }
 0x250   : > { %v2556_v49 = vadd.f32 %v2555_v41, %v2447_v4  ;;  %v1330_v4 = vmul.f32 0.5, %v1298_v40  ;;  %v8419_v0 = vpop.permute.xlu0 %824  ;;  %v1300_v41 = vadd.f32 %v5550_v5, %v1124_v11 }
 0x251   : > { %2798 = vmatmul.f32.gmra.mxu2 %v10269_v22  ;;  %2892 = vmatmul.f32.gmra.mxu3 %v10271_v1  ;;  %v9872_v40 = vand.u32 4294901760, %v8406_v62  ;;  %vm856_vm2 = vcmp.eq.s32.totalorder %v10194_v12, %v8419_v0  ;;  %vm857_vm6 = vcmp.eq.s32.totalorder %v6305_v48, %v8419_v0 }
 0x252   : > { %3065 = vmatmul.f32.gmra.mxu0 %v3064_v2  ;;  %3254 = vmatmul.f32.gmra.mxu1 %v8363_v19  ;;  %v8403_v33 = vadd.f32 %v2671_v60, %v2556_v49  ;;  %v5456_v60 = vsel %vm710_vm14, 1.0, %v9960_v38  ;;  %v8421_v27 = vand.u32 4294901760, %v1330_v4  ;;  %v3072_v2 = vand.u32 4294901760, %v3071_v28 }
 0x253   : > { %v950_v49 = vadd.f32 %v5488_v37, %v5456_v60  ;;  %v1332_v11 = vmul.f32 0.5, %v1300_v41  ;;  %v5552_v37 = vsel %vm1206_vm1, 1.0, %v9960_v38  ;;  %v5490_v60 = vsel %vm856_vm2, 1.0, %v9960_v38 }
 0x254   : > { %v2312_v22 = vpop.f32.mrf.mxu2  ;;  %v2458_v30 = vpop.f32.mrf.mxu3 }
 0x255   : > { %v2313_v15 = vadd.f32 %v2312_v22, %v10272_v59  ;;  %v10273_v22 = vld [vmem:[#allocation79_spill] sm:$0xff]  ;;  %v1126_v59 = vadd.f32 %v5520_v53, %v950_v49  ;;  %v8453_v49 = vand.u32 4294901760, %v1332_v11 }
 0x257   : > { %v2560_v57 = vpop.f32.mrf.mxu0  ;;  %v2683_v43 = vpop.f32.mrf.mxu1  ;;  %v2455_v10 = vadd.f32 %v2454_v7, %v2313_v15  ;;  %v8437_v7 = vsub.f32 %v1330_v4, %v8421_v27  ;;  %v10274_v15 = vld [vmem:[#allocation17_spill] sm:$0xff]  ;;  %v1302_v53 = vadd.f32 %v5552_v37, %v1126_v59 }
 0x258   : > { %v2561_v31 = vadd.f32 %v2560_v57, %v2451_v47  ;;  %v3079_v47 = vsub.f32 %v8406_v62, %v9872_v40  ;;  %v8450_v4 = vpop.permute.xlu2 %1176 }
 0x259   : > { %2802 = vmatmul.f32.gmra.mxu2 %v10271_v1  ;;  %2896 = vmatmul.f32.gmra.mxu3 %v10273_v22  ;;  %v8442_v1 = vpop.permute.xlu1 %1000  ;;  %10275 = vst [vmem:[#allocation51_spill] sm:$0xff] %v8450_v4  ;;  %v9878_v40 = vand.u32 4294901760, %v8437_v7  ;;  %vm1208_vm4 = vcmp.eq.s32.totalorder %v10194_v12, %v8450_v4 }
 0x25a   : > { %3073 = vmatmul.f32.gmra.mxu0 %v3072_v2  ;;  %3258 = vmatmul.f32.gmra.mxu1 %v8390_v21  ;;  %v8434_v6 = vadd.f32 %v2677_v20, %v2561_v31  ;;  %v5458_v20 = vsel %vm712_vm0, 1.0, %v9960_v38  ;;  %vm1032_vm3 = vcmp.eq.s32.totalorder %v10194_v12, %v8442_v1  ;;  %v3080_v2 = vand.u32 4294901760, %v3079_v47 }
 0x25b   : > { %v5522_v63 = vsel %vm1032_vm3, 1.0, %v9960_v38  ;;  %v3087_v47 = vsub.f32 %v8437_v7, %v9878_v40  ;;  %vm1033_vm7 = vcmp.eq.s32.totalorder %v6305_v48, %v8442_v1 }
 0x25c   : > { %v2320_v28 = vpop.f32.mrf.mxu2  ;;  %v2462_v5 = vpop.f32.mrf.mxu3  ;;  %v5523_v1 = vsel %vm1033_vm7, 1.0, %v9960_v38 }
 0x25d   : > { %v2321_v9 = vadd.f32 %v2320_v28, %v10274_v15  ;;  %v952_v15 = vadd.f32 %v5490_v60, %v5458_v20  ;;  %v10277_v20 = vld [vmem:[#allocation19_spill] sm:$0xff]  ;;  %v3088_v12 = vand.u32 4294901760, %v3087_v47 }
 0x25f   : > { %v2565_v57 = vpop.f32.mrf.mxu0  ;;  %v2689_v31 = vpop.f32.mrf.mxu1  ;;  %v2459_v41 = vadd.f32 %v2458_v30, %v2321_v9  ;;  %v1128_v37 = vadd.f32 %v5522_v63, %v952_v15 }
 0x260   : > { %v2566_v28 = vadd.f32 %v2565_v57, %v2455_v10  ;;  %v8467_v10 = vsub.f32 %v1332_v11, %v8453_v49  ;;  %v5554_v57 = vsel %vm1208_vm4, 1.0, %v9960_v38  ;;  %v10278_v11 = vld [vmem:[#allocation110_spill] sm:$0xff] }
 0x261   : > { %2806 = vmatmul.f32.gmra.mxu2 %v10273_v22  ;;  %2900 = vmatmul.f32.gmra.mxu3 %v10276_v35  ;;  %v1334_v22 = vmul.f32 0.5, %v1302_v53  ;;  %v1304_v4 = vadd.f32 %v5554_v57, %v1128_v37 }
 0x262   : > { %3081 = vmatmul.f32.gmra.mxu0 %v3080_v2  ;;  %3262 = vmatmul.f32.gmra.mxu1 %v8421_v27  ;;  %v8461_v30 = vadd.f32 %v2683_v43, %v2566_v28  ;;  %v3094_v40 = vand.u32 4294901760, %v8467_v10 }
 0x263   : > { %v8471_v28 = vand.u32 4294901760, %v1334_v22  ;;  %v1336_v15 = vmul.f32 0.5, %v1304_v4  ;;  %v10280_v4 = vand.u32 4294901760, %v7900_v3 }
 0x264   : > { %v2328_v59 = vpop.f32.mrf.mxu2  ;;  %v2466_v9 = vpop.f32.mrf.mxu3 }
 0x265   : > { %v2329_v60 = vadd.f32 %v2328_v59, %v10277_v20  ;;  %v8480_v53 = vsub.f32 %v1334_v22, %v8471_v28  ;;  %v10279_v59 = vld [vmem:[#allocation23_spill] sm:$0xff] }
 0x267   : > { %v2570_v2 = vpop.f32.mrf.mxu0  ;;  %v2695_v50 = vpop.f32.mrf.mxu1  ;;  %v2463_v43 = vadd.f32 %v2462_v5, %v2329_v60 }
 0x268   : > { %v2571_v39 = vadd.f32 %v2570_v2, %v2459_v41  ;;  %v3095_v41 = vsub.f32 %v8467_v10, %v3094_v40 }
 0x269   : > { %2810 = vmatmul.f32.gmra.mxu2 %v10276_v35  ;;  %2904 = vmatmul.f32.gmra.mxu3 %v10278_v11 }
 0x26a   : > { %3089 = vmatmul.f32.gmra.mxu0 %v3088_v12  ;;  %3266 = vmatmul.f32.gmra.mxu1 %v8453_v49  ;;  %v8477_v63 = vadd.f32 %v2689_v31, %v2571_v39  ;;  %v8486_v12 = vand.u32 4294901760, %v1336_v15  ;;  %v3096_v39 = vand.u32 4294901760, %v3095_v41  ;;  %v9880_v31 = vand.u32 4294901760, %v8480_v53 }
 0x26c   : > { %v2336_v5 = vpop.f32.mrf.mxu2  ;;  %v2470_v47 = vpop.f32.mrf.mxu3 }
 0x26d   : > { %v2337_v37 = vadd.f32 %v2336_v5, %v10279_v59  ;;  %v3103_v5 = vsub.f32 %v8480_v53, %v9880_v31 }
 0x26f   : > { %v2575_v35 = vpop.f32.mrf.mxu0  ;;  %v2701_v20 = vpop.f32.mrf.mxu1  ;;  %v2467_v60 = vadd.f32 %v2466_v9, %v2337_v37  ;;  %v8497_v9 = vsub.f32 %v1336_v15, %v8486_v12 }
 0x270   : > { %v2576_v57 = vadd.f32 %v2575_v35, %v2463_v43 }
 0x271   : > { %2814 = vmatmul.f32.gmra.mxu2 %v10278_v11  ;;  %3442 = vmatmul.f32.vlgmr.msra.gmra.mxu3 %v10280_v4  ;;  %v9879_v15 = vand.u32 4294901760, %v8497_v9  ;;  %v10285_v4 = vld [vmem:[#allocation88_spill] sm:$0xff] }
 0x272   : > { %3097 = vmatmul.f32.gmra.mxu0 %v3096_v39  ;;  %3270 = vmatmul.f32.gmra.mxu1 %v8471_v28  ;;  %v8493_v22 = vadd.f32 %v2695_v50, %v2576_v57  ;;  %v10281_v50 = vld [vmem:[#allocation84_spill] sm:$0xff]  ;;  %v10282_v57 = vld [vmem:[#allocation31_spill] sm:$0xff] }
 0x273   : > { %4395 = vmatpush.msra.mxu3 %v10211_v42  ;;  %v3104_v42 = vand.u32 4294901760, %v3103_v5  ;;  %v10283_v39 = vand.u32 4294901760, %v10282_v57  ;;  %v10286_v5 = vld [vmem:[#allocation82_spill] sm:$0xff] }
 0x274   : > { %v2344_v2 = vpop.f32.mrf.mxu2  ;;  %v2845_v43 = vpop.f32.mrf.mxu3 }
 0x275   : > { %v2345_v11 = vadd.f32 %v2344_v2, %v7957_v25  ;;  %4397 = vmatpush.msra.mxu3 %v10215_v18  ;;  %v10284_v18 = vld [vmem:[#allocation72_spill] sm:$0xff] }
 0x277   : > { %v2580_v41 = vpop.f32.mrf.mxu0  ;;  %v2707_v59 = vpop.f32.mrf.mxu1  ;;  %v2471_v37 = vadd.f32 %v2470_v47, %v2345_v11  ;;  %4399 = vmatpush.msra.mxu3 %v10281_v50  ;;  %v10288_v50 = vld [vmem:[#allocation86_spill] sm:$0xff] }
 0x278   : > { %v2581_v35 = vadd.f32 %v2580_v41, %v2467_v60  ;;  %v3111_v60 = vsub.f32 %v8497_v9, %v9879_v15 }
 0x279   : > { %3328 = vmatmul.f32.vlgmr.msra.gmra.mxu2 %v7900_v3  ;;  %3448 = vmatmul.f32.gmra.mxu3 %v10283_v39  ;;  %v10289_v39 = vand.u32 4294901760, %v7993_v32 }
 0x27a   : > { %3105 = vmatmul.f32.gmra.mxu0 %v3104_v42  ;;  %3274 = vmatmul.f32.gmra.mxu1 %v8486_v12  ;;  %v8510_v25 = vadd.f32 %v2701_v20, %v2581_v35  ;;  %v3112_v42 = vand.u32 4294901760, %v3111_v60 }
 0x27b   : > { %4289 = vmatpush.msra.mxu2 %v10284_v18  ;;  %4401 = vmatpush.msra.mxu3 %v10285_v4 }
 0x27c   : > { %v2755_v47 = vpop.f32.mrf.mxu2  ;;  %v2849_v2 = vpop.f32.mrf.mxu3 }
 0x27d   : > { %v2756_v3 = vadd.f32 %v2755_v47, %v8040_v45  ;;  %4293 = vmatpush.msra.mxu2 %v10286_v5  ;;  %4403 = vmatpush.msra.mxu3 %v10225_v26  ;;  %v10290_v45 = vld [vmem:[#allocation24_spill] sm:$0xff] }
 0x27f   : > { %v8520_v11 = vadd.f32 %v2845_v43, %v2756_v3  ;;  %v2585_v20 = vpop.f32.mrf.mxu0  ;;  %v8522_v41 = vpop.f32.mrf.mxu1  ;;  %4297 = vmatpush.msra.mxu2 %v10288_v50  ;;  %4405 = vmatpush.msra.mxu3 %v10228_v61  ;;  %v10291_v43 = vld [vmem:[#allocation90_spill] sm:$0xff] }
 0x280   : > { %v2586_v35 = vadd.f32 %v2585_v20, %v2471_v37  ;;  %v10292_v37 = vld [vmem:[#allocation94_spill] sm:$0xff]  ;;  %v10298_v20 = vld [vmem:[#allocation115_spill] sm:$0xff] }
 0x281   : > { %10287 = vst [vmem:[#allocation52_spill] sm:$0xff] %v8520_v11  ;;  %3333 = vmatmul.f32.gmra.mxu2 %v10282_v57  ;;  %3454 = vmatmul.f32.gmra.mxu3 %v10289_v39 }
 0x282   : > { %3113 = vmatmul.f32.gmra.mxu0 %v3112_v42  ;;  %3698 = vmatmul.f32.vlgmr.msra.gmra.mxu1 %v10290_v45  ;;  %v8530_v26 = vadd.f32 %v2707_v59, %v2586_v35  ;;  %v10294_v59 = vld [vmem:[#allocation99_spill] sm:$0xff]  ;;  %v10300_v35 = vld [vmem:[#allocation117_spill] sm:$0xff]  ;;  %v10301_v42 = vand.u32 4294901760, %v8124_v55 }
 0x283   : > { %4301 = vmatpush.msra.mxu2 %v10291_v43  ;;  %4407 = vmatpush.msra.mxu3 %v10233_v24  ;;  %v10295_v24 = vand.u32 4294901760, %v8057_v54 }
 0x284   : > { %v2759_v18 = vpop.f32.mrf.mxu2  ;;  %v2853_v4 = vpop.f32.mrf.mxu3 }
 0x285   : > { %v2760_v61 = vadd.f32 %v2759_v18, %v8072_v34  ;;  %4305 = vmatpush.msra.mxu2 %v10292_v37  ;;  %4409 = vmatpush.msra.mxu3 %v10235_v13  ;;  %v10296_v34 = vld [vmem:[#allocation29_spill] sm:$0xff] }
 0x286   : > { %v10297_v13 = vld [vmem:[#allocation105_spill] sm:$0xff] }
 0x287   : > { %v8537_v57 = vadd.f32 %v2849_v2, %v2760_v61  ;;  %v8539_v47 = vpop.f32.mrf.mxu0  ;;  %v8541_v60 = vpop.f32.mrf.mxu1  ;;  %4309 = vmatpush.msra.mxu2 %v10294_v59  ;;  %4411 = vmatpush.msra.mxu3 %v10238_v29  ;;  %v10304_v61 = vld [vmem:[#allocation33_spill] sm:$0xff] }
 0x289   : > { %10293 = vst [vmem:[#allocation53_spill] sm:$0xff] %v8537_v57  ;;  %3338 = vmatmul.f32.gmra.mxu2 %v7993_v32  ;;  %3460 = vmatmul.f32.gmra.mxu3 %v10295_v24  ;;  %v10305_v24 = vld [vmem:[#allocation43_spill] sm:$0xff] }
 0x28a   : > { %3601 = vmatmul.f32.vlgmr.msra.gmra.mxu0 %v10290_v45  ;;  %3702 = vmatmul.f32.gmra.mxu1 %v10296_v34 }
 0x28b   : > { %4313 = vmatpush.msra.mxu2 %v10297_v13 }
 0x28c   : > { %v2763_v2 = vpop.f32.mrf.mxu2  ;;  %v2857_v3 = vpop.f32.mrf.mxu3 }
 0x28d   : > { %v2764_v5 = vadd.f32 %v2763_v2, %v8135_v44  ;;  %4317 = vmatpush.msra.mxu2 %v10298_v20 }
 0x28f   : > { %v8553_v50 = vadd.f32 %v2853_v4, %v2764_v5  ;;  %v8555_v29 = vpop.f32.mrf.mxu0  ;;  %v8557_v32 = vpop.f32.mrf.mxu1  ;;  %4321 = vmatpush.msra.mxu2 %v10300_v35  ;;  %v10310_v35 = vld [vmem:[#allocation62_spill] sm:$0xff] }
 0x291   : > { %10299 = vst [vmem:[#allocation42_spill] sm:$0xff] %v8553_v50  ;;  %3343 = vmatmul.f32.gmra.mxu2 %v8057_v54  ;;  %3466 = vmatmul.f32.gmra.mxu3 %v10301_v42  ;;  %v10303_v54 = vand.u32 4294901760, %v8177_v46 }
 0x292   : > { %3605 = vmatmul.f32.gmra.mxu0 %v10296_v34  ;;  %3706 = vmatmul.f32.gmra.mxu1 %v7967_v8 }
 0x294   : > { %v2767_v44 = vpop.f32.mrf.mxu2  ;;  %v2861_v39 = vpop.f32.mrf.mxu3 }
 0x295   : > { %v2768_v45 = vadd.f32 %v2767_v44, %v8184_v14 }
 0x297   : > { %v8566_v43 = vadd.f32 %v2857_v3, %v2768_v45  ;;  %v8568_v18 = vpop.f32.mrf.mxu0  ;;  %v8570_v4 = vpop.f32.mrf.mxu1 }
 0x299   : > { %10302 = vst [vmem:[#allocation63_spill] sm:$0xff] %v8566_v43  ;;  %3348 = vmatmul.f32.gmra.mxu2 %v8124_v55  ;;  %3472 = vmatmul.f32.gmra.mxu3 %v10303_v54  ;;  %v10307_v55 = vld [vmem:[#allocation44_spill] sm:$0xff] }
 0x29a   : > { %3609 = vmatmul.f32.gmra.mxu0 %v7967_v8  ;;  %3710 = vmatmul.f32.gmra.mxu1 %v10304_v61  ;;  %v10308_v3 = vand.u32 4294901760, %v10307_v55  ;;  %v10309_v8 = vld [vmem:[#allocation36_spill] sm:$0xff] }
 0x29c   : > { %v2771_v37 = vpop.f32.mrf.mxu2  ;;  %v2865_v59 = vpop.f32.mrf.mxu3 }
 0x29d   : > { %v2772_v34 = vadd.f32 %v2771_v37, %v10305_v24 }
 0x29f   : > { %v8578_v14 = vadd.f32 %v2861_v39, %v2772_v34  ;;  %v8580_v13 = vpop.f32.mrf.mxu0  ;;  %v8582_v2 = vpop.f32.mrf.mxu1  ;;  %v10315_v34 = vld [vmem:[#allocation98_spill] sm:$0xff] }
 0x2a1   : > { %10306 = vst [vmem:[#allocation106_spill] sm:$0xff] %v8578_v14  ;;  %3353 = vmatmul.f32.gmra.mxu2 %v8177_v46  ;;  %3478 = vmatmul.f32.gmra.mxu3 %v10308_v3  ;;  %v10312_v46 = vld [vmem:[#allocation49_spill] sm:$0xff] }
 0x2a2   : > { %3613 = vmatmul.f32.gmra.mxu0 %v10304_v61  ;;  %3714 = vmatmul.f32.gmra.mxu1 %v10309_v8  ;;  %v10313_v54 = vand.u32 4294901760, %v10312_v46  ;;  %v10314_v61 = vld [vmem:[#allocation39_spill] sm:$0xff] }
 0x2a4   : > { %v2775_v5 = vpop.f32.mrf.mxu2  ;;  %v2869_v20 = vpop.f32.mrf.mxu3 }
 0x2a5   : > { %v2776_v42 = vadd.f32 %v2775_v5, %v10310_v35 }
 0x2a7   : > { %v8590_v44 = vadd.f32 %v2865_v59, %v2776_v42  ;;  %v8592_v39 = vpop.f32.mrf.mxu0  ;;  %v8594_v45 = vpop.f32.mrf.mxu1 }
 0x2a9   : > { %10311 = vst [vmem:[#allocation102_spill] sm:$0xff] %v8590_v44  ;;  %3358 = vmatmul.f32.gmra.mxu2 %v10307_v55  ;;  %3484 = vmatmul.f32.gmra.mxu3 %v10313_v54  ;;  %v10317_v55 = vand.u32 4294901760, %v8299_v56  ;;  %v10341_v44 = vld [vmem:[#allocation68_spill] sm:$0xff] }
 0x2aa   : > { %3617 = vmatmul.f32.gmra.mxu0 %v10309_v8  ;;  %3718 = vmatmul.f32.gmra.mxu1 %v10314_v61  ;;  %v10318_v8 = vld [vmem:[#allocation38_spill] sm:$0xff]  ;;  %v1313_v14 = vmul.f32 0.5, %v10341_v44 }
 0x2ac   : > { %v2779_v37 = vpop.f32.mrf.mxu2  ;;  %v2873_v24 = vpop.f32.mrf.mxu3 }
 0x2ad   : > { %v2780_v3 = vadd.f32 %v2779_v37, %v10315_v34 }
 0x2af   : > { %v8602_v5 = vadd.f32 %v2869_v20, %v2780_v3  ;;  %v8604_v59 = vpop.f32.mrf.mxu0  ;;  %v8606_v35 = vpop.f32.mrf.mxu1 }
 0x2b1   : > { %10316 = vst [vmem:[#allocation61_spill] sm:$0xff] %v8602_v5  ;;  %3363 = vmatmul.f32.gmra.mxu2 %v10312_v46  ;;  %3490 = vmatmul.f32.gmra.mxu3 %v10317_v55  ;;  %v10320_v46 = vand.u32 4294901760, %v8350_v23 }
 0x2b2   : > { %3621 = vmatmul.f32.gmra.mxu0 %v10314_v61  ;;  %3722 = vmatmul.f32.gmra.mxu1 %v10318_v8  ;;  %v10321_v61 = vld [vmem:[#allocation45_spill] sm:$0xff] }
 0x2b4   : > { %v2783_v42 = vpop.f32.mrf.mxu2  ;;  %v2877_v54 = vpop.f32.mrf.mxu3 }
 0x2b5   : > { %v2784_v15 = vadd.f32 %v2783_v42, %v8347_v51 }
 0x2b7   : > { %v8614_v37 = vadd.f32 %v2873_v24, %v2784_v15  ;;  %v8616_v20 = vpop.f32.mrf.mxu0  ;;  %v8618_v34 = vpop.f32.mrf.mxu1 }
 0x2b9   : > { %10319 = vst [vmem:[#allocation113_spill] sm:$0xff] %v8614_v37  ;;  %3368 = vmatmul.f32.gmra.mxu2 %v8299_v56  ;;  %3496 = vmatmul.f32.gmra.mxu3 %v10320_v46  ;;  %v10323_v56 = vand.u32 4294901760, %v8379_v16  ;;  %v5792_v46 = vld [vmem:[%s5958_s28] sm:$0xff] }
 0x2ba   : > { %3625 = vmatmul.f32.gmra.mxu0 %v10318_v8  ;;  %3726 = vmatmul.f32.gmra.mxu1 %v10321_v61  ;;  %v5879_v8 = vmov 0  }
 0x2bb   : > { %5772 = vset.pattern.permute.xlu1 %v5879_v8  ;;  %5774 = vset.pattern.permute.xlu0 %v5879_v8 }
 0x2bc   : > { %v2787_v3 = vpop.f32.mrf.mxu2  ;;  %v2881_v55 = vpop.f32.mrf.mxu3  ;;  %219 = vperm.xlu1 %5772, %v5792_v46   ;;  %5773 = vset.pattern.permute.xlu2 %v5879_v8  ;;  %v10325_v46 = vand.u32 4294901760, %v8406_v62 }
 0x2bd   : > { %v2788_v51 = vadd.f32 %v2787_v3, %v8376_v58 }
 0x2bf   : > { %v8626_v15 = vadd.f32 %v2877_v54, %v2788_v51  ;;  %v8628_v24 = vpop.f32.mrf.mxu0  ;;  %v8630_v42 = vpop.f32.mrf.mxu1  ;;  %v5793_v51 = vld [vmem:[%s5958_s28 + $0x10] sm:$0xff] }
 0x2c0   : > { %225 = vperm.xlu0 %5774, %v5793_v51   ;;  %v5797_v51 = vld [vmem:[%s5958_s28 + $0x20] sm:$0xff] }
 0x2c1   : > { %10322 = vst [vmem:[#allocation108_spill] sm:$0xff] %v8626_v15  ;;  %3373 = vmatmul.f32.gmra.mxu2 %v8350_v23  ;;  %3502 = vmatmul.f32.gmra.mxu3 %v10323_v56  ;;  %v5794_v23 = vld [vmem:[%s5958_s28 + $0x8] sm:$0xff] }
 0x2c2   : > { %3629 = vmatmul.f32.gmra.mxu0 %v10321_v61  ;;  %3730 = vmatmul.f32.gmra.mxu1 %v8278_v17 }
 0x2c3   : > { %222 = vperm.xlu2 %5773, %v5794_v23  }
 0x2c4   : > { %v2791_v58 = vpop.f32.mrf.mxu2  ;;  %v2885_v54 = vpop.f32.mrf.mxu3 }
 0x2c5   : > { %v2792_v3 = vadd.f32 %v2791_v58, %v8403_v33  ;;  %v5795_v58 = vld [vmem:[%s5958_s28 + $0x18] sm:$0xff] }
 0x2c6   : > { %228 = vperm.xlu1 %5772, %v5795_v58   ;;  %v5798_v58 = vld [vmem:[%s5958_s28 + $0x28] sm:$0xff] }
 0x2c7   : > { %v8641_v61 = vadd.f32 %v2881_v55, %v2792_v3  ;;  %v8643_v56 = vpop.f32.mrf.mxu0  ;;  %v8645_v31 = vpop.f32.mrf.mxu1  ;;  %v5796_v3 = vld [vmem:[%s5958_s28 + $0x38] sm:$0xff] }
 0x2c8   : > { %240 = vperm.xlu0 %5774, %v5796_v3   ;;  %v5800_v3 = vld [vmem:[%s5958_s28 + $0x30] sm:$0xff] }
 0x2c9   : > { %10324 = vst [vmem:[#allocation66_spill] sm:$0xff] %v8641_v61  ;;  %3378 = vmatmul.f32.gmra.mxu2 %v8379_v16  ;;  %3508 = vmatmul.f32.gmra.mxu3 %v10325_v46  ;;  %v10327_v46 = vand.u32 4294901760, %v8437_v7 }
 0x2ca   : > { %3633 = vmatmul.f32.gmra.mxu0 %v8278_v17  ;;  %3734 = vmatmul.f32.gmra.mxu1 %v8330_v52 }
 0x2cb   : > { %231 = vperm.xlu2 %5773, %v5797_v51  }
 0x2cc   : > { %v2795_v33 = vpop.f32.mrf.mxu2  ;;  %v2889_v8 = vpop.f32.mrf.mxu3 }
 0x2cd   : > { %v2796_v55 = vadd.f32 %v2795_v33, %v8434_v6 }
 0x2ce   : > { %234 = vperm.xlu1 %5772, %v5798_v58   ;;  %v5802_v58 = vld [vmem:[%s5958_s28 + $0x68] sm:$0xff] }
 0x2cf   : > { %v8656_v16 = vadd.f32 %v2885_v54, %v2796_v55  ;;  %v8658_v23 = vpop.f32.mrf.mxu0  ;;  %v8660_v17 = vpop.f32.mrf.mxu1  ;;  %v5799_v55 = vld [vmem:[%s5958_s28 + $0x50] sm:$0xff] }
 0x2d0   : > { %249 = vperm.xlu0 %5774, %v5799_v55  }
 0x2d1   : > { %10326 = vst [vmem:[#allocation64_spill] sm:$0xff] %v8656_v16  ;;  %3383 = vmatmul.f32.gmra.mxu2 %v8406_v62  ;;  %3514 = vmatmul.f32.gmra.mxu3 %v10327_v46 }
 0x2d2   : > { %3637 = vmatmul.f32.gmra.mxu0 %v8330_v52  ;;  %3738 = vmatmul.f32.gmra.mxu1 %v8363_v19 }
 0x2d3   : > { %237 = vperm.xlu2 %5773, %v5800_v3  }
 0x2d4   : > { %v2799_v6 = vpop.f32.mrf.mxu2  ;;  %v2893_v33 = vpop.f32.mrf.mxu3 }
 0x2d5   : > { %v2800_v54 = vadd.f32 %v2799_v6, %v8461_v30  ;;  %v5801_v6 = vld [vmem:[%s5958_s28 + $0x40] sm:$0xff] }
 0x2d6   : > { %243 = vperm.xlu1 %5772, %v5801_v6   ;;  %v10331_v6 = vand.u32 4294901760, %v8480_v53 }
 0x2d7   : > { %v8671_v62 = vadd.f32 %v2889_v8, %v2800_v54  ;;  %v8673_v51 = vpop.f32.mrf.mxu0  ;;  %v8675_v52 = vpop.f32.mrf.mxu1  ;;  %v5803_v54 = vld [vmem:[%s5958_s28 + $0x48] sm:$0xff] }
 0x2d8   : > { %258 = vperm.xlu0 %5774, %v5802_v58  }
 0x2d9   : > { %10328 = vst [vmem:[#allocation120_spill] sm:$0xff] %v8671_v62  ;;  %3388 = vmatmul.f32.gmra.mxu2 %v8437_v7  ;;  %3520 = vmatmul.f32.gmra.mxu3 %v3094_v40 }
 0x2da   : > { %3641 = vmatmul.f32.gmra.mxu0 %v8363_v19  ;;  %3742 = vmatmul.f32.gmra.mxu1 %v8390_v21  ;;  %v10330_v19 = vld [vmem:[#allocation25_spill] sm:$0xff] }
 0x2db   : > { %246 = vperm.xlu2 %5773, %v5803_v54   ;;  %v1307_v3 = vmul.f32 0.5, %v10330_v19  ;;  %v5805_v54 = vld [vmem:[%s5958_s28 + $0x60] sm:$0xff]  ;;  %v10332_v19 = vmov 6  }
 0x2dc   : > { %v2803_v30 = vpop.f32.mrf.mxu2  ;;  %v2897_v46 = vpop.f32.mrf.mxu3 }
 0x2dd   : > { %v2804_v8 = vadd.f32 %v2803_v30, %v8477_v63  ;;  %v2909_v63 = vsel %vm1338_vm12, %v1307_v3, 0 }
 0x2df   : > { %v8686_v7 = vadd.f32 %v2893_v33, %v2804_v8  ;;  %v8688_v55 = vpop.f32.mrf.mxu0  ;;  %v8690_v40 = vpop.f32.mrf.mxu1  ;;  %v5804_v8 = vld [vmem:[%s5958_s28 + $0x58] sm:$0xff] }
 0x2e0   : > { %252 = vperm.xlu1 %5772, %v5804_v8   ;;  %5775 = vset.pattern.permute.xlu0 %v10332_v19  ;;  %v5806_v19 = vld [vmem:[%s5958_s28 + $0x70] sm:$0xff] }
 0x2e1   : > { %10329 = vst [vmem:[#allocation114_spill] sm:$0xff] %v8686_v7  ;;  %3393 = vmatmul.f32.gmra.mxu2 %v8467_v10  ;;  %3526 = vmatmul.f32.gmra.mxu3 %v10331_v6  ;;  %v8703_v10 = vand.u32 4294901760, %v2909_v63  ;;  %v10333_v6 = vld [vmem:[#allocation46_spill] sm:$0xff] }
 0x2e2   : > { %3645 = vmatmul.f32.gmra.mxu0 %v8390_v21  ;;  %3746 = vmatmul.f32.gmra.mxu1 %v8421_v27  ;;  %v1309_v7 = vmul.f32 0.5, %v10333_v6 }
 0x2e3   : > { %255 = vperm.xlu2 %5773, %v5805_v54  }
 0x2e4   : > { %v2807_v30 = vpop.f32.mrf.mxu2  ;;  %v2901_v33 = vpop.f32.mrf.mxu3  ;;  %v2912_v8 = vsel %vm1338_vm12, %v1309_v7, 0 }
 0x2e5   : > { %v2808_v58 = vadd.f32 %v2807_v30, %v8493_v22  ;;  %v10335_v22 = vand.u32 4294901760, %v8497_v9  ;;  %v214_v30 = vld [vmem:[%s9645_s2 + $0x8] sm:$0xff] }
 0x2e7   : > { %v8706_v21 = vadd.f32 %v2897_v46, %v2808_v58  ;;  %v8708_v62 = vpop.f32.mrf.mxu0  ;;  %v8710_v3 = vpop.f32.mrf.mxu1  ;;  %v8721_v46 = vsub.f32 %v2909_v63, %v8703_v10  ;;  %v8724_v58 = vand.u32 4294901760, %v214_v30 }
 0x2e8   : > { %261 = vperm.xlu1 %5772, %v5806_v19  }
 0x2e9   : > { %10334 = vst [vmem:[#allocation122_spill] sm:$0xff] %v8706_v21  ;;  %3398 = vmatmul.f32.gmra.mxu2 %v8480_v53  ;;  %3532 = vmatmul.f32.gmra.mxu3 %v10335_v22  ;;  %v5807_v22 = vld [vmem:[%s5958_s28 + $0x78] sm:$0xff]  ;;  %v8733_v21 = vand.u32 4294901760, %v2912_v8  ;;  %v3789_v63 = vand.u32 4294901760, %v8721_v46 }
 0x2ea   : > { %3649 = vmatmul.f32.gmra.mxu0 %v8421_v27  ;;  %3750 = vmatmul.f32.gmra.mxu1 %v8453_v49  ;;  %v8730_v27 = vsub.f32 %v214_v30, %v8724_v58 }
 0x2eb   : > { %4622 = vmatpush.msra.mxu0 %v8724_v58  ;;  %264 = vperm.xlu2 %5773, %v5807_v22   ;;  %10336 = vst [vmem:[#allocation121_spill] sm:$0xff] %v8733_v21  ;;  %v8750_v22 = vsub.f32 %v2912_v8, %v8733_v21 }
 0x2ec   : > { %v2811_v54 = vpop.f32.mrf.mxu2  ;;  %v2905_v53 = vpop.f32.mrf.mxu3  ;;  %v9881_v19 = vand.u32 4294901760, %v8730_v27 }
 0x2ed   : > { %v2812_v6 = vadd.f32 %v2811_v54, %v8510_v25  ;;  %v10338_v25 = vld [vmem:[#allocation40_spill] sm:$0xff] }
 0x2ee   : > { %v1311_v54 = vmul.f32 0.5, %v10338_v25  ;;  %v4771_v30 = vsub.f32 %v8730_v27, %v9881_v19  ;;  %v3797_v19 = vand.u32 4294901760, %v8750_v22 }
 0x2ef   : > { %v8736_v7 = vadd.f32 %v2901_v33, %v2812_v6  ;;  %v8738_v16 = vpop.f32.mrf.mxu0  ;;  %v8740_v61 = vpop.f32.mrf.mxu1  ;;  %v3790_v33 = vsub.f32 %v8721_v46, %v3789_v63 }
 0x2f0   : > { %v4772_v6 = vand.u32 4294901760, %v4771_v30 }
 0x2f1   : > { %10337 = vst [vmem:[#allocation73_spill] sm:$0xff] %v8736_v7  ;;  %3403 = vmatmul.f32.gmra.mxu2 %v8497_v9  ;;  %3978 = vmatmul.f32.vlgmr.msrb.gmra.mxu3 %v8703_v10  ;;  %v2915_v9 = vsel %vm1338_vm12, %v1311_v54, 0  ;;  %v3791_v30 = vand.u32 4294901760, %v3790_v33 }
 0x2f2   : > { %3653 = vmatmul.f32.gmra.mxu0 %v8453_v49  ;;  %3754 = vmatmul.f32.gmra.mxu1 %v8471_v28  ;;  %v8759_v8 = vand.u32 4294901760, %v2915_v9 }
 0x2f3   : > { %4961 = vmatpush.msrb.mxu3 %v8724_v58  ;;  %4773 = vmatpush.msra.mxu1 %v4772_v6 }
 0x2f4   : > { %v2815_v25 = vpop.f32.mrf.mxu2  ;;  %v3443_v7 = vpop.f32.mrf.mxu3  ;;  %10339 = vst [vmem:[#allocation16_spill] sm:$0xff] %v8759_v8  ;;  %v8773_v54 = vsub.f32 %v2915_v9, %v8759_v8 }
 0x2f5   : > { %v2816_v15 = vadd.f32 %v2815_v25, %v8530_v26  ;;  %v3798_v26 = vsub.f32 %v8750_v22, %v3797_v19 }
 0x2f6   : > { %v3805_v57 = vand.u32 4294901760, %v8773_v54 }
 0x2f7   : > { %v8761_v37 = vadd.f32 %v2905_v53, %v2816_v15  ;;  %v8763_v49 = vpop.f32.mrf.mxu0  ;;  %v8765_v5 = vpop.f32.mrf.mxu1  ;;  %v3216_v15 = vadd.f32 %v8522_v41, %v8539_v47  ;;  %v2918_v53 = vsel %vm1338_vm12, %v1313_v14, 0  ;;  %v3799_v25 = vand.u32 4294901760, %v3798_v26 }
 0x2f8   : > { %v3220_v14 = vadd.f32 %v8541_v60, %v8555_v29  ;;  %v3806_v26 = vsub.f32 %v8773_v54, %v3805_v57 }
 0x2f9   : > { %10340 = vst [vmem:[#allocation123_spill] sm:$0xff] %v8761_v37  ;;  %3792 = vmatmul.f32.vlgmr.msrb.gmra.mxu2 %v3791_v30  ;;  %3982 = vmatmul.f32.gmra.mxu3 %v8733_v21  ;;  %v8779_v30 = vand.u32 4294901760, %v2918_v53 }
 0x2fa   : > { %3657 = vmatmul.f32.gmra.mxu0 %v8471_v28  ;;  %3758 = vmatmul.f32.gmra.mxu1 %v8486_v12  ;;  %v10342_v28 = vld [vmem:[#allocation7_spill] sm:$0xff]  ;;  %v3807_v11 = vand.u32 4294901760, %v3806_v26 }
 0x2fb   : > { %4861 = vmatpush.msrb.mxu2 %v8730_v27  ;;  %v1315_v37 = vmul.f32 0.5, %v10342_v28  ;;  %v8788_v41 = vsub.f32 %v2918_v53, %v8779_v30  ;;  %v10343_v53 = vld [vmem:[#allocation6_spill] sm:$0xff] }
 0x2fc   : > { %v3329_v44 = vpop.f32.mrf.mxu2  ;;  %v3449_v33 = vpop.f32.mrf.mxu3 }
 0x2fd   : > { %v3330_v6 = vadd.f32 %v3329_v44, %v3216_v15  ;;  %v2921_v47 = vsel %vm1338_vm12, %v1315_v37, 0  ;;  %v3224_v37 = vadd.f32 %v8557_v32, %v8568_v18 }
 0x2ff   : > { %v8782_v43 = vpop.f32.mrf.mxu0  ;;  %v3699_v50 = vpop.f32.mrf.mxu1  ;;  %v3444_v9 = vadd.f32 %v3443_v7, %v3330_v6  ;;  %v8794_v6 = vand.u32 4294901760, %v2921_v47 }
 0x301   : > { %3800 = vmatmul.f32.gmra.mxu2 %v3799_v25  ;;  %3986 = vmatmul.f32.gmra.mxu3 %v8759_v8  ;;  %v1317_v8 = vmul.f32 0.5, %v10343_v53  ;;  %v8800_v60 = vsub.f32 %v2921_v47, %v8794_v6 }
 0x302   : > { %3661 = vmatmul.f32.gmra.mxu0 %v8486_v12  ;;  %4185 = vmatmul.f32.vlgmr.msrb.gmra.mxu1 %v3789_v63  ;;  %v3813_v63 = vand.u32 4294901760, %v8788_v41 }
 0x304   : > { %v3334_v15 = vpop.f32.mrf.mxu2  ;;  %v3455_v7 = vpop.f32.mrf.mxu3 }
 0x305   : > { %v3335_v44 = vadd.f32 %v3334_v15, %v3220_v14  ;;  %v2924_v14 = vsel %vm1338_vm12, %v1317_v8, 0  ;;  %v3821_v15 = vand.u32 4294901760, %v8800_v60 }
 0x307   : > { %v3602_v25 = vpop.f32.mrf.mxu0  ;;  %v3703_v28 = vpop.f32.mrf.mxu1  ;;  %v3450_v12 = vadd.f32 %v3449_v33, %v3335_v44  ;;  %v3814_v33 = vsub.f32 %v8788_v41, %v3813_v63  ;;  %v8810_v44 = vand.u32 4294901760, %v2924_v14  ;;  %v3822_v32 = vsub.f32 %v8800_v60, %v3821_v15 }
 0x308   : > { %v3603_v21 = vadd.f32 %v3602_v25, %v3444_v9 }
 0x309   : > { %3808 = vmatmul.f32.gmra.mxu2 %v3807_v11  ;;  %3990 = vmatmul.f32.gmra.mxu3 %v8779_v30  ;;  %v8819_v8 = vsub.f32 %v2924_v14, %v8810_v44 }
 0x30a   : > { %4078 = vmatmul.f32.vlgmr.msrb.gmra.mxu0 %v8721_v46  ;;  %4191 = vmatmul.f32.gmra.mxu1 %v3797_v19  ;;  %v8803_v29 = vadd.f32 %v3699_v50, %v3603_v21  ;;  %v3815_v46 = vand.u32 4294901760, %v3814_v33  ;;  %v10344_v50 = vld [vmem:[#allocation10_spill] sm:$0xff] }
 0x30b   : > { %v1319_v21 = vmul.f32 0.5, %v10344_v50 }
 0x30c   : > { %v3339_v26 = vpop.f32.mrf.mxu2  ;;  %v3461_v9 = vpop.f32.mrf.mxu3 }
 0x30d   : > { %v3340_v11 = vadd.f32 %v3339_v26, %v3224_v37  ;;  %v3228_v37 = vadd.f32 %v8570_v4, %v8580_v13 }
 0x30f   : > { %v3606_v47 = vpop.f32.mrf.mxu0  ;;  %v3707_v25 = vpop.f32.mrf.mxu1  ;;  %v3456_v19 = vadd.f32 %v3455_v7, %v3340_v11  ;;  %v2927_v7 = vsel %vm1338_vm12, %v1319_v21, 0  ;;  %v3823_v11 = vand.u32 4294901760, %v3822_v32  ;;  %v3232_v32 = vadd.f32 %v8582_v2, %v8592_v39 }
 0x310   : > { %v3607_v53 = vadd.f32 %v3606_v47, %v3450_v12  ;;  %v8824_v47 = vand.u32 4294901760, %v2927_v7 }
 0x311   : > { %3816 = vmatmul.f32.gmra.mxu2 %v3815_v46  ;;  %3994 = vmatmul.f32.gmra.mxu3 %v8794_v6 }
 0x312   : > { %4083 = vmatmul.f32.gmra.mxu0 %v8750_v22  ;;  %4197 = vmatmul.f32.gmra.mxu1 %v3805_v57  ;;  %v8816_v18 = vadd.f32 %v3703_v28, %v3607_v53  ;;  %v10345_v22 = vld [vmem:[#allocation14_spill] sm:$0xff]  ;;  %v3829_v53 = vand.u32 4294901760, %v8819_v8  ;;  %v8833_v13 = vsub.f32 %v2927_v7, %v8824_v47  ;;  %v10347_v7 = vld [vmem:[#allocation20_spill] sm:$0xff] }
 0x313   : > { %v1321_v57 = vmul.f32 0.5, %v10345_v22 }
 0x314   : > { %v3344_v33 = vpop.f32.mrf.mxu2  ;;  %v3467_v12 = vpop.f32.mrf.mxu3  ;;  %v3837_v22 = vand.u32 4294901760, %v8833_v13 }
 0x315   : > { %v3345_v26 = vadd.f32 %v3344_v33, %v3228_v37  ;;  %v2930_v21 = vsel %vm1338_vm12, %v1321_v57, 0  ;;  %v3236_v57 = vadd.f32 %v8594_v45, %v8604_v59  ;;  %v213_v59 = vld [vmem:[%s9645_s2] sm:$0xff] }
 0x317   : > { %v3610_v46 = vpop.f32.mrf.mxu0  ;;  %v3711_v50 = vpop.f32.mrf.mxu1  ;;  %v3462_v28 = vadd.f32 %v3461_v9, %v3345_v26  ;;  %v3830_v9 = vsub.f32 %v8819_v8, %v3829_v53  ;;  %v8839_v26 = vand.u32 4294901760, %v2930_v21 }
 0x318   : > { %v3611_v14 = vadd.f32 %v3610_v46, %v3456_v19  ;;  %v1323_v46 = vmul.f32 0.5, %v10347_v7 }
 0x319   : > { %3824 = vmatmul.f32.gmra.mxu2 %v3823_v11  ;;  %3998 = vmatmul.f32.gmra.mxu3 %v8810_v44  ;;  %10346 = vst [vmem:[#allocation26_spill] sm:$0xff] %v8839_v26  ;;  %v8846_v2 = vsub.f32 %v2930_v21, %v8839_v26 }
 0x31a   : > { %4088 = vmatmul.f32.gmra.mxu0 %v8773_v54  ;;  %4203 = vmatmul.f32.gmra.mxu1 %v3813_v63  ;;  %v8830_v4 = vadd.f32 %v3707_v25, %v3611_v14  ;;  %v3831_v63 = vand.u32 4294901760, %v3830_v9 }
 0x31c   : > { %v3349_v37 = vpop.f32.mrf.mxu2  ;;  %v3473_v19 = vpop.f32.mrf.mxu3 }
 0x31d   : > { %v3350_v33 = vadd.f32 %v3349_v37, %v3232_v32  ;;  %v2933_v32 = vsel %vm1338_vm12, %v1323_v46, 0 }
 0x31f   : > { %v3614_v11 = vpop.f32.mrf.mxu0  ;;  %v3715_v54 = vpop.f32.mrf.mxu1  ;;  %v3468_v25 = vadd.f32 %v3467_v12, %v3350_v33  ;;  %v3838_v12 = vsub.f32 %v8833_v13, %v3837_v22  ;;  %v9886_v33 = vand.u32 4294901760, %v8846_v2 }
 0x320   : > { %v3615_v14 = vadd.f32 %v3614_v11, %v3462_v28  ;;  %v8855_v11 = vand.u32 4294901760, %v2933_v32 }
 0x321   : > { %3832 = vmatmul.f32.gmra.mxu2 %v3831_v63  ;;  %4002 = vmatmul.f32.gmra.mxu3 %v8824_v47  ;;  %v3839_v21 = vand.u32 4294901760, %v3838_v12  ;;  %v3846_v45 = vsub.f32 %v8846_v2, %v9886_v33 }
 0x322   : > { %4093 = vmatmul.f32.gmra.mxu0 %v8788_v41  ;;  %4209 = vmatmul.f32.gmra.mxu1 %v3821_v15  ;;  %v8848_v39 = vadd.f32 %v3711_v50, %v3615_v14  ;;  %v10348_v50 = vld [vmem:[#allocation59_spill] sm:$0xff] }
 0x323   : > { %v1325_v7 = vmul.f32 0.5, %v10348_v50 }
 0x324   : > { %v3354_v9 = vpop.f32.mrf.mxu2  ;;  %v3479_v28 = vpop.f32.mrf.mxu3 }
 0x325   : > { %v3355_v37 = vadd.f32 %v3354_v9, %v3236_v57  ;;  %v4623_v57 = vand.u32 4294901760, %v213_v59 }
 0x327   : > { %v3618_v41 = vpop.f32.mrf.mxu0  ;;  %v3719_v15 = vpop.f32.mrf.mxu1  ;;  %v3474_v63 = vadd.f32 %v3473_v19, %v3355_v37  ;;  %v8869_v19 = vsub.f32 %v2933_v32, %v8855_v11  ;;  %4624 = vmatpush.msra.mxu0 %v4623_v57  ;;  %v4775_v37 = vsub.f32 %v213_v59, %v4623_v57  ;;  %4963 = vmatpush.msrb.mxu3 %v4623_v57 }
 0x328   : > { %v3619_v14 = vadd.f32 %v3618_v41, %v3468_v25  ;;  %v3240_v25 = vadd.f32 %v8606_v35, %v8616_v20  ;;  %v3847_v41 = vand.u32 4294901760, %v3846_v45 }
 0x329   : > { %3840 = vmatmul.f32.gmra.mxu2 %v3839_v21  ;;  %4006 = vmatmul.f32.gmra.mxu3 %v8839_v26  ;;  %v10349_v21 = vand.u32 4294901760, %v8730_v27  ;;  %v3853_v35 = vand.u32 4294901760, %v8869_v19  ;;  %v4776_v20 = vand.u32 4294901760, %v4775_v37 }
 0x32a   : > { %4098 = vmatmul.f32.gmra.mxu0 %v8800_v60  ;;  %4215 = vmatmul.f32.gmra.mxu1 %v3829_v53  ;;  %v8866_v46 = vadd.f32 %v3715_v54, %v3619_v14  ;;  %v2936_v60 = vsel %vm1338_vm12, %v1325_v7, 0  ;;  %v10350_v7 = vld [vmem:[#allocation58_spill] sm:$0xff] }
 0x32b   : > { %5078 = vmatpush.msrb.mxu0 %v10349_v21  ;;  %v8876_v54 = vand.u32 4294901760, %v2936_v60  ;;  %4864 = vmatpush.msrb.mxu2 %v4775_v37  ;;  %v1327_v33 = vmul.f32 0.5, %v10350_v7  ;;  %v4777_v59 = vsub.f32 %v4775_v37, %v4776_v20 }
 0x32c   : > { %v3359_v53 = vpop.f32.mrf.mxu2  ;;  %v3485_v12 = vpop.f32.mrf.mxu3 }
 0x32d   : > { %v3360_v9 = vadd.f32 %v3359_v53, %v3240_v25  ;;  %v8885_v45 = vsub.f32 %v2936_v60, %v8876_v54  ;;  %v3854_v25 = vsub.f32 %v8869_v19, %v3853_v35  ;;  %v4778_v53 = vand.u32 4294901760, %v4777_v59  ;;  %5082 = vmatpush.msrb.mxu0 %v4776_v20 }
 0x32f   : > { %v3622_v32 = vpop.f32.mrf.mxu0  ;;  %v3723_v50 = vpop.f32.mrf.mxu1  ;;  %v3480_v14 = vadd.f32 %v3479_v28, %v3360_v9  ;;  %v3244_v28 = vadd.f32 %v8618_v34, %v8628_v24  ;;  %4779 = vmatpush.msra.mxu1 %v4778_v53  ;;  %v3861_v34 = vand.u32 4294901760, %v8885_v45  ;;  %v10351_v24 = vld [vmem:[#allocation35_spill] sm:$0xff] }
 0x330   : > { %v3623_v26 = vadd.f32 %v3622_v32, %v3474_v63  ;;  %v2939_v63 = vsel %vm1338_vm12, %v1327_v33, 0  ;;  %v1329_v21 = vmul.f32 0.5, %v10351_v24  ;;  %v10352_v33 = vand.u32 4294901760, %v8846_v2 }
 0x331   : > { %3848 = vmatmul.f32.gmra.mxu2 %v3847_v41  ;;  %4010 = vmatmul.f32.gmra.mxu3 %v8855_v11  ;;  %v3862_v7 = vsub.f32 %v8885_v45, %v3861_v34  ;;  %v3252_v24 = vadd.f32 %v8645_v31, %v8658_v23  ;;  %v10354_v23 = vld [vmem:[#allocation101_spill] sm:$0xff] }
 0x332   : > { %4103 = vmatmul.f32.gmra.mxu0 %v8819_v8  ;;  %4221 = vmatmul.f32.gmra.mxu1 %v3837_v22  ;;  %v8882_v27 = vadd.f32 %v3719_v15, %v3623_v26  ;;  %v8892_v8 = vand.u32 4294901760, %v2939_v63  ;;  %v3855_v15 = vand.u32 4294901760, %v3854_v25 }
 0x333   : > { %5163 = vmatpush.msrb.mxu1 %v8724_v58 }
 0x334   : > { %v3364_v9 = vpop.f32.mrf.mxu2  ;;  %v3491_v41 = vpop.f32.mrf.mxu3  ;;  %v8903_v20 = vsub.f32 %v2939_v63, %v8892_v8  ;;  %v10353_v63 = vld [vmem:[#allocation60_spill] sm:$0xff] }
 0x335   : > { %v3365_v37 = vadd.f32 %v3364_v9, %v3244_v28  ;;  %5165 = vmatpush.msrb.mxu1 %v4623_v57  ;;  %v2942_v57 = vsel %vm1338_vm12, %v1329_v21, 0  ;;  %v3863_v9 = vand.u32 4294901760, %v3862_v7 }
 0x336   : > { %v8909_v25 = vand.u32 4294901760, %v2942_v57 }
 0x337   : > { %v3626_v26 = vpop.f32.mrf.mxu0  ;;  %v3727_v22 = vpop.f32.mrf.mxu1  ;;  %v3486_v60 = vadd.f32 %v3485_v12, %v3365_v37  ;;  %v3248_v12 = vadd.f32 %v8630_v42, %v8643_v56  ;;  %v3869_v37 = vand.u32 4294901760, %v8903_v20 }
 0x338   : > { %v3627_v32 = vadd.f32 %v3626_v26, %v3480_v14  ;;  %v1331_v26 = vmul.f32 0.5, %v10353_v63  ;;  %v8918_v56 = vsub.f32 %v2942_v57, %v8909_v25  ;;  %v1333_v57 = vmul.f32 0.5, %v10354_v23 }
 0x339   : > { %3856 = vmatmul.f32.gmra.mxu2 %v3855_v15  ;;  %4014 = vmatmul.f32.gmra.mxu3 %v8876_v54 }
 0x33a   : > { %4108 = vmatmul.f32.gmra.mxu0 %v8833_v13  ;;  %4227 = vmatmul.f32.gmra.mxu1 %v10352_v33  ;;  %v8900_v58 = vadd.f32 %v3723_v50, %v3627_v32  ;;  %v2945_v21 = vsel %vm1338_vm12, %v1331_v26, 0  ;;  %v3877_v31 = vand.u32 4294901760, %v8918_v56 }
 0x33c   : > { %v3369_v14 = vpop.f32.mrf.mxu2  ;;  %v3497_v59 = vpop.f32.mrf.mxu3 }
 0x33d   : > { %v3370_v28 = vadd.f32 %v3369_v14, %v3248_v12 }
 0x33f   : > { %v3630_v13 = vpop.f32.mrf.mxu0  ;;  %v3731_v53 = vpop.f32.mrf.mxu1  ;;  %v3492_v50 = vadd.f32 %v3491_v41, %v3370_v28  ;;  %v3870_v41 = vsub.f32 %v8903_v20, %v3869_v37  ;;  %v5459_v28 = vsel %vm713_vm5, 1.0, %v9960_v38 }
 0x340   : > { %v3631_v15 = vadd.f32 %v3630_v13, %v3486_v60  ;;  %v5491_v13 = vsel %vm857_vm6, 1.0, %v9960_v38 }
 0x341   : > { %3864 = vmatmul.f32.gmra.mxu2 %v3863_v9  ;;  %4018 = vmatmul.f32.gmra.mxu3 %v8892_v8  ;;  %v3871_v12 = vand.u32 4294901760, %v3870_v41  ;;  %v3878_v9 = vsub.f32 %v8918_v56, %v3877_v31  ;;  %v953_v63 = vadd.f32 %v5491_v13, %v5459_v28 }
 0x342   : > { %4113 = vmatmul.f32.gmra.mxu0 %v8846_v2  ;;  %4233 = vmatmul.f32.gmra.mxu1 %v3853_v35  ;;  %v8915_v42 = vadd.f32 %v3727_v22, %v3631_v15  ;;  %v8928_v2 = vand.u32 4294901760, %v2945_v21 }
 0x344   : > { %v3374_v32 = vpop.f32.mrf.mxu2  ;;  %v3503_v60 = vpop.f32.mrf.mxu3  ;;  %v8941_v0 = vsub.f32 %v2945_v21, %v8928_v2  ;;  %v3879_v21 = vand.u32 4294901760, %v3878_v9 }
 0x345   : > { %v3375_v33 = vadd.f32 %v3374_v32, %v3252_v24 }
 0x347   : > { %v3634_v35 = vpop.f32.mrf.mxu0  ;;  %v3735_v22 = vpop.f32.mrf.mxu1  ;;  %v3498_v7 = vadd.f32 %v3497_v59, %v3375_v33  ;;  %v3256_v59 = vadd.f32 %v8660_v17, %v8673_v51  ;;  %v3885_v17 = vand.u32 4294901760, %v8941_v0  ;;  %v10356_v51 = vld [vmem:[#allocation48_spill] sm:$0xff] }
 0x348   : > { %v3635_v14 = vadd.f32 %v3634_v35, %v3492_v50  ;;  %v2948_v50 = vsel %vm1338_vm12, %v1333_v57, 0  ;;  %v1335_v33 = vmul.f32 0.5, %v10356_v51  ;;  %v1129_v35 = vadd.f32 %v5523_v1, %v953_v63 }
 0x349   : > { %3872 = vmatmul.f32.gmra.mxu2 %v3871_v12  ;;  %4022 = vmatmul.f32.gmra.mxu3 %v8909_v25 }
 0x34a   : > { %4118 = vmatmul.f32.gmra.mxu0 %v8869_v19  ;;  %4239 = vmatmul.f32.gmra.mxu1 %v3861_v34  ;;  %v8938_v36 = vadd.f32 %v3731_v53, %v3635_v14  ;;  %v10355_v19 = vld [vmem:[#allocation51_spill] sm:$0xff]  ;;  %v8950_v34 = vand.u32 4294901760, %v2948_v50  ;;  %v3886_v14 = vsub.f32 %v8941_v0, %v3885_v17 }
 0x34b   : > { %vm1209_vm8 = vcmp.eq.s32.totalorder %v6305_v48, %v10355_v19  ;;  %v3264_v19 = vadd.f32 %v8690_v40, %v8708_v62 }
 0x34c   : > { %v3379_v26 = vpop.f32.mrf.mxu2  ;;  %v3509_v15 = vpop.f32.mrf.mxu3  ;;  %v5555_v23 = vsel %vm1209_vm8, 1.0, %v9960_v38  ;;  %v8960_v57 = vsub.f32 %v2948_v50, %v8950_v34 }
 0x34d   : > { %v3380_v24 = vadd.f32 %v3379_v26, %v3256_v59  ;;  %v1305_v28 = vadd.f32 %v5555_v23, %v1129_v35 }
 0x34e   : > { %v3893_v50 = vand.u32 4294901760, %v8960_v57 }
 0x34f   : > { %v3638_v53 = vpop.f32.mrf.mxu0  ;;  %v3739_v41 = vpop.f32.mrf.mxu1  ;;  %v3504_v32 = vadd.f32 %v3503_v60, %v3380_v24  ;;  %v3260_v60 = vadd.f32 %v8675_v52, %v8688_v55  ;;  %v1337_v1 = vmul.f32 0.5, %v1305_v28 }
 0x350   : > { %v3639_v12 = vadd.f32 %v3638_v53, %v3498_v7  ;;  %v2951_v7 = vsel %vm1338_vm12, %v1335_v33, 0 }
 0x351   : > { %3880 = vmatmul.f32.gmra.mxu2 %v3879_v21  ;;  %4026 = vmatmul.f32.gmra.mxu3 %v8928_v2  ;;  %v8966_v63 = vand.u32 4294901760, %v2951_v7  ;;  %v2954_v53 = vsel %vm1338_vm12, %v1337_v1, 0 }
 0x352   : > { %4123 = vmatmul.f32.gmra.mxu0 %v8885_v45  ;;  %4245 = vmatmul.f32.gmra.mxu1 %v3869_v37  ;;  %v8957_v48 = vadd.f32 %v3735_v22, %v3639_v12  ;;  %v3887_v22 = vand.u32 4294901760, %v3886_v14  ;;  %v8980_v33 = vand.u32 4294901760, %v2954_v53 }
 0x353   : > { %v8974_v55 = vsub.f32 %v2951_v7, %v8966_v63 }
 0x354   : > { %v3384_v13 = vpop.f32.mrf.mxu2  ;;  %v3515_v59 = vpop.f32.mrf.mxu3  ;;  %v8988_v40 = vsub.f32 %v2954_v53, %v8980_v33 }
 0x355   : > { %v3385_v9 = vadd.f32 %v3384_v13, %v3260_v60  ;;  %v3901_v12 = vand.u32 4294901760, %v8974_v55  ;;  %v3268_v60 = vadd.f32 %v8710_v3, %v8738_v16  ;;  %v3272_v16 = vadd.f32 %v8740_v61, %v8763_v49  ;;  %v10357_v49 = vld [vmem:[#allocation55_spill] sm:$0xff] }
 0x356   : > { %v3276_v61 = vadd.f32 %v8765_v5, %v8782_v43  ;;  %v223_v43 = vpop.permute.xlu2 %222 }
 0x357   : > { %v3642_v45 = vpop.f32.mrf.mxu0  ;;  %v3743_v37 = vpop.f32.mrf.mxu1  ;;  %v3510_v26 = vadd.f32 %v3509_v15, %v3385_v9  ;;  %v3894_v15 = vsub.f32 %v8960_v57, %v3893_v50  ;;  %v3902_v14 = vsub.f32 %v8974_v55, %v3901_v12  ;;  %vm267_vm10 = vcmp.eq.s32.totalorder %v10357_v49, %v223_v43 }
 0x358   : > { %v3643_v24 = vadd.f32 %v3642_v45, %v3504_v32 }
 0x359   : > { %3888 = vmatmul.f32.gmra.mxu2 %v3887_v22  ;;  %4030 = vmatmul.f32.gmra.mxu3 %v8950_v34  ;;  %v3903_v45 = vand.u32 4294901760, %v3902_v14 }
 0x35a   : > { %4128 = vmatmul.f32.gmra.mxu0 %v8903_v20  ;;  %4251 = vmatmul.f32.gmra.mxu1 %v3877_v31  ;;  %v8971_v52 = vadd.f32 %v3739_v41, %v3643_v24  ;;  %v3895_v31 = vand.u32 4294901760, %v3894_v15 }
 0x35c   : > { %v3389_v21 = vpop.f32.mrf.mxu2  ;;  %v3521_v32 = vpop.f32.mrf.mxu3 }
 0x35d   : > { %v3390_v51 = vadd.f32 %v3389_v21, %v3264_v19 }
 0x35f   : > { %v3646_v35 = vpop.f32.mrf.mxu0  ;;  %v3747_v20 = vpop.f32.mrf.mxu1  ;;  %v3516_v41 = vadd.f32 %v3515_v59, %v3390_v51 }
 0x360   : > { %v3647_v23 = vadd.f32 %v3646_v35, %v3510_v26 }
 0x361   : > { %3896 = vmatmul.f32.gmra.mxu2 %v3895_v31  ;;  %4034 = vmatmul.f32.gmra.mxu3 %v8966_v63 }
 0x362   : > { %4133 = vmatmul.f32.gmra.mxu0 %v8918_v56  ;;  %4257 = vmatmul.f32.gmra.mxu1 %v3885_v17  ;;  %v8985_v62 = vadd.f32 %v3743_v37, %v3647_v23  ;;  %v3909_v56 = vand.u32 4294901760, %v8988_v40 }
 0x364   : > { %v3394_v7 = vpop.f32.mrf.mxu2  ;;  %v3527_v28 = vpop.f32.mrf.mxu3  ;;  %v3910_v3 = vsub.f32 %v8988_v40, %v3909_v56 }
 0x365   : > { %v3395_v13 = vadd.f32 %v3394_v7, %v3268_v60 }
 0x366   : > { %v3911_v53 = vand.u32 4294901760, %v3910_v3  ;;  %v226_v3 = vpop.permute.xlu0 %225 }
 0x367   : > { %v3650_v59 = vpop.f32.mrf.mxu0  ;;  %v3751_v9 = vpop.f32.mrf.mxu1  ;;  %v3522_v22 = vadd.f32 %v3521_v32, %v3395_v13  ;;  %vm268_vm11 = vcmp.eq.s32.totalorder %v10357_v49, %v226_v3 }
 0x368   : > { %v3651_v17 = vadd.f32 %v3650_v59, %v3516_v41 }
 0x369   : > { %3904 = vmatmul.f32.gmra.mxu2 %v3903_v45  ;;  %4038 = vmatmul.f32.gmra.mxu3 %v8980_v33 }
 0x36a   : > { %4138 = vmatmul.f32.gmra.mxu0 %v8941_v0  ;;  %4263 = vmatmul.f32.gmra.mxu1 %v3893_v50  ;;  %v8996_v37 = vadd.f32 %v3747_v20, %v3651_v17  ;;  %v220_v0 = vpop.permute.xlu1 %219 }
 0x36b   : > { %vm266_vm12 = vcmp.eq.s32.totalorder %v10357_v49, %v220_v0 }
 0x36c   : > { %v3399_v26 = vpop.f32.mrf.mxu2  ;;  %v3533_v1 = vpop.f32.mrf.mxu3  ;;  %v9009_v31 = vsel %vm266_vm12, 1.0, %v9960_v38 }
 0x36d   : > { %v3400_v24 = vadd.f32 %v3399_v26, %v3272_v16  ;;  %v10359_v16 = vld [vmem:[#allocation16_spill] sm:$0xff] }
 0x36f   : > { %v3654_v19 = vpop.f32.mrf.mxu0  ;;  %v3755_v15 = vpop.f32.mrf.mxu1  ;;  %v3528_v21 = vadd.f32 %v3527_v28, %v3400_v24 }
 0x370   : > { %v3655_v32 = vadd.f32 %v3654_v19, %v3522_v22 }
 0x371   : > { %3912 = vmatmul.f32.gmra.mxu2 %v3911_v53  ;;  %4413 = vmatmul.f32.vlgmr.msra.gmra.mxu3 %v8703_v10  ;;  %v9043_v53 = vsel %vm268_vm11, 1.0, %v9960_v38 }
 0x372   : > { %4143 = vmatmul.f32.gmra.mxu0 %v8960_v57  ;;  %4269 = vmatmul.f32.gmra.mxu1 %v3901_v12  ;;  %v9003_v50 = vadd.f32 %v3751_v9, %v3655_v32  ;;  %v4560_v57 = vsel %vm4558_vm9, %v9009_v31, 0  ;;  %v10358_v12 = vld [vmem:[#allocation121_spill] sm:$0xff]  ;;  %v9023_v9 = vsel %vm267_vm10, 1.0, %v9960_v38  ;;  %vm4541_vm10 = vcmask 523264  }
 0x373   : > { %v9019_v7 = vsub.f32 %v4560_v57, %v4560_v57 }
 0x374   : > { %v3404_v51 = vpop.f32.mrf.mxu2  ;;  %v3979_v35 = vpop.f32.mrf.mxu3 }
 0x375   : > { %v3405_v20 = vadd.f32 %v3404_v51, %v3276_v61  ;;  %v9900_v17 = vand.u32 4294901760, %v9019_v7 }
 0x377   : > { %v3658_v41 = vpop.f32.mrf.mxu0  ;;  %v3759_v23 = vpop.f32.mrf.mxu1  ;;  %v3534_v60 = vadd.f32 %v3533_v1, %v3405_v20  ;;  %v4628_v26 = vsub.f32 %v9019_v7, %v9900_v17 }
 0x378   : > { %v3659_v14 = vadd.f32 %v3658_v41, %v3528_v21  ;;  %v229_v20 = vpop.permute.xlu1 %228 }
 0x379   : > { %4323 = vmatmul.f32.vlgmr.msra.gmra.mxu2 %v8703_v10  ;;  %4417 = vmatmul.f32.gmra.mxu3 %v10358_v12  ;;  %v4629_v0 = vand.u32 4294901760, %v4628_v26  ;;  %vm269_vm13 = vcmp.eq.s32.totalorder %v10357_v49, %v229_v20 }
 0x37a   : > { %4148 = vmatmul.f32.gmra.mxu0 %v8974_v55  ;;  %4275 = vmatmul.f32.gmra.mxu1 %v3909_v56  ;;  %v9016_v5 = vadd.f32 %v3755_v15, %v3659_v14  ;;  %v4563_v56 = vsel %vm4558_vm9, %v9023_v9, 0 }
 0x37b   : > { %v9039_v1 = vsub.f32 %v4563_v56, %v4563_v56 }
 0x37c   : > { %v3793_v28 = vpop.f32.mrf.mxu2  ;;  %v3983_v13 = vpop.f32.mrf.mxu3 }
 0x37d   : > { %v3794_v59 = vadd.f32 %v3793_v28, %v8803_v29  ;;  %v9898_v51 = vand.u32 4294901760, %v9039_v1 }
 0x37f   : > { %v3662_v10 = vpop.f32.mrf.mxu0  ;;  %v4186_v45 = vpop.f32.mrf.mxu1  ;;  %v3980_v22 = vadd.f32 %v3979_v35, %v3794_v59  ;;  %v4566_v35 = vsel %vm4558_vm9, %v9043_v53, 0  ;;  %v4636_v14 = vsub.f32 %v9039_v1, %v9898_v51 }
 0x380   : > { %v3663_v55 = vadd.f32 %v3662_v10, %v3534_v60  ;;  %v9055_v41 = vsub.f32 %v4566_v35, %v4566_v35  ;;  %v235_v35 = vpop.permute.xlu1 %234 }
 0x381   : > { %4327 = vmatmul.f32.gmra.mxu2 %v10358_v12  ;;  %4421 = vmatmul.f32.gmra.mxu3 %v10359_v16  ;;  %v9062_v12 = vsel %vm269_vm13, 1.0, %v9960_v38  ;;  %v4637_v10 = vand.u32 4294901760, %v4636_v14  ;;  %vm271_vm15 = vcmp.eq.s32.totalorder %v10357_v49, %v235_v35 }
 0x382   : > { %4153 = vmatmul.f32.gmra.mxu0 %v8988_v40  ;;  %5556 = vmatmul.msk.f32.vlgmr.msra.gmra.mxu1 %vm4558_vm9, %v9009_v31  ;;  %v9033_v29 = vadd.f32 %v3759_v23, %v3663_v55  ;;  %v232_v55 = vpop.permute.xlu2 %231 }
 0x383   : > { %vm270_vm14 = vcmp.eq.s32.totalorder %v10357_v49, %v232_v55 }
 0x384   : > { %v3801_v24 = vpop.f32.mrf.mxu2  ;;  %v3987_v19 = vpop.f32.mrf.mxu3 }
 0x385   : > { %v3802_v15 = vadd.f32 %v3801_v24, %v8816_v18  ;;  %v9081_v24 = vsel %vm270_vm14, 1.0, %v9960_v38 }
 0x387   : > { %v4079_v40 = vpop.f32.mrf.mxu0  ;;  %v4192_v21 = vpop.f32.mrf.mxu1  ;;  %v3984_v32 = vadd.f32 %v3983_v13, %v3802_v15 }
 0x388   : > { %v4080_v61 = vadd.f32 %v4079_v40, %v3980_v22  ;;  %v4569_v22 = vsel %vm4558_vm9, %v9062_v12, 0 }
 0x389   : > { %4331 = vmatmul.f32.gmra.mxu2 %v10359_v16  ;;  %4425 = vmatmul.f32.gmra.mxu3 %v8779_v30  ;;  %v9074_v56 = vsub.f32 %v4569_v22, %v4569_v22 }
 0x38a   : > { %4630 = vmatmul.f32.vlgmr.msra.gmra.mxu0 %v4629_v0  ;;  %5557 = vmatmul.msk.f32.gmra.mxu1 %vm4558_vm9, %v9023_v9  ;;  %v9052_v18 = vadd.f32 %v4186_v45, %v4080_v61  ;;  %v9896_v45 = vand.u32 4294901760, %v9055_v41  ;;  %v4572_v61 = vsel %vm4558_vm9, %v9081_v24, 0 }
 0x38b   : > { %v9895_v0 = vand.u32 4294901760, %v9074_v56  ;;  %v9093_v20 = vsub.f32 %v4572_v61, %v4572_v61 }
 0x38c   : > { %v3809_v23 = vpop.f32.mrf.mxu2  ;;  %v3991_v60 = vpop.f32.mrf.mxu3  ;;  %v4644_v26 = vsub.f32 %v9055_v41, %v9896_v45 }
 0x38d   : > { %v3810_v57 = vadd.f32 %v3809_v23, %v8830_v4  ;;  %v4652_v14 = vsub.f32 %v9074_v56, %v9895_v0  ;;  %v9893_v22 = vand.u32 4294901760, %v9093_v20 }
 0x38f   : > { %v4084_v43 = vpop.f32.mrf.mxu0  ;;  %v4198_v28 = vpop.f32.mrf.mxu1  ;;  %v3988_v13 = vadd.f32 %v3987_v19, %v3810_v57  ;;  %v9100_v57 = vsel %vm271_vm15, 1.0, %v9960_v38 }
 0x390   : > { %v4085_v59 = vadd.f32 %v4084_v43, %v3984_v32  ;;  %v4645_v32 = vand.u32 4294901760, %v4644_v26  ;;  %v4575_v55 = vsel %vm4558_vm9, %v9100_v57, 0 }
 0x391   : > { %4335 = vmatmul.f32.gmra.mxu2 %v8779_v30  ;;  %4429 = vmatmul.f32.gmra.mxu3 %v8794_v6 }
 0x392   : > { %4638 = vmatmul.f32.gmra.mxu0 %v4637_v10  ;;  %5558 = vmatmul.msk.f32.gmra.mxu1 %vm4558_vm9, %v9043_v53  ;;  %v9071_v4 = vadd.f32 %v4192_v21, %v4085_v59  ;;  %v4653_v10 = vand.u32 4294901760, %v4652_v14 }
 0x394   : > { %v3817_v16 = vpop.f32.mrf.mxu2  ;;  %v3995_v3 = vpop.f32.mrf.mxu3 }
 0x395   : > { %v3818_v30 = vadd.f32 %v3817_v16, %v8848_v39  ;;  %v238_v16 = vpop.permute.xlu2 %237 }
 0x396   : > { %vm272_vm0 = vcmp.eq.s32.totalorder %v10357_v49, %v238_v16 }
 0x397   : > { %v4089_v19 = vpop.f32.mrf.mxu0  ;;  %v4204_v15 = vpop.f32.mrf.mxu1  ;;  %v3992_v40 = vadd.f32 %v3991_v60, %v3818_v30 }
 0x398   : > { %v4090_v21 = vadd.f32 %v4089_v19, %v3988_v13  ;;  %v4660_v19 = vsub.f32 %v9093_v20, %v9893_v22 }
 0x399   : > { %4339 = vmatmul.f32.gmra.mxu2 %v8794_v6  ;;  %4433 = vmatmul.f32.gmra.mxu3 %v8810_v44 }
 0x39a   : > { %4646 = vmatmul.f32.gmra.mxu0 %v4645_v32  ;;  %5559 = vmatmul.msk.f32.gmra.mxu1 %vm4558_vm9, %v9062_v12  ;;  %v9090_v39 = vadd.f32 %v4198_v28, %v4090_v21  ;;  %v4661_v35 = vand.u32 4294901760, %v4660_v19 }
 0x39c   : > { %v3825_v23 = vpop.f32.mrf.mxu2  ;;  %v3999_v60 = vpop.f32.mrf.mxu3 }
 0x39d   : > { %v3826_v6 = vadd.f32 %v3825_v23, %v8866_v46 }
 0x39f   : > { %v4094_v43 = vpop.f32.mrf.mxu0  ;;  %v4210_v13 = vpop.f32.mrf.mxu1  ;;  %v3996_v59 = vadd.f32 %v3995_v3, %v3826_v6  ;;  %v9112_v3 = vsub.f32 %v4575_v55, %v4575_v55  ;;  %v10360_v6 = vld [vmem:[#allocation26_spill] sm:$0xff] }
 0x3a0   : > { %v4095_v28 = vadd.f32 %v4094_v43, %v3992_v40  ;;  %v9119_v40 = vsel %vm272_vm0, 1.0, %v9960_v38  ;;  %v241_v43 = vpop.permute.xlu0 %240 }
 0x3a1   : > { %4343 = vmatmul.f32.gmra.mxu2 %v8810_v44  ;;  %4437 = vmatmul.f32.gmra.mxu3 %v8824_v47  ;;  %v9891_v23 = vand.u32 4294901760, %v9112_v3  ;;  %v4578_v14 = vsel %vm4558_vm9, %v9119_v40, 0  ;;  %vm273_vm1 = vcmp.eq.s32.totalorder %v10357_v49, %v241_v43 }
 0x3a2   : > { %4654 = vmatmul.f32.gmra.mxu0 %v4653_v10  ;;  %5560 = vmatmul.msk.f32.gmra.mxu1 %vm4558_vm9, %v9081_v24  ;;  %v9109_v46 = vadd.f32 %v4204_v15, %v4095_v28  ;;  %v9138_v55 = vsel %vm273_vm1, 1.0, %v9960_v38 }
 0x3a3   : > { %v4668_v10 = vsub.f32 %v9112_v3, %v9891_v23 }
 0x3a4   : > { %v3833_v26 = vpop.f32.mrf.mxu2  ;;  %v4003_v30 = vpop.f32.mrf.mxu3 }
 0x3a5   : > { %v3834_v44 = vadd.f32 %v3833_v26, %v8882_v27 }
 0x3a7   : > { %v4099_v21 = vpop.f32.mrf.mxu0  ;;  %v4216_v32 = vpop.f32.mrf.mxu1  ;;  %v4000_v61 = vadd.f32 %v3999_v60, %v3834_v44  ;;  %v9131_v60 = vsub.f32 %v4578_v14, %v4578_v14  ;;  %v4669_v44 = vand.u32 4294901760, %v4668_v10 }
 0x3a8   : > { %v4100_v15 = vadd.f32 %v4099_v21, %v3996_v59 }
 0x3a9   : > { %4347 = vmatmul.f32.gmra.mxu2 %v8824_v47  ;;  %4441 = vmatmul.f32.gmra.mxu3 %v10360_v6  ;;  %v9889_v21 = vand.u32 4294901760, %v9131_v60 }
 0x3aa   : > { %4662 = vmatmul.f32.gmra.mxu0 %v4661_v35  ;;  %5561 = vmatmul.msk.f32.gmra.mxu1 %vm4558_vm9, %v9100_v57  ;;  %v9128_v27 = vadd.f32 %v4210_v13, %v4100_v15  ;;  %v4581_v15 = vsel %vm4558_vm9, %v9138_v55, 0  ;;  %v244_v35 = vpop.permute.xlu1 %243 }
 0x3ab   : > { %vm274_vm2 = vcmp.eq.s32.totalorder %v10357_v49, %v244_v35  ;;  %v4676_v43 = vsub.f32 %v9131_v60, %v9889_v21  ;;  %v247_v35 = vpop.permute.xlu2 %246 }
 0x3ac   : > { %v3841_v59 = vpop.f32.mrf.mxu2  ;;  %v4007_v28 = vpop.f32.mrf.mxu3  ;;  %vm275_vm3 = vcmp.eq.s32.totalorder %v10357_v49, %v247_v35 }
 0x3ad   : > { %v3842_v47 = vadd.f32 %v3841_v59, %v8900_v58  ;;  %v9157_v59 = vsel %vm274_vm2, 1.0, %v9960_v38 }
 0x3af   : > { %v4104_v16 = vpop.f32.mrf.mxu0  ;;  %v4222_v26 = vpop.f32.mrf.mxu1  ;;  %v4004_v19 = vadd.f32 %v4003_v30, %v3842_v47  ;;  %v9150_v30 = vsub.f32 %v4581_v15, %v4581_v15  ;;  %v4584_v15 = vsel %vm4558_vm9, %v9157_v59, 0 }
 0x3b0   : > { %v4105_v13 = vadd.f32 %v4104_v16, %v4000_v61 }
 0x3b1   : > { %4351 = vmatmul.f32.gmra.mxu2 %v10360_v6  ;;  %4445 = vmatmul.f32.gmra.mxu3 %v8855_v11 }
 0x3b2   : > { %4670 = vmatmul.f32.gmra.mxu0 %v4669_v44  ;;  %5562 = vmatmul.msk.f32.gmra.mxu1 %vm4558_vm9, %v9119_v40  ;;  %v9147_v58 = vadd.f32 %v4216_v32, %v4105_v13  ;;  %v4677_v13 = vand.u32 4294901760, %v4676_v43  ;;  %v9890_v44 = vand.u32 4294901760, %v9150_v30 }
 0x3b4   : > { %v3849_v61 = vpop.f32.mrf.mxu2  ;;  %v4011_v14 = vpop.f32.mrf.mxu3  ;;  %v4684_v43 = vsub.f32 %v9150_v30, %v9890_v44 }
 0x3b5   : > { %v3850_v6 = vadd.f32 %v3849_v61, %v8915_v42  ;;  %v250_v44 = vpop.permute.xlu0 %249 }
 0x3b6   : > { %vm276_vm4 = vcmp.eq.s32.totalorder %v10357_v49, %v250_v44 }
 0x3b7   : > { %v4109_v10 = vpop.f32.mrf.mxu0  ;;  %v4228_v47 = vpop.f32.mrf.mxu1  ;;  %v4008_v16 = vadd.f32 %v4007_v28, %v3850_v6  ;;  %v9169_v28 = vsub.f32 %v4584_v15, %v4584_v15  ;;  %v9176_v6 = vsel %vm275_vm3, 1.0, %v9960_v38 }
 0x3b8   : > { %v4110_v32 = vadd.f32 %v4109_v10, %v4004_v19  ;;  %v4587_v15 = vsel %vm4558_vm9, %v9176_v6, 0 }
 0x3b9   : > { %4355 = vmatmul.f32.gmra.mxu2 %v8855_v11  ;;  %4449 = vmatmul.f32.gmra.mxu3 %v8876_v54  ;;  %v9892_v35 = vand.u32 4294901760, %v9169_v28 }
 0x3ba   : > { %4678 = vmatmul.f32.gmra.mxu0 %v4677_v13  ;;  %5563 = vmatmul.msk.f32.gmra.mxu1 %vm4558_vm9, %v9138_v55  ;;  %v9166_v42 = vadd.f32 %v4222_v26, %v4110_v32  ;;  %v4685_v32 = vand.u32 4294901760, %v4684_v43 }
 0x3bb   : > { %v4692_v43 = vsub.f32 %v9169_v28, %v9892_v35  ;;  %v253_v35 = vpop.permute.xlu1 %252 }
 0x3bc   : > { %v3857_v19 = vpop.f32.mrf.mxu2  ;;  %v4015_v61 = vpop.f32.mrf.mxu3  ;;  %vm277_vm5 = vcmp.eq.s32.totalorder %v10357_v49, %v253_v35 }
 0x3bd   : > { %v3858_v11 = vadd.f32 %v3857_v19, %v8938_v36 }
 0x3bf   : > { %v4114_v10 = vpop.f32.mrf.mxu0  ;;  %v4234_v13 = vpop.f32.mrf.mxu1  ;;  %v4012_v21 = vadd.f32 %v4011_v14, %v3858_v11  ;;  %v9188_v14 = vsub.f32 %v4587_v15, %v4587_v15  ;;  %v9195_v11 = vsel %vm276_vm4, 1.0, %v9960_v38 }
 0x3c0   : > { %v4115_v26 = vadd.f32 %v4114_v10, %v4008_v16  ;;  %v4590_v15 = vsel %vm4558_vm9, %v9195_v11, 0 }
 0x3c1   : > { %4359 = vmatmul.f32.gmra.mxu2 %v8876_v54  ;;  %4453 = vmatmul.f32.gmra.mxu3 %v8892_v8  ;;  %v9894_v44 = vand.u32 4294901760, %v9188_v14 }
 0x3c2   : > { %4686 = vmatmul.f32.gmra.mxu0 %v4685_v32  ;;  %5564 = vmatmul.msk.f32.gmra.mxu1 %vm4558_vm9, %v9157_v59  ;;  %v9185_v36 = vadd.f32 %v4228_v47, %v4115_v26  ;;  %v4693_v26 = vand.u32 4294901760, %v4692_v43 }
 0x3c3   : > { %v4700_v43 = vsub.f32 %v9188_v14, %v9894_v44  ;;  %v256_v44 = vpop.permute.xlu2 %255 }
 0x3c4   : > { %v3865_v16 = vpop.f32.mrf.mxu2  ;;  %v4019_v19 = vpop.f32.mrf.mxu3  ;;  %vm278_vm6 = vcmp.eq.s32.totalorder %v10357_v49, %v256_v44 }
 0x3c5   : > { %v3866_v54 = vadd.f32 %v3865_v16, %v8957_v48 }
 0x3c7   : > { %v4119_v10 = vpop.f32.mrf.mxu0  ;;  %v4240_v32 = vpop.f32.mrf.mxu1  ;;  %v4016_v23 = vadd.f32 %v4015_v61, %v3866_v54  ;;  %v9214_v54 = vsel %vm277_vm5, 1.0, %v9960_v38 }
 0x3c8   : > { %v4120_v47 = vadd.f32 %v4119_v10, %v4012_v21  ;;  %v9207_v21 = vsub.f32 %v4590_v15, %v4590_v15  ;;  %v4593_v15 = vsel %vm4558_vm9, %v9214_v54, 0 }
 0x3c9   : > { %4363 = vmatmul.f32.gmra.mxu2 %v8892_v8  ;;  %4457 = vmatmul.f32.gmra.mxu3 %v8909_v25 }
 0x3ca   : > { %4694 = vmatmul.f32.gmra.mxu0 %v4693_v26  ;;  %5565 = vmatmul.msk.f32.gmra.mxu1 %vm4558_vm9, %v9176_v6  ;;  %v9204_v48 = vadd.f32 %v4234_v13, %v4120_v47  ;;  %v4701_v47 = vand.u32 4294901760, %v4700_v43  ;;  %v9897_v35 = vand.u32 4294901760, %v9207_v21 }
 0x3cc   : > { %v3873_v61 = vpop.f32.mrf.mxu2  ;;  %v4023_v16 = vpop.f32.mrf.mxu3  ;;  %v4708_v43 = vsub.f32 %v9207_v21, %v9897_v35 }
 0x3cd   : > { %v3874_v8 = vadd.f32 %v3873_v61, %v8971_v52 }
 0x3ce   : > { %v4709_v45 = vand.u32 4294901760, %v4708_v43 }
 0x3cf   : > { %v4124_v10 = vpop.f32.mrf.mxu0  ;;  %v4246_v26 = vpop.f32.mrf.mxu1  ;;  %v4020_v22 = vadd.f32 %v4019_v19, %v3874_v8  ;;  %v9233_v8 = vsel %vm278_vm6, 1.0, %v9960_v38 }
 0x3d0   : > { %v4125_v13 = vadd.f32 %v4124_v10, %v4016_v23  ;;  %v9226_v23 = vsub.f32 %v4593_v15, %v4593_v15  ;;  %v4596_v15 = vsel %vm4558_vm9, %v9233_v8, 0 }
 0x3d1   : > { %4367 = vmatmul.f32.gmra.mxu2 %v8909_v25  ;;  %4461 = vmatmul.f32.gmra.mxu3 %v8928_v2 }
 0x3d2   : > { %4702 = vmatmul.f32.gmra.mxu0 %v4701_v47  ;;  %5566 = vmatmul.msk.f32.gmra.mxu1 %vm4558_vm9, %v9195_v11  ;;  %v9223_v52 = vadd.f32 %v4240_v32, %v4125_v13  ;;  %v259_v32 = vpop.permute.xlu0 %258  ;;  %v9899_v44 = vand.u32 4294901760, %v9226_v23 }
 0x3d3   : > { %vm279_vm7 = vcmp.eq.s32.totalorder %v10357_v49, %v259_v32 }
 0x3d4   : > { %v3881_v19 = vpop.f32.mrf.mxu2  ;;  %v4027_v61 = vpop.f32.mrf.mxu3  ;;  %v4716_v43 = vsub.f32 %v9226_v23, %v9899_v44 }
 0x3d5   : > { %v3882_v25 = vadd.f32 %v3881_v19, %v8985_v62 }
 0x3d6   : > { %v4717_v51 = vand.u32 4294901760, %v4716_v43 }
 0x3d7   : > { %v4129_v10 = vpop.f32.mrf.mxu0  ;;  %v4252_v47 = vpop.f32.mrf.mxu1  ;;  %v4024_v0 = vadd.f32 %v4023_v16, %v3882_v25  ;;  %v9245_v16 = vsub.f32 %v4596_v15, %v4596_v15  ;;  %v9252_v25 = vsel %vm279_vm7, 1.0, %v9960_v38 }
 0x3d8   : > { %v4130_v13 = vadd.f32 %v4129_v10, %v4020_v22  ;;  %v4599_v15 = vsel %vm4558_vm9, %v9252_v25, 0 }
 0x3d9   : > { %4371 = vmatmul.f32.gmra.mxu2 %v8928_v2  ;;  %4465 = vmatmul.f32.gmra.mxu3 %v8950_v34  ;;  %v9901_v32 = vand.u32 4294901760, %v9245_v16 }
 0x3da   : > { %4710 = vmatmul.f32.gmra.mxu0 %v4709_v45  ;;  %5567 = vmatmul.msk.f32.gmra.mxu1 %vm4558_vm9, %v9214_v54  ;;  %v9242_v62 = vadd.f32 %v4246_v26, %v4130_v13  ;;  %v262_v26 = vpop.permute.xlu1 %261 }
 0x3db   : > { %vm280_vm8 = vcmp.eq.s32.totalorder %v10357_v49, %v262_v26  ;;  %v4724_v43 = vsub.f32 %v9245_v16, %v9901_v32 }
 0x3dc   : > { %v3889_v22 = vpop.f32.mrf.mxu2  ;;  %v4031_v19 = vpop.f32.mrf.mxu3 }
 0x3dd   : > { %v3890_v2 = vadd.f32 %v3889_v22, %v8996_v37  ;;  %v4725_v17 = vand.u32 4294901760, %v4724_v43 }
 0x3df   : > { %v4134_v45 = vpop.f32.mrf.mxu0  ;;  %v4258_v10 = vpop.f32.mrf.mxu1  ;;  %v4028_v35 = vadd.f32 %v4027_v61, %v3890_v2  ;;  %v9264_v61 = vsub.f32 %v4599_v15, %v4599_v15  ;;  %v9271_v2 = vsel %vm280_vm8, 1.0, %v9960_v38 }
 0x3e0   : > { %v4135_v13 = vadd.f32 %v4134_v45, %v4024_v0  ;;  %v4602_v15 = vsel %vm4558_vm9, %v9271_v2, 0 }
 0x3e1   : > { %4375 = vmatmul.f32.gmra.mxu2 %v8950_v34  ;;  %4469 = vmatmul.f32.gmra.mxu3 %v8966_v63  ;;  %v9902_v26 = vand.u32 4294901760, %v9264_v61 }
 0x3e2   : > { %4718 = vmatmul.f32.gmra.mxu0 %v4717_v51  ;;  %5568 = vmatmul.msk.f32.gmra.mxu1 %vm4558_vm9, %v9233_v8  ;;  %v9261_v37 = vadd.f32 %v4252_v47, %v4135_v13  ;;  %v265_v47 = vpop.permute.xlu2 %264 }
 0x3e3   : > { %vm281_vm12 = vcmp.eq.s32.totalorder %v10357_v49, %v265_v47  ;;  %v4732_v43 = vsub.f32 %v9264_v61, %v9902_v26 }
 0x3e4   : > { %v3897_v0 = vpop.f32.mrf.mxu2  ;;  %v4035_v22 = vpop.f32.mrf.mxu3 }
 0x3e5   : > { %v3898_v34 = vadd.f32 %v3897_v0, %v9003_v50 }
 0x3e7   : > { %v4139_v51 = vpop.f32.mrf.mxu0  ;;  %v4264_v45 = vpop.f32.mrf.mxu1  ;;  %v4032_v44 = vadd.f32 %v4031_v19, %v3898_v34  ;;  %v9283_v19 = vsub.f32 %v4602_v15, %v4602_v15  ;;  %v9290_v34 = vsel %vm281_vm12, 1.0, %v9960_v38  ;;  %v10361_v15 = vand.u32 4294901760, %v9019_v7 }
 0x3e8   : > { %v4140_v13 = vadd.f32 %v4139_v51, %v4028_v35  ;;  %v4605_v47 = vsel %vm4558_vm9, %v9290_v34, 0 }
 0x3e9   : > { %4379 = vmatmul.f32.gmra.mxu2 %v8966_v63  ;;  %4473 = vmatmul.f32.gmra.mxu3 %v8980_v33  ;;  %v4739_v49 = vand.u32 4294901760, %v9283_v19 }
 0x3ea   : > { %4726 = vmatmul.f32.gmra.mxu0 %v4725_v17  ;;  %5569 = vmatmul.msk.f32.gmra.mxu1 %vm4558_vm9, %v9252_v25  ;;  %v9280_v50 = vadd.f32 %v4258_v10, %v4140_v13  ;;  %v4733_v13 = vand.u32 4294901760, %v4732_v43 }
 0x3ec   : > { %v3905_v35 = vpop.f32.mrf.mxu2  ;;  %v4039_v0 = vpop.f32.mrf.mxu3 }
 0x3ed   : > { %v3906_v63 = vadd.f32 %v3905_v35, %v9016_v5  ;;  %v9302_v5 = vsub.f32 %v4605_v47, %v4605_v47  ;;  %v4740_v35 = vsub.f32 %v9283_v19, %v4739_v49 }
 0x3ef   : > { %v4144_v17 = vpop.f32.mrf.mxu0  ;;  %v4270_v51 = vpop.f32.mrf.mxu1  ;;  %v4036_v32 = vadd.f32 %v4035_v22, %v3906_v63  ;;  %v4747_v26 = vand.u32 4294901760, %v9302_v5 }
 0x3f0   : > { %v4145_v10 = vadd.f32 %v4144_v17, %v4032_v44 }
 0x3f1   : > { %4383 = vmatmul.f32.gmra.mxu2 %v8980_v33  ;;  %4967 = vmatmul.f32.vlgmr.msrb.gmra.mxu3 %v10361_v15 }
 0x3f2   : > { %4734 = vmatmul.f32.gmra.mxu0 %v4733_v13  ;;  %5570 = vmatmul.msk.f32.gmra.mxu1 %vm4558_vm9, %v9271_v2  ;;  %v9300_v38 = vadd.f32 %v4264_v45, %v4145_v10  ;;  %v4741_v13 = vand.u32 4294901760, %v4740_v35  ;;  %v10362_v45 = vand.u32 4294901760, %v9039_v1 }
 0x3f4   : > { %v3913_v44 = vpop.f32.mrf.mxu2  ;;  %v4414_v22 = vpop.f32.mrf.mxu3 }
 0x3f5   : > { %v3914_v43 = vadd.f32 %v3913_v44, %v9033_v29 }
 0x3f7   : > { %v4149_v33 = vpop.f32.mrf.mxu0  ;;  %v4276_v63 = vpop.f32.mrf.mxu1  ;;  %v4040_v17 = vadd.f32 %v4039_v0, %v3914_v43 }
 0x3f8   : > { %v4150_v15 = vadd.f32 %v4149_v33, %v4036_v32  ;;  %v4748_v32 = vsub.f32 %v9302_v5, %v4747_v26 }
 0x3f9   : > { %4867 = vmatmul.f32.vlgmr.msrb.gmra.mxu2 %v9019_v7  ;;  %4973 = vmatmul.f32.gmra.mxu3 %v10362_v45 }
 0x3fa   : > { %4742 = vmatmul.f32.gmra.mxu0 %v4741_v13  ;;  %5571 = vmatmul.msk.f32.gmra.mxu1 %vm4558_vm9, %v9290_v34  ;;  %v9314_v10 = vadd.f32 %v4270_v51, %v4150_v15  ;;  %v4749_v33 = vand.u32 4294901760, %v4748_v32  ;;  %v10363_v51 = vand.u32 4294901760, %v9055_v41 }
 0x3fc   : > { %v4324_v47 = vpop.f32.mrf.mxu2  ;;  %v4418_v29 = vpop.f32.mrf.mxu3 }
 0x3fd   : > { %v4325_v0 = vadd.f32 %v4324_v47, %v9052_v18 }
 0x3ff   : > { %v4415_v44 = vadd.f32 %v4414_v22, %v4325_v0  ;;  %v4154_v35 = vpop.f32.mrf.mxu0  ;;  %v9320_v7 = vpop.f32.mrf.mxu1 }
 0x400   : > { %v4155_v43 = vadd.f32 %v4154_v35, %v4040_v17 }
 0x401   : > { %4493 = vrot.lane.b32.xlu0 %v4415_v44, %s5880_s4  ;;  %4872 = vmatmul.f32.gmra.mxu2 %v9039_v1  ;;  %v10364_v1 = vand.u32 4294901760, %v9074_v56 }
 0x402   : > { %4979 = vmatmul.f32.gmra.mxu3 %v10363_v51  ;;  %4750 = vmatmul.f32.gmra.mxu0 %v4749_v33  ;;  %v9326_v15 = vadd.f32 %v4276_v63, %v4155_v43 }
 0x403   : > { %5588 = vmatmul.msk.f32.vlgmr.msrb.gmra.mxu1 %vm4558_vm9, %v9009_v31 }
 0x404   : > { %v4328_v18 = vpop.f32.mrf.mxu2  ;;  %v4422_v22 = vpop.f32.mrf.mxu3 }
 0x405   : > { %v4329_v13 = vadd.f32 %v4328_v18, %v9071_v4 }
 0x407   : > { %v4419_v17 = vadd.f32 %v4418_v29, %v4329_v13  ;;  %v9331_v45 = vpop.f32.mrf.mxu0  ;;  %v9333_v47 = vpop.f32.mrf.mxu1 }
 0x409   : > { %4495 = vrot.lane.b32.xlu1 %v4419_v17, %s5880_s4  ;;  %4877 = vmatmul.f32.gmra.mxu2 %v9055_v41  ;;  %v10365_v41 = vand.u32 4294901760, %v9093_v20 }
 0x40a   : > { %4985 = vmatmul.f32.gmra.mxu3 %v10364_v1  ;;  %5572 = vmatmul.msk.f32.vlgmr.msrb.gmra.mxu0 %vm4558_vm9, %v9009_v31 }
 0x40b   : > { %5589 = vmatmul.msk.f32.gmra.mxu1 %vm4558_vm9, %v9023_v9 }
 0x40c   : > { %v4332_v63 = vpop.f32.mrf.mxu2  ;;  %v4426_v4 = vpop.f32.mrf.mxu3 }
 0x40d   : > { %v4333_v29 = vadd.f32 %v4332_v63, %v9090_v39 }
 0x40f   : > { %v4423_v32 = vadd.f32 %v4422_v22, %v4333_v29  ;;  %v9344_v0 = vpop.f32.mrf.mxu0  ;;  %v9346_v44 = vpop.f32.mrf.mxu1 }
 0x411   : > { %4497 = vrot.lane.b32.xlu2 %v4423_v32, %s5880_s4  ;;  %4882 = vmatmul.f32.gmra.mxu2 %v9074_v56  ;;  %v10366_v56 = vand.u32 4294901760, %v9112_v3 }
 0x412   : > { %4991 = vmatmul.f32.gmra.mxu3 %v10365_v41  ;;  %5573 = vmatmul.msk.f32.gmra.mxu0 %vm4558_vm9, %v9023_v9 }
 0x413   : > { %5590 = vmatmul.msk.f32.gmra.mxu1 %vm4558_vm9, %v9043_v53 }
 0x414   : > { %v4336_v31 = vpop.f32.mrf.mxu2  ;;  %v4430_v39 = vpop.f32.mrf.mxu3 }
 0x415   : > { %v4337_v35 = vadd.f32 %v4336_v31, %v9109_v46 }
 0x417   : > { %v4427_v43 = vadd.f32 %v4426_v4, %v4337_v35  ;;  %v9357_v33 = vpop.f32.mrf.mxu0  ;;  %v9359_v51 = vpop.f32.mrf.mxu1 }
 0x419   : > { %4499 = vrot.lane.b32.xlu0 %v4427_v43, %s5880_s4  ;;  %4887 = vmatmul.f32.gmra.mxu2 %v9093_v20  ;;  %v10367_v20 = vand.u32 4294901760, %v9131_v60 }
 0x41a   : > { %4997 = vmatmul.f32.gmra.mxu3 %v10366_v56  ;;  %5574 = vmatmul.msk.f32.gmra.mxu0 %vm4558_vm9, %v9043_v53 }
 0x41b   : > { %5591 = vmatmul.msk.f32.gmra.mxu1 %vm4558_vm9, %v9062_v12 }
 0x41c   : > { %v4340_v9 = vpop.f32.mrf.mxu2  ;;  %v4434_v46 = vpop.f32.mrf.mxu3 }
 0x41d   : > { %v4341_v18 = vadd.f32 %v4340_v9, %v9128_v27 }
 0x41f   : > { %v4431_v22 = vadd.f32 %v4430_v39, %v4341_v18  ;;  %v9370_v13 = vpop.f32.mrf.mxu0  ;;  %v9372_v17 = vpop.f32.mrf.mxu1 }
 0x421   : > { %4501 = vrot.lane.b32.xlu1 %v4431_v22, %s5880_s4  ;;  %4892 = vmatmul.f32.gmra.mxu2 %v9112_v3  ;;  %v10368_v3 = vand.u32 4294901760, %v9150_v30 }
 0x422   : > { %5003 = vmatmul.f32.gmra.mxu3 %v10367_v20  ;;  %5575 = vmatmul.msk.f32.gmra.mxu0 %vm4558_vm9, %v9062_v12 }
 0x423   : > { %5592 = vmatmul.msk.f32.gmra.mxu1 %vm4558_vm9, %v9081_v24 }
 0x424   : > { %v4344_v53 = vpop.f32.mrf.mxu2  ;;  %v4438_v27 = vpop.f32.mrf.mxu3 }
 0x425   : > { %v4345_v1 = vadd.f32 %v4344_v53, %v9147_v58 }
 0x427   : > { %v4435_v63 = vadd.f32 %v4434_v46, %v4345_v1  ;;  %v9383_v4 = vpop.f32.mrf.mxu0  ;;  %v9385_v29 = vpop.f32.mrf.mxu1 }
 0x429   : > { %4503 = vrot.lane.b32.xlu2 %v4435_v63, %s5880_s4  ;;  %4897 = vmatmul.f32.gmra.mxu2 %v9131_v60  ;;  %v10369_v60 = vand.u32 4294901760, %v9169_v28 }
 0x42a   : > { %5009 = vmatmul.f32.gmra.mxu3 %v10368_v3  ;;  %5576 = vmatmul.msk.f32.gmra.mxu0 %vm4558_vm9, %v9081_v24 }
 0x42b   : > { %5593 = vmatmul.msk.f32.gmra.mxu1 %vm4558_vm9, %v9100_v57 }
 0x42c   : > { %v4348_v12 = vpop.f32.mrf.mxu2  ;;  %v4442_v58 = vpop.f32.mrf.mxu3 }
 0x42d   : > { %v4349_v32 = vadd.f32 %v4348_v12, %v9166_v42 }
 0x42f   : > { %v4439_v41 = vadd.f32 %v4438_v27, %v4349_v32  ;;  %v9396_v31 = vpop.f32.mrf.mxu0  ;;  %v9398_v39 = vpop.f32.mrf.mxu1 }
 0x431   : > { %4505 = vrot.lane.b32.xlu0 %v4439_v41, %s5880_s4  ;;  %4902 = vmatmul.f32.gmra.mxu2 %v9150_v30  ;;  %v10370_v30 = vand.u32 4294901760, %v9188_v14 }
 0x432   : > { %5015 = vmatmul.f32.gmra.mxu3 %v10369_v60  ;;  %5577 = vmatmul.msk.f32.gmra.mxu0 %vm4558_vm9, %v9100_v57 }
 0x433   : > { %5594 = vmatmul.msk.f32.gmra.mxu1 %vm4558_vm9, %v9119_v40 }
 0x434   : > { %v4352_v24 = vpop.f32.mrf.mxu2  ;;  %v4446_v42 = vpop.f32.mrf.mxu3 }
 0x435   : > { %v4353_v35 = vadd.f32 %v4352_v24, %v9185_v36 }
 0x437   : > { %v4443_v43 = vadd.f32 %v4442_v58, %v4353_v35  ;;  %v9409_v56 = vpop.f32.mrf.mxu0  ;;  %v9411_v9 = vpop.f32.mrf.mxu1 }
 0x439   : > { %4507 = vrot.lane.b32.xlu1 %v4443_v43, %s5880_s4  ;;  %4907 = vmatmul.f32.gmra.mxu2 %v9169_v28  ;;  %v10371_v28 = vand.u32 4294901760, %v9207_v21 }
 0x43a   : > { %5021 = vmatmul.f32.gmra.mxu3 %v10370_v30  ;;  %5578 = vmatmul.msk.f32.gmra.mxu0 %vm4558_vm9, %v9119_v40 }
 0x43b   : > { %5595 = vmatmul.msk.f32.gmra.mxu1 %vm4558_vm9, %v9138_v55 }
 0x43c   : > { %v4356_v57 = vpop.f32.mrf.mxu2  ;;  %v4450_v36 = vpop.f32.mrf.mxu3 }
 0x43d   : > { %v4357_v46 = vadd.f32 %v4356_v57, %v9204_v48 }
 0x43f   : > { %v4447_v18 = vadd.f32 %v4446_v42, %v4357_v46  ;;  %v9422_v22 = vpop.f32.mrf.mxu0  ;;  %v9424_v20 = vpop.f32.mrf.mxu1 }
 0x441   : > { %4509 = vrot.lane.b32.xlu2 %v4447_v18, %s5880_s4  ;;  %4912 = vmatmul.f32.gmra.mxu2 %v9188_v14  ;;  %v10372_v14 = vand.u32 4294901760, %v9226_v23 }
 0x442   : > { %5027 = vmatmul.f32.gmra.mxu3 %v10371_v28  ;;  %5579 = vmatmul.msk.f32.gmra.mxu0 %vm4558_vm9, %v9138_v55 }
 0x443   : > { %5596 = vmatmul.msk.f32.gmra.mxu1 %vm4558_vm9, %v9157_v59 }
 0x444   : > { %v4360_v40 = vpop.f32.mrf.mxu2  ;;  %v4454_v48 = vpop.f32.mrf.mxu3 }
 0x445   : > { %v4361_v53 = vadd.f32 %v4360_v40, %v9223_v52 }
 0x447   : > { %v4451_v27 = vadd.f32 %v4450_v36, %v4361_v53  ;;  %v9435_v1 = vpop.f32.mrf.mxu0  ;;  %v9437_v63 = vpop.f32.mrf.mxu1 }
 0x449   : > { %4511 = vrot.lane.b32.xlu0 %v4451_v27, %s5880_s4  ;;  %4917 = vmatmul.f32.gmra.mxu2 %v9207_v21  ;;  %v10373_v21 = vand.u32 4294901760, %v9245_v16 }
 0x44a   : > { %5033 = vmatmul.f32.gmra.mxu3 %v10372_v14  ;;  %5580 = vmatmul.msk.f32.gmra.mxu0 %vm4558_vm9, %v9157_v59  ;;  %v10375_v14 = vld [vmem:[#allocation52_spill] sm:$0xff] }
 0x44b   : > { %5597 = vmatmul.msk.f32.gmra.mxu1 %vm4558_vm9, %v9176_v6 }
 0x44c   : > { %v4364_v55 = vpop.f32.mrf.mxu2  ;;  %v4458_v52 = vpop.f32.mrf.mxu3 }
 0x44d   : > { %v4365_v3 = vadd.f32 %v4364_v55, %v9242_v62 }
 0x44f   : > { %v4455_v12 = vadd.f32 %v4454_v48, %v4365_v3  ;;  %v9448_v58 = vpop.f32.mrf.mxu0  ;;  %v9450_v32 = vpop.f32.mrf.mxu1 }
 0x451   : > { %4513 = vrot.lane.b32.xlu1 %v4455_v12, %s5880_s4  ;;  %4922 = vmatmul.f32.gmra.mxu2 %v9226_v23  ;;  %v10374_v23 = vand.u32 4294901760, %v9264_v61 }
 0x452   : > { %5039 = vmatmul.f32.gmra.mxu3 %v10373_v21  ;;  %5581 = vmatmul.msk.f32.gmra.mxu0 %vm4558_vm9, %v9176_v6 }
 0x453   : > { %5598 = vmatmul.msk.f32.gmra.mxu1 %vm4558_vm9, %v9195_v11 }
 0x454   : > { %v4368_v59 = vpop.f32.mrf.mxu2  ;;  %v4462_v62 = vpop.f32.mrf.mxu3 }
 0x455   : > { %v4369_v41 = vadd.f32 %v4368_v59, %v9261_v37  ;;  %v10376_v59 = vld [vmem:[#allocation53_spill] sm:$0xff] }
 0x457   : > { %v4459_v60 = vadd.f32 %v4458_v52, %v4369_v41  ;;  %v9461_v24 = vpop.f32.mrf.mxu0  ;;  %v9463_v42 = vpop.f32.mrf.mxu1 }
 0x459   : > { %4515 = vrot.lane.b32.xlu2 %v4459_v60, %s5880_s4  ;;  %4927 = vmatmul.f32.gmra.mxu2 %v9245_v16 }
 0x45a   : > { %5045 = vmatmul.f32.gmra.mxu3 %v10374_v23  ;;  %5582 = vmatmul.msk.f32.gmra.mxu0 %vm4558_vm9, %v9195_v11 }
 0x45b   : > { %5599 = vmatmul.msk.f32.gmra.mxu1 %vm4558_vm9, %v9214_v54 }
 0x45c   : > { %v4372_v6 = vpop.f32.mrf.mxu2  ;;  %v4466_v37 = vpop.f32.mrf.mxu3 }
 0x45d   : > { %v4373_v35 = vadd.f32 %v4372_v6, %v9280_v50 }
 0x45f   : > { %v4463_v43 = vadd.f32 %v4462_v62, %v4373_v35  ;;  %v9474_v30 = vpop.f32.mrf.mxu0  ;;  %v9476_v57 = vpop.f32.mrf.mxu1 }
 0x461   : > { %4517 = vrot.lane.b32.xlu0 %v4463_v43, %s5880_s4  ;;  %4932 = vmatmul.f32.gmra.mxu2 %v9264_v61 }
 0x462   : > { %5051 = vmatmul.f32.gmra.mxu3 %v4739_v49  ;;  %5583 = vmatmul.msk.f32.gmra.mxu0 %vm4558_vm9, %v9214_v54 }
 0x463   : > { %5600 = vmatmul.msk.f32.gmra.mxu1 %vm4558_vm9, %v9233_v8 }
 0x464   : > { %v4376_v11 = vpop.f32.mrf.mxu2  ;;  %v4470_v16 = vpop.f32.mrf.mxu3 }
 0x465   : > { %v4377_v50 = vadd.f32 %v4376_v11, %v9300_v38  ;;  %v10377_v11 = vld [vmem:[#allocation42_spill] sm:$0xff] }
 0x467   : > { %v4467_v36 = vadd.f32 %v4466_v37, %v4377_v50  ;;  %v9487_v46 = vpop.f32.mrf.mxu0  ;;  %v9489_v18 = vpop.f32.mrf.mxu1 }
 0x469   : > { %4519 = vrot.lane.b32.xlu1 %v4467_v36, %s5880_s4  ;;  %4937 = vmatmul.f32.gmra.mxu2 %v9283_v19 }
 0x46a   : > { %5057 = vmatmul.f32.gmra.mxu3 %v4747_v26  ;;  %5584 = vmatmul.msk.f32.gmra.mxu0 %vm4558_vm9, %v9233_v8 }
 0x46b   : > { %5601 = vmatmul.msk.f32.gmra.mxu1 %vm4558_vm9, %v9252_v25  ;;  %v4498_v23 = vpop.permute.xlu2 %4497 }
 0x46c   : > { %v4380_v54 = vpop.f32.mrf.mxu2  ;;  %v4474_v61 = vpop.f32.mrf.mxu3 }
 0x46d   : > { %v4381_v49 = vadd.f32 %v4380_v54, %v9314_v10 }
 0x46f   : > { %v4471_v38 = vadd.f32 %v4470_v16, %v4381_v49  ;;  %v9500_v28 = vpop.f32.mrf.mxu0  ;;  %v9502_v40 = vpop.f32.mrf.mxu1  ;;  %v4544_v16 = vsel %vm4541_vm10, %v10377_v11, %v4498_v23 }
 0x471   : > { %4521 = vrot.lane.b32.xlu2 %v4471_v38, %s5880_s4  ;;  %4942 = vmatmul.f32.gmra.mxu2 %v9302_v5 }
 0x472   : > { %5585 = vmatmul.msk.f32.gmra.mxu0 %vm4558_vm9, %v9252_v25 }
 0x473   : > { %5602 = vmatmul.msk.f32.gmra.mxu1 %vm4558_vm9, %v9271_v2  ;;  %v4494_v10 = vpop.permute.xlu0 %4493 }
 0x474   : > { %v4384_v8 = vpop.f32.mrf.mxu2  ;;  %v4968_v26 = vpop.f32.mrf.mxu3  ;;  %v4542_v5 = vsel %vm4541_vm10, %v10375_v14, %v4494_v10  ;;  %v10378_v10 = vld [vmem:[#allocation63_spill] sm:$0xff] }
 0x475   : > { %v4385_v19 = vadd.f32 %v4384_v8, %v9326_v15  ;;  %v4632_v25 = vadd.f32 %v9331_v45, %v4542_v5 }
 0x477   : > { %v4475_v48 = vadd.f32 %v4474_v61, %v4385_v19  ;;  %v9511_v53 = vpop.f32.mrf.mxu0  ;;  %v9513_v27 = vpop.f32.mrf.mxu1  ;;  %v4783_v12 = vadd.f32 %v9320_v7, %v4632_v25 }
 0x479   : > { %4523 = vrot.lane.b32.xlu0 %v4475_v48, %s5880_s4 }
 0x47a   : > { %5586 = vmatmul.msk.f32.gmra.mxu0 %vm4558_vm9, %v9271_v2 }
 0x47b   : > { %5603 = vmatmul.msk.f32.gmra.mxu1 %vm4558_vm9, %v9290_v34  ;;  %v4496_v52 = vpop.permute.xlu1 %4495 }
 0x47c   : > { %v4868_v15 = vpop.f32.mrf.mxu2  ;;  %v4974_v55 = vpop.f32.mrf.mxu3  ;;  %v4543_v62 = vsel %vm4541_vm10, %v10376_v59, %v4496_v52 }
 0x47d   : > { %v4869_v41 = vadd.f32 %v4868_v15, %v4783_v12  ;;  %v4640_v2 = vadd.f32 %v9344_v0, %v4543_v62 }
 0x47f   : > { %v9523_v3 = vpop.f32.mrf.mxu0  ;;  %v4969_v6 = vadd.f32 %v4968_v26, %v4869_v41  ;;  %v4787_v35 = vadd.f32 %v9333_v47, %v4640_v2  ;;  %v10379_v41 = vld [vmem:[#allocation106_spill] sm:$0xff] }
 0x480   : > { %v5168_v21 = vpop.f32.mrf.mxu1 }
 0x482   : > { %5587 = vmatmul.msk.f32.gmra.mxu0 %vm4558_vm9, %v9290_v34  ;;  %v4648_v34 = vadd.f32 %v9357_v33, %v4544_v16 }
 0x484   : > { %v4873_v60 = vpop.f32.mrf.mxu2  ;;  %v4791_v8 = vadd.f32 %v9346_v44, %v4648_v34 }
 0x485   : > { %v4980_v45 = vpop.f32.mrf.mxu3  ;;  %v4874_v50 = vadd.f32 %v4873_v60, %v4787_v35 }
 0x487   : > { %v5085_v37 = vpop.f32.mrf.mxu0  ;;  %v4975_v49 = vadd.f32 %v4974_v55, %v4874_v50  ;;  %v10380_v50 = vld [vmem:[#allocation102_spill] sm:$0xff] }
 0x488   : > { %v5086_v7 = vadd.f32 %v5085_v37, %v4969_v6  ;;  %v5172_v43 = vpop.f32.mrf.mxu1 }
 0x48a   : > { %v5169_v36 = vadd.f32 %v5168_v21, %v5086_v7  ;;  %v4504_v7 = vpop.permute.xlu2 %4503 }
 0x48b   : > { %v4500_v47 = vpop.permute.xlu0 %4499 }
 0x48c   : > { %v5231_v0 = vmul.f32 0.33333334, %v5169_v36  ;;  %v4878_v54 = vpop.f32.mrf.mxu2  ;;  %v4545_v48 = vsel %vm4541_vm10, %v10378_v10, %v4500_v47  ;;  %v4547_v36 = vsel %vm4541_vm10, %v10380_v50, %v4504_v7  ;;  %v10381_v10 = vld [vmem:[#allocation61_spill] sm:$0xff] }
 0x48d   : > { %v4986_v61 = vpop.f32.mrf.mxu3  ;;  %v4879_v14 = vadd.f32 %v4878_v54, %v4791_v8  ;;  %v4656_v5 = vadd.f32 %v9370_v13, %v4545_v48  ;;  %v4672_v54 = vadd.f32 %v9396_v31, %v4547_v36 }
 0x48e   : > { %5247 = vst [vmem:[%s9538_s7] sm:$0xff] %v5231_v0 }
 0x48f   : > { %v5089_v38 = vpop.f32.mrf.mxu0  ;;  %v4981_v21 = vadd.f32 %v4980_v45, %v4879_v14  ;;  %v4795_v59 = vadd.f32 %v9359_v51, %v4656_v5 }
 0x490   : > { %v5090_v26 = vadd.f32 %v5089_v38, %v4975_v49  ;;  %v5176_v19 = vpop.f32.mrf.mxu1 }
 0x492   : > { %v5173_v33 = vadd.f32 %v5172_v43, %v5090_v26  ;;  %v4803_v26 = vadd.f32 %v9385_v29, %v4672_v54 }
 0x493   : > { %v4502_v12 = vpop.permute.xlu1 %4501 }
 0x494   : > { %v5232_v25 = vmul.f32 0.33333334, %v5173_v33  ;;  %v4883_v15 = vpop.f32.mrf.mxu2  ;;  %v4546_v2 = vsel %vm4541_vm10, %v10379_v41, %v4502_v12 }
 0x495   : > { %v4992_v52 = vpop.f32.mrf.mxu3  ;;  %v4884_v60 = vadd.f32 %v4883_v15, %v4795_v59  ;;  %v4664_v6 = vadd.f32 %v9383_v4, %v4546_v2 }
 0x496   : > { %5248 = vst [vmem:[%s9538_s7 + $0x8] sm:$0xff] %v5232_v25 }
 0x497   : > { %v5093_v55 = vpop.f32.mrf.mxu0  ;;  %v4987_v43 = vadd.f32 %v4986_v61, %v4884_v60  ;;  %v4799_v11 = vadd.f32 %v9372_v17, %v4664_v6 }
 0x498   : > { %v5094_v44 = vadd.f32 %v5093_v55, %v4981_v21  ;;  %v5180_v62 = vpop.f32.mrf.mxu1 }
 0x49a   : > { %v5177_v23 = vadd.f32 %v5176_v19, %v5094_v44  ;;  %v10382_v44 = vld [vmem:[#allocation113_spill] sm:$0xff] }
 0x49b   : > { %v4510_v6 = vpop.permute.xlu2 %4509 }
 0x49c   : > { %v5233_v13 = vmul.f32 0.33333334, %v5177_v23  ;;  %v4888_v37 = vpop.f32.mrf.mxu2 }
 0x49d   : > { %v4998_v35 = vpop.f32.mrf.mxu3  ;;  %v4889_v34 = vadd.f32 %v4888_v37, %v4799_v11 }
 0x49e   : > { %5249 = vst [vmem:[%s9538_s7 + $0x10] sm:$0xff] %v5233_v13 }
 0x49f   : > { %v5097_v45 = vpop.f32.mrf.mxu0  ;;  %v4993_v8 = vadd.f32 %v4992_v52, %v4889_v34 }
 0x4a0   : > { %v5098_v51 = vadd.f32 %v5097_v45, %v4987_v43  ;;  %v5184_v16 = vpop.f32.mrf.mxu1  ;;  %v10383_v45 = vld [vmem:[#allocation108_spill] sm:$0xff] }
 0x4a1   : > { %v4550_v11 = vsel %vm4541_vm10, %v10383_v45, %v4510_v6 }
 0x4a2   : > { %v5181_v0 = vadd.f32 %v5180_v62, %v5098_v51  ;;  %v4696_v50 = vadd.f32 %v9435_v1, %v4550_v11  ;;  %v10387_v11 = vld [vmem:[#allocation114_spill] sm:$0xff] }
 0x4a3   : > { %v4506_v38 = vpop.permute.xlu0 %4505 }
 0x4a4   : > { %v5234_v4 = vmul.f32 0.33333334, %v5181_v0  ;;  %v4893_v47 = vpop.f32.mrf.mxu2  ;;  %v4548_v48 = vsel %vm4541_vm10, %v10381_v10, %v4506_v38 }
 0x4a5   : > { %v5004_v49 = vpop.f32.mrf.mxu3  ;;  %v4894_v14 = vadd.f32 %v4893_v47, %v4803_v26  ;;  %v4680_v5 = vadd.f32 %v9409_v56, %v4548_v48 }
 0x4a6   : > { %5250 = vst [vmem:[%s9538_s7 + $0x18] sm:$0xff] %v5234_v4  ;;  %v4815_v4 = vadd.f32 %v9424_v20, %v4696_v50 }
 0x4a7   : > { %v5101_v61 = vpop.f32.mrf.mxu0  ;;  %v4999_v21 = vadd.f32 %v4998_v35, %v4894_v14  ;;  %v4807_v55 = vadd.f32 %v9398_v39, %v4680_v5 }
 0x4a8   : > { %v5102_v17 = vadd.f32 %v5101_v61, %v4993_v8  ;;  %v5188_v19 = vpop.f32.mrf.mxu1 }
 0x4aa   : > { %v5185_v33 = vadd.f32 %v5184_v16, %v5102_v17 }
 0x4ab   : > { %v4508_v12 = vpop.permute.xlu1 %4507 }
 0x4ac   : > { %v5235_v31 = vmul.f32 0.33333334, %v5185_v33  ;;  %v4898_v25 = vpop.f32.mrf.mxu2  ;;  %v4549_v62 = vsel %vm4541_vm10, %v10382_v44, %v4508_v12 }
 0x4ad   : > { %v5010_v15 = vpop.f32.mrf.mxu3  ;;  %v4899_v41 = vadd.f32 %v4898_v25, %v4807_v55  ;;  %v4688_v60 = vadd.f32 %v9422_v22, %v4549_v62 }
 0x4ae   : > { %5251 = vst [vmem:[%s9538_s7 + $0x20] sm:$0xff] %v5235_v31  ;;  %v10385_v31 = vld [vmem:[#allocation64_spill] sm:$0xff] }
 0x4af   : > { %v5105_v52 = vpop.f32.mrf.mxu0  ;;  %v5005_v13 = vadd.f32 %v5004_v49, %v4899_v41  ;;  %v4811_v7 = vadd.f32 %v9411_v9, %v4688_v60  ;;  %v10384_v49 = vld [vmem:[#allocation66_spill] sm:$0xff] }
 0x4b0   : > { %v5106_v29 = vadd.f32 %v5105_v52, %v4999_v21  ;;  %v5192_v59 = vpop.f32.mrf.mxu1 }
 0x4b2   : > { %v5189_v2 = vadd.f32 %v5188_v19, %v5106_v29 }
 0x4b3   : > { %v4516_v29 = vpop.permute.xlu2 %4515 }
 0x4b4   : > { %v5236_v56 = vmul.f32 0.33333334, %v5189_v2  ;;  %v4903_v23 = vpop.f32.mrf.mxu2  ;;  %v10386_v2 = vld [vmem:[#allocation120_spill] sm:$0xff] }
 0x4b5   : > { %v5016_v37 = vpop.f32.mrf.mxu3  ;;  %v4904_v51 = vadd.f32 %v4903_v23, %v4811_v7  ;;  %v4553_v60 = vsel %vm4541_vm10, %v10386_v2, %v4516_v29  ;;  %v10390_v29 = vld [vmem:[#allocation123_spill] sm:$0xff] }
 0x4b6   : > { %5252 = vst [vmem:[%s9538_s7 + $0x28] sm:$0xff] %v5236_v56  ;;  %v4720_v6 = vadd.f32 %v9474_v30, %v4553_v60 }
 0x4b7   : > { %v5109_v35 = vpop.f32.mrf.mxu0  ;;  %v5011_v0 = vadd.f32 %v5010_v15, %v4904_v51 }
 0x4b8   : > { %v5110_v39 = vadd.f32 %v5109_v35, %v5005_v13  ;;  %v5196_v43 = vpop.f32.mrf.mxu1 }
 0x4ba   : > { %v5193_v16 = vadd.f32 %v5192_v59, %v5110_v39 }
 0x4bb   : > { %v4512_v34 = vpop.permute.xlu0 %4511 }
 0x4bc   : > { %v5237_v22 = vmul.f32 0.33333334, %v5193_v16  ;;  %v4908_v36 = vpop.f32.mrf.mxu2  ;;  %v4551_v38 = vsel %vm4541_vm10, %v10384_v49, %v4512_v34 }
 0x4bd   : > { %v5022_v8 = vpop.f32.mrf.mxu3  ;;  %v4909_v61 = vadd.f32 %v4908_v36, %v4815_v4  ;;  %v4704_v17 = vadd.f32 %v9448_v58, %v4551_v38 }
 0x4be   : > { %5253 = vst [vmem:[%s9538_s7 + $0x30] sm:$0xff] %v5237_v22 }
 0x4bf   : > { %v5113_v54 = vpop.f32.mrf.mxu0  ;;  %v5017_v48 = vadd.f32 %v5016_v37, %v4909_v61  ;;  %v4819_v33 = vadd.f32 %v9437_v63, %v4704_v17 }
 0x4c0   : > { %v5114_v47 = vadd.f32 %v5113_v54, %v5011_v0  ;;  %v5200_v9 = vpop.f32.mrf.mxu1 }
 0x4c2   : > { %v5197_v26 = vadd.f32 %v5196_v43, %v5114_v47  ;;  %v4827_v43 = vadd.f32 %v9463_v42, %v4720_v6 }
 0x4c3   : > { %v4514_v10 = vpop.permute.xlu1 %4513 }
 0x4c4   : > { %v5238_v1 = vmul.f32 0.33333334, %v5197_v26  ;;  %v4913_v19 = vpop.f32.mrf.mxu2  ;;  %v4552_v25 = vsel %vm4541_vm10, %v10385_v31, %v4514_v10 }
 0x4c5   : > { %v4914_v15 = vadd.f32 %v4913_v19, %v4819_v33  ;;  %v5028_v21 = vpop.f32.mrf.mxu3  ;;  %v4712_v52 = vadd.f32 %v9461_v24, %v4552_v25 }
 0x4c6   : > { %5254 = vst [vmem:[%s9538_s7 + $0x38] sm:$0xff] %v5238_v1 }
 0x4c7   : > { %v5117_v14 = vpop.f32.mrf.mxu0  ;;  %v5023_v59 = vadd.f32 %v5022_v8, %v4914_v15  ;;  %v4823_v62 = vadd.f32 %v9450_v32, %v4712_v52 }
 0x4c8   : > { %v5118_v20 = vadd.f32 %v5117_v14, %v5017_v48  ;;  %v5204_v5 = vpop.f32.mrf.mxu1 }
 0x4ca   : > { %v5201_v12 = vadd.f32 %v5200_v9, %v5118_v20  ;;  %v10388_v9 = vld [vmem:[#allocation122_spill] sm:$0xff] }
 0x4cb   : > { %v4522_v1 = vpop.permute.xlu2 %4521 }
 0x4cc   : > { %v5239_v58 = vmul.f32 0.33333334, %v5201_v12  ;;  %v4918_v55 = vpop.f32.mrf.mxu2 }
 0x4cd   : > { %v4919_v56 = vadd.f32 %v4918_v55, %v4823_v62  ;;  %v5034_v37 = vpop.f32.mrf.mxu3 }
 0x4ce   : > { %5255 = vst [vmem:[%s9538_s7 + $0x40] sm:$0xff] %v5239_v58 }
 0x4cf   : > { %v5121_v44 = vpop.f32.mrf.mxu0  ;;  %v5029_v7 = vadd.f32 %v5028_v21, %v4919_v56 }
 0x4d0   : > { %v5122_v63 = vadd.f32 %v5121_v44, %v5023_v59  ;;  %v5208_v41 = vpop.f32.mrf.mxu1 }
 0x4d2   : > { %v5205_v23 = vadd.f32 %v5204_v5, %v5122_v63 }
 0x4d3   : > { %v4518_v35 = vpop.permute.xlu0 %4517 }
 0x4d4   : > { %v5240_v13 = vmul.f32 0.33333334, %v5205_v23  ;;  %v4923_v24 = vpop.f32.mrf.mxu2  ;;  %v4554_v51 = vsel %vm4541_vm10, %v10387_v11, %v4518_v35 }
 0x4d5   : > { %v4924_v16 = vadd.f32 %v4923_v24, %v4827_v43  ;;  %v4728_v22 = vadd.f32 %v9487_v46, %v4554_v51  ;;  %v5040_v54 = vpop.f32.mrf.mxu3 }
 0x4d6   : > { %5256 = vst [vmem:[%s9538_s7 + $0x48] sm:$0xff] %v5240_v13 }
 0x4d7   : > { %v5125_v39 = vpop.f32.mrf.mxu0  ;;  %v5035_v0 = vadd.f32 %v5034_v37, %v4924_v16  ;;  %v4831_v47 = vadd.f32 %v9476_v57, %v4728_v22  ;;  %v10389_v57 = vld [vmem:[#allocation73_spill] sm:$0xff] }
 0x4d8   : > { %v5126_v32 = vadd.f32 %v5125_v39, %v5029_v7  ;;  %v5212_v45 = vpop.f32.mrf.mxu1  ;;  %v4556_v33 = vsel %vm4541_vm10, %v10389_v57, %v4522_v1 }
 0x4d9   : > { %v4744_v25 = vadd.f32 %v9511_v53, %v4556_v33 }
 0x4da   : > { %v5209_v50 = vadd.f32 %v5208_v41, %v5126_v32 }
 0x4db   : > { %v4520_v34 = vpop.permute.xlu1 %4519  ;;  %v4839_v55 = vadd.f32 %v9502_v40, %v4744_v25 }
 0x4dc   : > { %v5241_v30 = vmul.f32 0.33333334, %v5209_v50  ;;  %v4928_v36 = vpop.f32.mrf.mxu2  ;;  %v4555_v49 = vsel %vm4541_vm10, %v10388_v9, %v4520_v34 }
 0x4dd   : > { %v4929_v38 = vadd.f32 %v4928_v36, %v4831_v47  ;;  %v4736_v26 = vadd.f32 %v9500_v28, %v4555_v49  ;;  %v5046_v20 = vpop.f32.mrf.mxu3 }
 0x4de   : > { %5257 = vst [vmem:[%s9538_s7 + $0x50] sm:$0xff] %v5241_v30 }
 0x4df   : > { %v5129_v4 = vpop.f32.mrf.mxu0  ;;  %v5041_v19 = vadd.f32 %v5040_v54, %v4929_v38  ;;  %v4835_v48 = vadd.f32 %v9489_v18, %v4736_v26 }
 0x4e0   : > { %v5130_v42 = vadd.f32 %v5129_v4, %v5035_v0  ;;  %v5216_v61 = vpop.f32.mrf.mxu1 }
 0x4e2   : > { %v5213_v8 = vadd.f32 %v5212_v45, %v5130_v42 }
 0x4e4   : > { %v5242_v46 = vmul.f32 0.33333334, %v5213_v8  ;;  %v4933_v17 = vpop.f32.mrf.mxu2 }
 0x4e5   : > { %v4934_v5 = vadd.f32 %v4933_v17, %v4835_v48  ;;  %v5052_v63 = vpop.f32.mrf.mxu3 }
 0x4e6   : > { %5258 = vst [vmem:[%s9538_s7 + $0x58] sm:$0xff] %v5242_v46 }
 0x4e7   : > { %v5133_v10 = vpop.f32.mrf.mxu0  ;;  %v5047_v52 = vadd.f32 %v5046_v20, %v4934_v5 }
 0x4e8   : > { %v5134_v14 = vadd.f32 %v5133_v10, %v5041_v19  ;;  %v5220_v15 = vpop.f32.mrf.mxu1 }
 0x4ea   : > { %v5217_v31 = vadd.f32 %v5216_v61, %v5134_v14 }
 0x4eb   : > { %v4524_v21 = vpop.permute.xlu0 %4523 }
 0x4ec   : > { %v5243_v28 = vmul.f32 0.33333334, %v5217_v31  ;;  %v4938_v12 = vpop.f32.mrf.mxu2  ;;  %v4557_v59 = vsel %vm4541_vm10, %v10390_v29, %v4524_v21 }
 0x4ed   : > { %v4939_v44 = vadd.f32 %v4938_v12, %v4839_v55  ;;  %v4752_v53 = vadd.f32 %v9523_v3, %v4557_v59  ;;  %v5058_v35 = vpop.f32.mrf.mxu3 }
 0x4ee   : > { %5259 = vst [vmem:[%s9538_s7 + $0x60] sm:$0xff] %v5243_v28 }
 0x4ef   : > { %v5137_v58 = vpop.f32.mrf.mxu0  ;;  %v5053_v60 = vadd.f32 %v5052_v63, %v4939_v44  ;;  %v4843_v40 = vadd.f32 %v9513_v27, %v4752_v53 }
 0x4f0   : > { %v5138_v18 = vadd.f32 %v5137_v58, %v5047_v52  ;;  %v5224_v2 = vpop.f32.mrf.mxu1 }
 0x4f2   : > { %v5221_v62 = vadd.f32 %v5220_v15, %v5138_v18 }
 0x4f4   : > { %v5244_v41 = vmul.f32 0.33333334, %v5221_v62  ;;  %v4943_v56 = vpop.f32.mrf.mxu2 }
 0x4f5   : > { %v4944_v13 = vadd.f32 %v4943_v56, %v4843_v40 }
 0x4f6   : > { %5260 = vst [vmem:[%s9538_s7 + $0x68] sm:$0xff] %v5244_v41 }
 0x4f7   : > { %v5141_v23 = vpop.f32.mrf.mxu0  ;;  %v5059_v7 = vadd.f32 %v5058_v35, %v4944_v13 }
 0x4f8   : > { %v5142_v6 = vadd.f32 %v5141_v23, %v5053_v60  ;;  %v5228_v43 = vpop.f32.mrf.mxu1 }
 0x4fa   : > { %v5225_v24 = vadd.f32 %v5224_v2, %v5142_v6 }
 0x4fc   : > { %v5245_v37 = vmul.f32 0.33333334, %v5225_v24 }
 0x4fe   : > { %5261 = vst [vmem:[%s9538_s7 + $0x70] sm:$0xff] %v5245_v37 }
 0x4ff   : > { %v5145_v3 = vpop.f32.mrf.mxu0 }
 0x500   : > { %v5146_v39 = vadd.f32 %v5145_v3, %v5059_v7 }
 0x502   : > { %v5229_v27 = vadd.f32 %v5228_v43, %v5146_v39 }
 0x504   : > { %v5246_v32 = vmul.f32 0.33333334, %v5229_v27 }
 0x506   : > { %5262 = vst [vmem:[%s9538_s7 + $0x78] sm:$0xff] %v5246_v32 }
 0x507   : > { %5835 = shalt.err (!%p5832_p3)
}
 0x508   : > { %s5881_s30 = smov 128   ;;  %s5882_s4 = smov 8  }
 0x509   : > { %5642 = dma.vmem_to_hbm [thread:$0]  (%p5941_p5), %s5277_s17, 2048, %s5279_s19, %s5264_s16, %s5881_s30, %s5881_s30, %s5882_s4  }
 0x50a PF: > { %p5648_p4 = scmp.ge.s32.totalorder %s5870_s15, 2  ;;  %s5293_s5 = sand.u32 1, %s5858_s12  }
 0x50b   : > { %s5294_s6 = scalar_lea.sflag [#allocation3], %s5293_s5 }
 0x50c   : > { %p5645_p7 = pnand %p5648_p4, %p5945_p6 }
 0x50e   : > { %p5646_p8 = pneg %p5645_p7 }
 0x510   : > { %5853 = dma.done.wait (%p5646_p8), %s5294_s6, 2048  }
 0x511   : > { %5855 = vsyncadd (%p5646_p8), %s5294_s6, 4294965248  ;;  %p13_p9 = scmp.ge.s32.totalorder %s5928_s18, 4   ;;  %s10391_s12 = smov %s5862_s13 }
 0x512   : > { %s10392_s13 = smov %s5866_s14  ;;  %s10393_s14 = smov %s5939_s21 }
 0x513   : > { %s10394_s15 = smov %s5928_s18  ;;  %15 = sbr.rel (!%p13_p9) target bundleno = 3 (0x3), region = 67 }
 0x518   :  { %5300 = vsyncpa [#allocation3], 1 }
 0x519   :  { %5302 = vsyncpa [#allocation3 + $0x1], 1 }

</bundles_post_ra>
